<compile_context>
chip_gen: v5e
topology: v5e:2x2
jax: 0.10.0
libtpu: 0.0.40
codegen_flags: <defaults>
</compile_context>

<pallas_src>
import functools

import jax
import jax.numpy as jnp
from jax import lax
from jax.experimental import pallas as pl
from jax.experimental.pallas import tpu as pltpu


def _double_conv_kernel(x_ref, w1_ref, sb1_ref, w2_ref, sb2_ref, o_ref, *,
                        true_h, num_h_tiles):
    # x_ref : (1, TH+4, W+4, Cin)  input row-tile; 2-row/col halo, zeros
    #                              outside the image (compute dtype)
    # w1_ref: (9*Cin,  Cmid)       conv1 taps flattened (ky, kx, cin)->rows
    # sb1_ref: (2, Cmid) f32       row 0 = scale, row 1 = bias (conv b + BN)
    # w2_ref: (9*Cmid, Cout)
    # sb2_ref: (2, Cout) f32
    # o_ref : (1, TH, W, Cout) f32
    TH, W, Cout = o_ref.shape[1], o_ref.shape[2], o_ref.shape[3]
    Cin = x_ref.shape[3]
    Cmid = w1_ref.shape[1]
    R1, W1 = TH + 2, W + 2           # conv1 extended output grid (1-halo)

    t = pl.program_id(0) % num_h_tiles   # H-tile index within the image
    x = x_ref[0]                         # (TH+4, W+4, Cin)
    w1 = w1_ref[...]                     # (9*Cin, Cmid)
    w2 = w2_ref[...]                     # (9*Cmid, Cout)

    # ---- conv1: single MXU contraction over an in-register im2col slab ----
    # 3 column-shifted views concatenated along lanes, reused for all 3 dy.
    xc = jnp.concatenate(
        [x[:, 0:W1], x[:, 1:W1 + 1], x[:, 2:W1 + 2]], axis=-1)
    a1 = jnp.concatenate([xc[0:R1], xc[1:R1 + 1], xc[2:R1 + 2]], axis=-1)
    # a1[i, j, (dy*3 + dx)*Cin + c] == x[i + dy, j + dx, c]
    h1 = jnp.dot(a1.reshape(R1 * W1, 9 * Cin), w1,
                 preferred_element_type=jnp.float32)
    h1 = h1 * sb1_ref[0:1, :] + sb1_ref[1:2, :]          # folded bias + BN1
    h1 = jnp.maximum(h1, 0.0).reshape(R1, W1, Cmid)      # ReLU1

    # conv1 was evaluated on a 1-element halo around this tile; zero the
    # positions lying outside the image so they act as conv2's 'same'
    # zero padding (also correct when H was padded up to a tile multiple).
    row_g = (t * TH - 1) + lax.broadcasted_iota(jnp.int32, (R1, W1, 1), 0)
    col_l = lax.broadcasted_iota(jnp.int32, (R1, W1, 1), 1)
    inside = (row_g >= 0) & (row_g < true_h) & (col_l >= 1) & (col_l <= W)
    h1 = jnp.where(inside, h1, 0.0).astype(w2.dtype)

    # ---- conv2: single MXU contraction (K = 9*Cmid) ----
    hc = jnp.concatenate(
        [h1[:, 0:W], h1[:, 1:W + 1], h1[:, 2:W + 2]], axis=-1)
    a2 = jnp.concatenate([hc[0:TH], hc[1:TH + 1], hc[2:TH + 2]], axis=-1)
    h2 = jnp.dot(a2.reshape(TH * W, 9 * Cmid), w2,
                 preferred_element_type=jnp.float32)
    h2 = h2 * sb2_ref[0:1, :] + sb2_ref[1:2, :]          # folded bias + BN2
    h2 = jnp.maximum(h2, 0.0)                            # ReLU2

    o_ref[0] = h2.reshape(TH, W, Cout).astype(o_ref.dtype)


def _fold_bn(conv_bias, gamma, beta, running_mean, running_var, eps=1e-5):
    """Fold conv bias + eval-mode BatchNorm into per-channel scale & bias."""
    scale = gamma / jnp.sqrt(running_var + eps)
    bias = beta - running_mean * scale + conv_bias * scale
    return scale.astype(jnp.float32), bias.astype(jnp.float32)


def _pick_tile_h(H, W, Cin, Cmid, Cout, op_bytes,
                 budget_bytes=24 * 1024 * 1024):
    """Largest H-tile whose per-step VMEM footprint fits a conservative budget
    (sized with headroom for v7x's 64 MiB VMEM; v5e/v6e have 128 MiB)."""
    def est(th):
        b_in = 2 * (th + 4) * (W + 4) * Cin * op_bytes          # 2x-buffered in
        b_out = 2 * th * W * Cout * 4                           # 2x-buffered out
        b_w = 9 * (Cin * Cmid + Cmid * Cout) * op_bytes         # 1x-buffered
        b_live = ((th + 2) * (W + 2) * (9 * Cin * op_bytes + 4 * Cmid)
                  + th * W * (9 * Cmid * op_bytes + 4 * Cout))  # im2col + acts
        return b_in + b_out + b_w + b_live

    th = min(H, 256)
    while th > 8 and est(th) > budget_bytes:
        th = (th + 1) // 2
    return max(min(th, H), 1)


def double_conv(x_nchw, params, *, tile_h=None, compute_dtype=jnp.float32):
    """Forward pass matching PyTorch DoubleConv (eval-mode BatchNorm).

    x_nchw: (N, Cin, H, W) float32
    compute_dtype: matmul operand dtype (jnp.bfloat16 recommended on v6e/v7x);
                   accumulation, BN and ReLU are always float32.
    returns: (N, Cout, H, W) float32
    """
    (w1, b1, g1, be1, rm1, rv1, w2, b2, g2, be2, rm2, rv2) = params

    N, Cin, H, W = x_nchw.shape
    Cmid = w1.shape[0]
    Cout = w2.shape[0]

    op_bytes = jnp.dtype(compute_dtype).itemsize
    TH = tile_h if tile_h is not None else _pick_tile_h(
        H, W, Cin, Cmid, Cout, op_bytes)
    TH = max(1, min(TH, H))
    nT = -(-H // TH)                    # ceil-div
    H_pad = nT * TH

    # NCHW -> NHWC; zero-pad 2 rows/cols per side (conv1 'same' pad plus the
    # 1-row/col halo conv2 needs), plus bottom rows so H is a tile multiple.
    x = jnp.transpose(x_nchw, (0, 2, 3, 1)).astype(compute_dtype)
    x = jnp.pad(x, ((0, 0), (2, 2 + H_pad - H), (2, 2), (0, 0)))

    # Overlapping (2-row halo) row windows laid out contiguously so the kernel
    # uses plain Blocked BlockSpecs; duplicates only 4/TH of the input rows.
    x_tiles = jnp.stack(
        [x[:, t * TH:t * TH + TH + 4] for t in range(nT)], axis=1
    ).reshape(N * nT, TH + 4, W + 4, Cin)

    # OIHW -> (ky, kx, Cin, Cout) -> (9*Cin, Cout): one im2col matmul per conv.
    w1_mat = jnp.transpose(w1, (2, 3, 1, 0)).reshape(9 * Cin, Cmid)
    w2_mat = jnp.transpose(w2, (2, 3, 1, 0)).reshape(9 * Cmid, Cout)
    w1_mat = w1_mat.astype(compute_dtype)
    w2_mat = w2_mat.astype(compute_dtype)

    s1, bb1 = _fold_bn(b1, g1, be1, rm1, rv1)
    s2, bb2 = _fold_bn(b2, g2, be2, rm2, rv2)
    sb1 = jnp.stack([s1, bb1], axis=0)       # (2, Cmid) f32
    sb2 = jnp.stack([s2, bb2], axis=0)       # (2, Cout) f32

    def _const(shape):
        # Grid-invariant operand: single-buffered to halve its VMEM footprint.
        nd = len(shape)
        return pl.BlockSpec(shape, lambda i: (0,) * nd,
                            pipeline_mode=pl.Buffered(1))

    out_tiles = pl.pallas_call(
        functools.partial(_double_conv_kernel, true_h=H, num_h_tiles=nT),
        out_shape=jax.ShapeDtypeStruct((N * nT, TH, W, Cout), jnp.float32),
        grid_spec=pltpu.PrefetchScalarGridSpec(
            num_scalar_prefetch=0,
            grid=(N * nT,),
            in_specs=[
                pl.BlockSpec((1, TH + 4, W + 4, Cin),
                             lambda i: (i, 0, 0, 0)),
                _const((9 * Cin, Cmid)),
                _const((2, Cmid)),
                _const((9 * Cmid, Cout)),
                _const((2, Cout)),
            ],
            out_specs=pl.BlockSpec((1, TH, W, Cout),
                                   lambda i: (i, 0, 0, 0)),
        ),
        compiler_params=pltpu.CompilerParams(
            dimension_semantics=("parallel",),
            vmem_limit_bytes=48 * 1024 * 1024),
    )(x_tiles, w1_mat, sb1, w2_mat, sb2)

    out = out_tiles.reshape(N, H_pad, W, Cout)[:, :H]
    return jnp.transpose(out, (0, 3, 1, 2))      # NHWC -> NCHW


def _reference(x_nchw, params):
    """Pure-JAX reference (lax conv) for correctness checking."""
    (w1, b1, g1, be1, rm1, rv1, w2, b2, g2, be2, rm2, rv2) = params

    def conv_bn_relu(x, w, b, g, be, rm, rv):
        y = lax.conv_general_dilated(
            x, w, window_strides=(1, 1), padding="SAME",
            dimension_numbers=("NCHW", "OIHW", "NCHW"))
        y = y + b[None, :, None, None]
        scale = g / jnp.sqrt(rv + 1e-5)
        bias = be - rm * scale
        y = y * scale[None, :, None, None] + bias[None, :, None, None]
        return jnp.maximum(y, 0.0)

    h = conv_bn_relu(x_nchw, w1, b1, g1, be1, rm1, rv1)
    return conv_bn_relu(h, w2, b2, g2, be2, rm2, rv2)


def _init_params(key, in_channels, out_channels):
    ks = jax.random.split(key, 8)
    fan1 = in_channels * 9
    fan2 = out_channels * 9
    w1 = jax.random.normal(ks[0], (out_channels, in_channels, 3, 3),
                           jnp.float32) / jnp.sqrt(fan1)
    b1 = 0.01 * jax.random.normal(ks[1], (out_channels,), jnp.float32)
    g1 = 1.0 + 0.1 * jax.random.normal(ks[2], (out_channels,), jnp.float32)
    be1 = 0.05 * jax.random.normal(ks[3], (out_channels,), jnp.float32)
    rm1 = 0.1 * jax.random.normal(ks[4], (out_channels,), jnp.float32)
    rv1 = 1.0 + 0.1 * jax.random.uniform(ks[5], (out_channels,), jnp.float32)

    w2 = jax.random.normal(ks[6], (out_channels, out_channels, 3, 3),
                           jnp.float32) / jnp.sqrt(fan2)
    b2 = 0.01 * jax.random.normal(ks[7], (out_channels,), jnp.float32)
    g2 = 1.0 + 0.1 * jnp.cos(jnp.arange(out_channels, dtype=jnp.float32))
    be2 = 0.05 * jnp.sin(jnp.arange(out_channels, dtype=jnp.float32))
    rm2 = 0.1 * jnp.sin(1.0 + jnp.arange(out_channels, dtype=jnp.float32))
    rv2 = 1.0 + 0.05 * jnp.arange(out_channels, dtype=jnp.float32)
    return (w1, b1, g1, be1, rm1, rv1, w2, b2, g2, be2, rm2, rv2)


if __name__ == "__main__":
    N, Cin, Cout, H, W = 2, 4, 8, 16, 16

    key = jax.random.PRNGKey(0)
    kx, kp = jax.random.split(key)
    x = jax.random.normal(kx, (N, Cin, H, W), jnp.float32)
    params = _init_params(kp, Cin, Cout)

    ref = jax.block_until_ready(_reference(x, params))

    # f32 operands, automatic tile size (single H tile at this problem size).
    out = jax.block_until_ready(double_conv(x, params))
    assert out.shape == (N, Cout, H, W)
    assert jnp.allclose(out, ref, atol=1e-4, rtol=1e-4), float(
        jnp.max(jnp.abs(out - ref)))

    # Explicitly exercise the haloed multi-tile path (2 H-tiles per image).
    out_t = jax.block_until_ready(double_conv(x, params, tile_h=8))
    assert jnp.allclose(out_t, ref, atol=1e-4, rtol=1e-4), float(
        jnp.max(jnp.abs(out_t - ref)))

    # bf16 matmul operands (v6e/v7x MXU path); f32 accumulation and BN/ReLU.
    out_bf = jax.block_until_ready(
        double_conv(x, params, tile_h=8, compute_dtype=jnp.bfloat16))
    assert jnp.allclose(out_bf, ref, atol=1e-1, rtol=1e-1), float(
        jnp.max(jnp.abs(out_bf - ref)))

    print("KERNEL_OK")
</pallas_src>

<mosaic_0001>
module attributes {stable_mosaic.version = 11 : i64} {
  func.func @_double_conv_kernel(%arg0: i32, %arg1: memref<1x20x20x4xf32, #tpu.memory_space<vmem>>, %arg2: memref<36x8xf32, #tpu.memory_space<vmem>>, %arg3: memref<2x8xf32, #tpu.memory_space<vmem>>, %arg4: memref<72x8xf32, #tpu.memory_space<vmem>>, %arg5: memref<2x8xf32, #tpu.memory_space<vmem>>, %arg6: memref<1x16x16x8xf32, #tpu.memory_space<vmem>>) attributes {dimension_semantics = [#tpu.dimension_semantics<parallel>], iteration_bounds = array<i64: 2>, scalar_prefetch = 0 : i64, scratch_operands = 0 : i64, tpu.core_type = #tpu.core_type<tc>, window_params = [{transform_indices = @transform_0, window_bounds = array<i64: 1, 20, 20, 4>}, {pipeline_mode = #tpu.pipeline_mode<synchronous>, transform_indices = @transform_1, window_bounds = array<i64: 36, 8>}, {pipeline_mode = #tpu.pipeline_mode<synchronous>, transform_indices = @transform_2, window_bounds = array<i64: 2, 8>}, {pipeline_mode = #tpu.pipeline_mode<synchronous>, transform_indices = @transform_3, window_bounds = array<i64: 72, 8>}, {pipeline_mode = #tpu.pipeline_mode<synchronous>, transform_indices = @transform_4, window_bounds = array<i64: 2, 8>}, {transform_indices = @transform_5, window_bounds = array<i64: 1, 16, 16, 8>}]} {
    %c1_i32 = arith.constant 1 : i32
    %c0_i32 = arith.constant 0 : i32
    %0 = arith.cmpi eq, %c1_i32, %c0_i32 : i32
    %c1_i32_0 = arith.constant 1 : i32
    %1 = arith.select %0, %c1_i32_0, %c1_i32 : i32
    %2 = arith.remsi %arg0, %1 : i32
    %c0_i32_1 = arith.constant 0 : i32
    %3 = arith.cmpi ne, %2, %c0_i32_1 : i32
    %c0_i32_2 = arith.constant 0 : i32
    %4 = arith.cmpi slt, %2, %c0_i32_2 : i32
    %c0_i32_3 = arith.constant 0 : i32
    %5 = arith.cmpi slt, %1, %c0_i32_3 : i32
    %6 = arith.xori %4, %5 : i1
    %7 = arith.andi %6, %3 : i1
    %8 = arith.addi %2, %1 : i32
    %9 = arith.select %7, %8, %2 : i32
    %c0 = arith.constant 0 : index
    %c0_4 = arith.constant 0 : index
    %c0_5 = arith.constant 0 : index
    %c0_6 = arith.constant 0 : index
    %10 = vector.load %arg1[%c0, %c0_4, %c0_5, %c0_6] : memref<1x20x20x4xf32, #tpu.memory_space<vmem>>, vector<1x20x20x4xf32>
    %11 = vector.shape_cast %10 : vector<1x20x20x4xf32> to vector<20x20x4xf32>
    %c0_7 = arith.constant 0 : index
    %c0_8 = arith.constant 0 : index
    %12 = vector.load %arg2[%c0_7, %c0_8] : memref<36x8xf32, #tpu.memory_space<vmem>>, vector<36x8xf32>
    %c0_9 = arith.constant 0 : index
    %c0_10 = arith.constant 0 : index
    %13 = vector.load %arg4[%c0_9, %c0_10] : memref<72x8xf32, #tpu.memory_space<vmem>>, vector<72x8xf32>
    %14 = vector.extract_strided_slice %11 {offsets = [0, 0, 0], sizes = [20, 18, 4], strides = [1, 1, 1]} : vector<20x20x4xf32> to vector<20x18x4xf32>
    %15 = vector.extract_strided_slice %11 {offsets = [0, 1, 0], sizes = [20, 18, 4], strides = [1, 1, 1]} : vector<20x20x4xf32> to vector<20x18x4xf32>
    %16 = vector.extract_strided_slice %11 {offsets = [0, 2, 0], sizes = [20, 18, 4], strides = [1, 1, 1]} : vector<20x20x4xf32> to vector<20x18x4xf32>
    %17 = tpu.concatenate %14, %15, %16 in 2 : vector<20x18x4xf32>, vector<20x18x4xf32>, vector<20x18x4xf32> -> vector<20x18x12xf32>
    %18 = vector.extract_strided_slice %17 {offsets = [0, 0, 0], sizes = [18, 18, 12], strides = [1, 1, 1]} : vector<20x18x12xf32> to vector<18x18x12xf32>
    %19 = vector.extract_strided_slice %17 {offsets = [1, 0, 0], sizes = [18, 18, 12], strides = [1, 1, 1]} : vector<20x18x12xf32> to vector<18x18x12xf32>
    %20 = vector.extract_strided_slice %17 {offsets = [2, 0, 0], sizes = [18, 18, 12], strides = [1, 1, 1]} : vector<20x18x12xf32> to vector<18x18x12xf32>
    %21 = tpu.concatenate %18, %19, %20 in 2 : vector<18x18x12xf32>, vector<18x18x12xf32>, vector<18x18x12xf32> -> vector<18x18x36xf32>
    %22 = vector.shape_cast %21 : vector<18x18x36xf32> to vector<324x36xf32>
    %cst = arith.constant dense<0.000000e+00> : vector<324x8xf32>
    %23 = tpu.matmul %22, %12, %cst {dimension_numbers = #tpu.dot_dimension_numbers<[1], [0], [0], [1], [0, 0, 1, 1], [], []>} : vector<324x36xf32>, vector<36x8xf32>, vector<324x8xf32> -> vector<324x8xf32>
    %c0_11 = arith.constant 0 : index
    %c0_12 = arith.constant 0 : index
    %24 = vector.load %arg3[%c0_11, %c0_12] : memref<2x8xf32, #tpu.memory_space<vmem>>, vector<1x8xf32>
    %25 = vector.broadcast %24 : vector<1x8xf32> to vector<324x8xf32>
    %26 = arith.mulf %23, %25 : vector<324x8xf32>
    %c1 = arith.constant 1 : index
    %c0_13 = arith.constant 0 : index
    %27 = vector.load %arg3[%c1, %c0_13] : memref<2x8xf32, #tpu.memory_space<vmem>>, vector<1x8xf32>
    %28 = vector.broadcast %27 : vector<1x8xf32> to vector<324x8xf32>
    %29 = arith.addf %26, %28 : vector<324x8xf32>
    %cst_14 = arith.constant 0.000000e+00 : f32
    %30 = vector.broadcast %cst_14 : f32 to vector<324x8xf32>
    %31 = arith.maximumf %29, %30 : vector<324x8xf32>
    %32 = vector.shape_cast %31 : vector<324x8xf32> to vector<18x18x8xf32>
    %c16_i32 = arith.constant 16 : i32
    %33 = arith.muli %9, %c16_i32 : i32
    %c1_i32_15 = arith.constant 1 : i32
    %34 = arith.subi %33, %c1_i32_15 : i32
    %35 = tpu.iota {dimensions = array<i32: 0>} : vector<18x18x1xi32>
    %36 = vector.broadcast %34 : i32 to vector<18x18x1xi32>
    %37 = arith.addi %36, %35 : vector<18x18x1xi32>
    %38 = tpu.iota {dimensions = array<i32: 1>} : vector<18x18x1xi32>
    %c0_i32_16 = arith.constant 0 : i32
    %39 = vector.broadcast %c0_i32_16 : i32 to vector<18x18x1xi32>
    %40 = arith.cmpi sge, %37, %39 : vector<18x18x1xi32>
    %c16_i32_17 = arith.constant 16 : i32
    %41 = vector.broadcast %c16_i32_17 : i32 to vector<18x18x1xi32>
    %42 = arith.cmpi slt, %37, %41 : vector<18x18x1xi32>
    %43 = arith.andi %40, %42 : vector<18x18x1xi1>
    %c1_i32_18 = arith.constant 1 : i32
    %44 = vector.broadcast %c1_i32_18 : i32 to vector<18x18x1xi32>
    %45 = arith.cmpi sge, %38, %44 : vector<18x18x1xi32>
    %46 = arith.andi %43, %45 : vector<18x18x1xi1>
    %c16_i32_19 = arith.constant 16 : i32
    %47 = vector.broadcast %c16_i32_19 : i32 to vector<18x18x1xi32>
    %48 = arith.cmpi sle, %38, %47 : vector<18x18x1xi32>
    %49 = arith.andi %46, %48 : vector<18x18x1xi1>
    %cst_20 = arith.constant 0.000000e+00 : f32
    %50 = vector.shape_cast %49 : vector<18x18x1xi1> to vector<18x18x1xi1>
    %51 = vector.broadcast %50 : vector<18x18x1xi1> to vector<18x18x8xi1>
    %52 = vector.broadcast %cst_20 : f32 to vector<18x18x8xf32>
    %53 = arith.select %51, %32, %52 : vector<18x18x8xi1>, vector<18x18x8xf32>
    %54 = vector.extract_strided_slice %53 {offsets = [0, 0, 0], sizes = [18, 16, 8], strides = [1, 1, 1]} : vector<18x18x8xf32> to vector<18x16x8xf32>
    %55 = vector.extract_strided_slice %53 {offsets = [0, 1, 0], sizes = [18, 16, 8], strides = [1, 1, 1]} : vector<18x18x8xf32> to vector<18x16x8xf32>
    %56 = vector.extract_strided_slice %53 {offsets = [0, 2, 0], sizes = [18, 16, 8], strides = [1, 1, 1]} : vector<18x18x8xf32> to vector<18x16x8xf32>
    %57 = tpu.concatenate %54, %55, %56 in 2 : vector<18x16x8xf32>, vector<18x16x8xf32>, vector<18x16x8xf32> -> vector<18x16x24xf32>
    %58 = vector.extract_strided_slice %57 {offsets = [0, 0, 0], sizes = [16, 16, 24], strides = [1, 1, 1]} : vector<18x16x24xf32> to vector<16x16x24xf32>
    %59 = vector.extract_strided_slice %57 {offsets = [1, 0, 0], sizes = [16, 16, 24], strides = [1, 1, 1]} : vector<18x16x24xf32> to vector<16x16x24xf32>
    %60 = vector.extract_strided_slice %57 {offsets = [2, 0, 0], sizes = [16, 16, 24], strides = [1, 1, 1]} : vector<18x16x24xf32> to vector<16x16x24xf32>
    %61 = tpu.concatenate %58, %59, %60 in 2 : vector<16x16x24xf32>, vector<16x16x24xf32>, vector<16x16x24xf32> -> vector<16x16x72xf32>
    %62 = vector.shape_cast %61 : vector<16x16x72xf32> to vector<256x72xf32>
    %cst_21 = arith.constant dense<0.000000e+00> : vector<256x8xf32>
    %63 = tpu.matmul %62, %13, %cst_21 {dimension_numbers = #tpu.dot_dimension_numbers<[1], [0], [0], [1], [0, 0, 1, 1], [], []>} : vector<256x72xf32>, vector<72x8xf32>, vector<256x8xf32> -> vector<256x8xf32>
    %c0_22 = arith.constant 0 : index
    %c0_23 = arith.constant 0 : index
    %64 = vector.load %arg5[%c0_22, %c0_23] : memref<2x8xf32, #tpu.memory_space<vmem>>, vector<1x8xf32>
    %65 = vector.broadcast %64 : vector<1x8xf32> to vector<256x8xf32>
    %66 = arith.mulf %63, %65 : vector<256x8xf32>
    %c1_24 = arith.constant 1 : index
    %c0_25 = arith.constant 0 : index
    %67 = vector.load %arg5[%c1_24, %c0_25] : memref<2x8xf32, #tpu.memory_space<vmem>>, vector<1x8xf32>
    %68 = vector.broadcast %67 : vector<1x8xf32> to vector<256x8xf32>
    %69 = arith.addf %66, %68 : vector<256x8xf32>
    %cst_26 = arith.constant 0.000000e+00 : f32
    %70 = vector.broadcast %cst_26 : f32 to vector<256x8xf32>
    %71 = arith.maximumf %69, %70 : vector<256x8xf32>
    %72 = vector.shape_cast %71 : vector<256x8xf32> to vector<16x16x8xf32>
    %c0_27 = arith.constant 0 : index
    %c0_28 = arith.constant 0 : index
    %c0_29 = arith.constant 0 : index
    %c0_30 = arith.constant 0 : index
    %73 = vector.load %arg6[%c0_27, %c0_28, %c0_29, %c0_30] : memref<1x16x16x8xf32, #tpu.memory_space<vmem>>, vector<1x16x16x8xf32>
    %74 = vector.shape_cast %73 : vector<1x16x16x8xf32> to vector<16x16x8xf32>
    %75 = vector.shape_cast %72 : vector<16x16x8xf32> to vector<1x16x16x8xf32>
    tpu.vector_store %arg6[%c0_27, %c0_28, %c0_29, %c0_30], %75 {strides = array<i32>} : memref<1x16x16x8xf32, #tpu.memory_space<vmem>>, vector<1x16x16x8xf32>,
    return
  }
  func.func @transform_0(%arg0: i32) -> (i32, i32, i32, i32) {
    %c0_i32 = arith.constant 0 : i32
    %c0_i32_0 = arith.constant 0 : i32
    %c0_i32_1 = arith.constant 0 : i32
    %c0_i32_2 = arith.constant 0 : i32
    return %arg0, %c0_i32, %c0_i32_0, %c0_i32_1 : i32, i32, i32, i32
  }
  func.func @transform_1(%arg0: i32) -> (i32, i32) {
    %c0_i32 = arith.constant 0 : i32
    %c0_i32_0 = arith.constant 0 : i32
    %c0_i32_1 = arith.constant 0 : i32
    return %c0_i32, %c0_i32_0 : i32, i32
  }
  func.func @transform_2(%arg0: i32) -> (i32, i32) {
    %c0_i32 = arith.constant 0 : i32
    %c0_i32_0 = arith.constant 0 : i32
    %c0_i32_1 = arith.constant 0 : i32
    return %c0_i32, %c0_i32_0 : i32, i32
  }
  func.func @transform_3(%arg0: i32) -> (i32, i32) {
    %c0_i32 = arith.constant 0 : i32
    %c0_i32_0 = arith.constant 0 : i32
    %c0_i32_1 = arith.constant 0 : i32
    return %c0_i32, %c0_i32_0 : i32, i32
  }
  func.func @transform_4(%arg0: i32) -> (i32, i32) {
    %c0_i32 = arith.constant 0 : i32
    %c0_i32_0 = arith.constant 0 : i32
    %c0_i32_1 = arith.constant 0 : i32
    return %c0_i32, %c0_i32_0 : i32, i32
  }
  func.func @transform_5(%arg0: i32) -> (i32, i32, i32, i32) {
    %c0_i32 = arith.constant 0 : i32
    %c0_i32_0 = arith.constant 0 : i32
    %c0_i32_1 = arith.constant 0 : i32
    %c0_i32_2 = arith.constant 0 : i32
    return %arg0, %c0_i32, %c0_i32_0, %c0_i32_1 : i32, i32, i32, i32
  }
}

</mosaic_0001>

<bundles_post_ra>
// kernel: tpu_custom_call.1
= control target key start
LH: loop header
LB: loop body
LE: loop exit
PB: predicated region body
PF: predicated region fallthrough
CT: control target
= control target key end

     0   :  { %s4225_s18 = smov 0   ;;  %s7147_s0 = inlined_call_operand.vmem [shape: f32[2,20,20,4], index: 0, kind: input, shape index: {}]   ;;  %s7148_s1 = inlined_call_operand.vmem [shape: f32[36,8], index: 1, kind: input, shape index: {}]   ;;  %s7149_s2 = inlined_call_operand.vmem [shape: f32[2,8], index: 2, kind: input, shape index: {}]   ;;  %s7150_s3 = inlined_call_operand.vmem [shape: f32[72,8], index: 3, kind: input, shape index: {}]   ;;  %s7151_s4 = inlined_call_operand.vmem [shape: f32[2,8], index: 4, kind: input, shape index: {}]   ;;  %s7152_s5 = inlined_call_operand.vmem [shape: f32[2,16,16,8], index: 5, kind: output, shape index: {}]  }
   0x1 LB: > { %s3998_s19 = sadd.s32 4294967295, %s4186_s18   ;;  %p4002_p0 = scmp.ge.s32.totalorder %s4186_s18, 1  ;;  %s4186_s18 = sphi %s4225_s18, %s15_s18  }
   0x2   : > { %p187_p1 = scmp.lt.s32.totalorder %s4186_s18, 3 }
   0x4   : > { %p188_p2 = pnand %p4002_p0, %p187_p1 }
   0x6   : > { %191 = sbr.rel (%p188_p2) target bundleno = 1581 (0x62d), region = 40 }
   0xb   : > { %p215_p3 = scmp.lt.s32.totalorder %s3998_s19, 1  ;;  %vm359_vm0 = vcmask 1046528   ;;  %s4188_s24 = smov 4   ;;  %vm640_vm1 = vcmask 1045504   ;;  %vm921_vm2 = vcmask 31744   ;;  %vm982_vm3 = vcmask 64512  }
   0xc   : > { %s4189_s25 = smov 8   ;;  %s4190_s26 = smov 12   ;;  %vm1989_vm4 = vcmask 1043456   ;;  %vm1424_vm5 = vcmask 97280   ;;  %vm1479_vm6 = vcmask 195584   ;;  %vm1906_vm7 = vcmask 293888  }
   0xd   : > { %s7375_s19 = smov (!%p215_p3, %s3998_s19), 1  ;;  %s4191_s27 = smov 24   ;;  %vm3273_vm10 = vcmask 130048   ;;  %vm3568_vm11 = vcmask 392192   ;;  %vm3601_vm12 = vcmask 588800  }
   0xe   : > { %s4102_s20 = smul.u32 480, %s7375_s19  ;;  %s4193_s17 = smov 16  }
   0xf   : > { %s4082_s28 = sshll.u32 %s7375_s19, 8 }
  0x10   : > { %s4239_s23 = scalar_lea.vmem %s7147_s0, %s4102_s20  ;;  %s6860_s6 = scalar_lea.vmem %s7152_s5, %s4082_s28 }
  0x11   : > { %v4242_v0 = vld [vmem:[%s4239_s23 + $0x28] sm:$0xf]  ;;  %v4245_v1 = vld [vmem:[%s4239_s23 + $0x10] sm:$0xf]  ;;  %v4248_v2 = vld [vmem:[%s4239_s23] sm:$0xff] }
  0x12   : > { %v368_v3 = vrot.slane %v4242_v0, 1  ;;  %v363_v4 = vrot.slane %v4245_v1, 1  ;;  %v4253_v5 = vld [vmem:[%s4239_s23 + $0x8] sm:$0xff]  ;;  %v360_v6 = vrot.slane %v4248_v2, 1  ;;  %v4257_v7 = vld [vmem:[%s4239_s23 + $0x20] sm:$0xff]  ;;  %v4260_v8 = vld [vmem:[%s4239_s23 + $0x18] sm:$0xff] }
  0x13   : > { %v361_v9 = vrot.slane %v4253_v5, 1  ;;  %v366_v11 = vrot.slane %v4257_v7, 1  ;;  %v365_v12 = vrot.slane %v4260_v8, 1  ;;  %v4272_v15 = vld [vmem:[%s4239_s23 + $0x40] sm:$0xf]  ;;  %v4275_v16 = vld [vmem:[%s4239_s23 + $0x38] sm:$0xff] }
  0x14   : > { %470 = vrot.lane.b32.xlu2 %v368_v3, %s4188_s24  ;;  %464 = vrot.lane.b32.xlu1 %v363_v4, %s4188_s24  ;;  %v4281_v18 = vld [vmem:[%s4239_s23 + $0x30] sm:$0xff]  ;;  %v373_v19 = vrot.slane %v4272_v15, 1  ;;  %v371_v20 = vrot.slane %v4275_v16, 1  ;;  %v4289_v23 = vld [vmem:[%s4239_s23 + $0x58] sm:$0xf] }
  0x15   : > { %v362_v10 = vsel %vm359_vm0, %v360_v6, %v361_v9  ;;  %v369_v13 = vsel %vm359_vm0, %v366_v11, %v368_v3  ;;  %v367_v14 = vsel %vm359_vm0, %v365_v12, %v366_v11  ;;  %v364_v17 = vsel %vm359_vm0, %v361_v9, %v363_v4  ;;  %v4292_v24 = vld [vmem:[%s4239_s23 + $0x50] sm:$0xff]  ;;  %v4298_v26 = vld [vmem:[%s4239_s23 + $0x48] sm:$0xff]  ;;  %v4315_v34 = vld [vmem:[%s4239_s23 + $0x60] sm:$0xff] }
  0x16   : > { %460 = vrot.lane.b32.xlu0 %v362_v10, %s4188_s24  ;;  %v370_v21 = vrot.slane %v4281_v18, 1  ;;  %v374_v22 = vsel %vm359_vm0, %v371_v20, %v373_v19  ;;  %v378_v27 = vrot.slane %v4289_v23, 1  ;;  %v376_v28 = vrot.slane %v4292_v24, 1  ;;  %v4306_v31 = vld [vmem:[%s4239_s23 + $0x70] sm:$0xf]  ;;  %v4309_v32 = vld [vmem:[%s4239_s23 + $0x68] sm:$0xff] }
  0x17   : > { %v375_v29 = vrot.slane %v4298_v26, 1  ;;  %v383_v35 = vrot.slane %v4306_v31, 1  ;;  %v381_v36 = vrot.slane %v4309_v32, 1  ;;  %v380_v37 = vrot.slane %v4315_v34, 1  ;;  %v4323_v39 = vld [vmem:[%s4239_s23 + $0x88] sm:$0xf] }
  0x18   : > { %v372_v25 = vsel %vm359_vm0, %v370_v21, %v371_v20  ;;  %v379_v30 = vsel %vm359_vm0, %v376_v28, %v378_v27  ;;  %v4326_v40 = vld [vmem:[%s4239_s23 + $0x80] sm:$0xff]  ;;  %v4332_v42 = vld [vmem:[%s4239_s23 + $0x78] sm:$0xff]  ;;  %v388_v43 = vrot.slane %v4323_v39, 1  ;;  %v4349_v50 = vld [vmem:[%s4239_s23 + $0x90] sm:$0xff] }
  0x19   : > { %v377_v33 = vsel %vm359_vm0, %v375_v29, %v376_v28  ;;  %v384_v38 = vsel %vm359_vm0, %v381_v36, %v383_v35  ;;  %v382_v41 = vsel %vm359_vm0, %v380_v37, %v381_v36  ;;  %v386_v44 = vrot.slane %v4326_v40, 1  ;;  %v4340_v47 = vld [vmem:[%s4239_s23 + $0xa0] sm:$0xf]  ;;  %v4343_v48 = vld [vmem:[%s4239_s23 + $0x98] sm:$0xff]  ;;  %v4360_v56 = vld [vmem:[%s4239_s23 + $0xb0] sm:$0xff] }
  0x1a   : > { %v385_v45 = vrot.slane %v4332_v42, 1  ;;  %v393_v51 = vrot.slane %v4340_v47, 1  ;;  %v391_v52 = vrot.slane %v4343_v48, 1  ;;  %v390_v53 = vrot.slane %v4349_v50, 1  ;;  %v4357_v55 = vld [vmem:[%s4239_s23 + $0xb8] sm:$0xf] }
  0x1b   : > { %v389_v46 = vsel %vm359_vm0, %v386_v44, %v388_v43  ;;  %v4366_v58 = vld [vmem:[%s4239_s23 + $0xa8] sm:$0xff]  ;;  %v398_v59 = vrot.slane %v4357_v55, 1  ;;  %v396_v60 = vrot.slane %v4360_v56, 1  ;;  %v4374_v63 = vld [vmem:[%s4239_s23 + $0xd0] sm:$0xf]  ;;  %v4383_v6 = vld [vmem:[%s4239_s23 + $0xc0] sm:$0xff] }
  0x1c   : > { %468 = vrot.lane.b32.xlu2 %v369_v13, %s4188_s24  ;;  %466 = vrot.lane.b32.xlu1 %v367_v14, %s4188_s24  ;;  %v387_v49 = vsel %vm359_vm0, %v385_v45, %v386_v44  ;;  %v394_v54 = vsel %vm359_vm0, %v391_v52, %v393_v51  ;;  %v392_v57 = vsel %vm359_vm0, %v390_v53, %v391_v52  ;;  %v395_v61 = vrot.slane %v4366_v58, 1  ;;  %v4377_v3 = vld [vmem:[%s4239_s23 + $0xc8] sm:$0xff]  ;;  %v4394_v14 = vld [vmem:[%s4239_s23 + $0xe0] sm:$0xff] }
  0x1d   : > { %v399_v62 = vsel %vm359_vm0, %v396_v60, %v398_v59  ;;  %v403_v9 = vrot.slane %v4374_v63, 1  ;;  %v401_v10 = vrot.slane %v4377_v3, 1  ;;  %v400_v11 = vrot.slane %v4383_v6, 1  ;;  %v4391_v13 = vld [vmem:[%s4239_s23 + $0xe8] sm:$0xf]  ;;  %v4411_v28 = vld [vmem:[%s4239_s23 + $0xf8] sm:$0xff] }
  0x1e   : > { %462 = vrot.lane.b32.xlu0 %v364_v17, %s4188_s24  ;;  %v397_v4 = vsel %vm359_vm0, %v395_v61, %v396_v60  ;;  %v408_v20 = vrot.slane %v4391_v13, 1  ;;  %v406_v21 = vrot.slane %v4394_v14, 1  ;;  %v4434_v44 = vld [vmem:[%s4239_s23 + $0x108] sm:$0xff]  ;;  %v4442_v52 = vld [vmem:[%s4239_s23 + $0x130] sm:$0xf] }
  0x1f   : > { %v404_v12 = vsel %vm359_vm0, %v401_v10, %v403_v9  ;;  %v402_v17 = vsel %vm359_vm0, %v400_v11, %v401_v10  ;;  %v4445_v53 = vld [vmem:[%s4239_s23 + $0x128] sm:$0xff]  ;;  %v4464_v10 = vld [vmem:[%s4239_s23 + $0x140] sm:$0xff] }
  0x20   : > { %v421_v60 = vrot.slane %v4445_v53, 1 }
  0x24   : > { %476 = vrot.lane.b32.xlu2 %v373_v19, %s4188_s24  ;;  %474 = vrot.lane.b32.xlu1 %v374_v22, %s4188_s24  ;;  %v4400_v19 = vld [vmem:[%s4239_s23 + $0xd8] sm:$0xff] }
  0x25   : > { %v405_v22 = vrot.slane %v4400_v19, 1 }
  0x26   : > { %472 = vrot.lane.b32.xlu0 %v372_v25, %s4188_s24  ;;  %v409_v25 = vsel %vm359_vm0, %v406_v21, %v408_v20 }
  0x27   : > { %v407_v29 = vsel %vm359_vm0, %v405_v22, %v406_v21 }
  0x2c   : > { %482 = vrot.lane.b32.xlu2 %v378_v27, %s4188_s24  ;;  %480 = vrot.lane.b32.xlu1 %v379_v30, %s4188_s24  ;;  %v4408_v27 = vld [vmem:[%s4239_s23 + $0x100] sm:$0xf]  ;;  %v4417_v30 = vld [vmem:[%s4239_s23 + $0xf0] sm:$0xff] }
  0x2d   : > { %v410_v36 = vrot.slane %v4417_v30, 1 }
  0x2e   : > { %478 = vrot.lane.b32.xlu0 %v377_v33, %s4188_s24  ;;  %v413_v33 = vrot.slane %v4408_v27, 1 }
  0x34   : > { %488 = vrot.lane.b32.xlu2 %v383_v35, %s4188_s24  ;;  %486 = vrot.lane.b32.xlu1 %v384_v38, %s4188_s24  ;;  %v411_v35 = vrot.slane %v4411_v28, 1  ;;  %v4425_v38 = vld [vmem:[%s4239_s23 + $0x118] sm:$0xf] }
  0x35   : > { %v418_v45 = vrot.slane %v4425_v38, 1 }
  0x36   : > { %484 = vrot.lane.b32.xlu0 %v382_v41, %s4188_s24  ;;  %v414_v37 = vsel %vm359_vm0, %v411_v35, %v413_v33  ;;  %v4428_v41 = vld [vmem:[%s4239_s23 + $0x110] sm:$0xff] }
  0x3c   : > { %494 = vrot.lane.b32.xlu2 %v388_v43, %s4188_s24  ;;  %492 = vrot.lane.b32.xlu1 %v389_v46, %s4188_s24  ;;  %v412_v43 = vsel %vm359_vm0, %v410_v36, %v411_v35  ;;  %v416_v46 = vrot.slane %v4428_v41, 1  ;;  %v4489_v36 = vld [vmem:[%s4239_s23 + $0x150] sm:$0xff] }
  0x3e   : > { %490 = vrot.lane.b32.xlu0 %v387_v49, %s4188_s24  ;;  %v415_v49 = vrot.slane %v4434_v44, 1 }
  0x44   : > { %500 = vrot.lane.b32.xlu2 %v393_v51, %s4188_s24  ;;  %498 = vrot.lane.b32.xlu1 %v394_v54, %s4188_s24  ;;  %v419_v51 = vsel %vm359_vm0, %v416_v46, %v418_v45  ;;  %v417_v54 = vsel %vm359_vm0, %v415_v49, %v416_v46  ;;  %v430_v46 = vrot.slane %v4489_v36, 1 }
  0x46   : > { %496 = vrot.lane.b32.xlu0 %v392_v57, %s4188_s24  ;;  %v4451_v57 = vld [vmem:[%s4239_s23 + $0x120] sm:$0xff] }
  0x4c   : > { %506 = vrot.lane.b32.xlu2 %v398_v59, %s4188_s24  ;;  %504 = vrot.lane.b32.xlu1 %v399_v62, %s4188_s24  ;;  %v423_v59 = vrot.slane %v4442_v52, 1  ;;  %v420_v62 = vrot.slane %v4451_v57, 1 }
  0x4e   : > { %502 = vrot.lane.b32.xlu0 %v397_v4, %s4188_s24  ;;  %v424_v4 = vsel %vm359_vm0, %v421_v60, %v423_v59  ;;  %v422_v11 = vsel %vm359_vm0, %v420_v62, %v421_v60  ;;  %v4508_v60 = vld [vmem:[%s4239_s23 + $0x168] sm:$0xff] }
  0x54   : > { %512 = vrot.lane.b32.xlu2 %v403_v9, %s4188_s24  ;;  %510 = vrot.lane.b32.xlu1 %v404_v12, %s4188_s24  ;;  %v4461_v9 = vld [vmem:[%s4239_s23 + $0x148] sm:$0xf]  ;;  %v4470_v12 = vld [vmem:[%s4239_s23 + $0x138] sm:$0xff] }
  0x55   : > { %v425_v22 = vrot.slane %v4470_v12, 1 }
  0x56   : > { %508 = vrot.lane.b32.xlu0 %v402_v17, %s4188_s24  ;;  %v428_v17 = vrot.slane %v4461_v9, 1 }
  0x5c   : > { %518 = vrot.lane.b32.xlu2 %v408_v20, %s4188_s24  ;;  %516 = vrot.lane.b32.xlu1 %v409_v25, %s4188_s24  ;;  %v426_v20 = vrot.slane %v4464_v10, 1 }
  0x5e   : > { %514 = vrot.lane.b32.xlu0 %v407_v29, %s4188_s24  ;;  %v429_v25 = vsel %vm359_vm0, %v426_v20, %v428_v17  ;;  %v4480_v29 = vld [vmem:[%s4239_s23 + $0x160] sm:$0xf]  ;;  %v427_v35 = vsel %vm359_vm0, %v425_v22, %v426_v20  ;;  %v435_v20 = vrot.slane %v4508_v60, 1 }
  0x64   : > { %524 = vrot.lane.b32.xlu2 %v413_v33, %s4188_s24  ;;  %522 = vrot.lane.b32.xlu1 %v414_v37, %s4188_s24  ;;  %v4483_v33 = vld [vmem:[%s4239_s23 + $0x158] sm:$0xff]  ;;  %v433_v37 = vrot.slane %v4480_v29, 1 }
  0x66   : > { %520 = vrot.lane.b32.xlu0 %v412_v43, %s4188_s24  ;;  %v431_v43 = vrot.slane %v4483_v33, 1 }
  0x68   : > { %v434_v49 = vsel %vm359_vm0, %v431_v43, %v433_v37 }
  0x6c   : > { %530 = vrot.lane.b32.xlu2 %v418_v45, %s4188_s24  ;;  %528 = vrot.lane.b32.xlu1 %v419_v51, %s4188_s24  ;;  %v4499_v51 = vld [vmem:[%s4239_s23 + $0x178] sm:$0xf] }
  0x6d   : > { %v438_v62 = vrot.slane %v4499_v51, 1 }
  0x6e   : > { %526 = vrot.lane.b32.xlu0 %v417_v54, %s4188_s24  ;;  %v4456_v61 = vpop.permute.xlu2 %470  ;;  %v4502_v54 = vld [vmem:[%s4239_s23 + $0x170] sm:$0xff] }
  0x6f   : > { %7182 = vst [vmem:[#allocation2_spill] sm:$0xff] %v4456_v61 }
  0x74   : > { %536 = vrot.lane.b32.xlu2 %v423_v59, %s4188_s24  ;;  %534 = vrot.lane.b32.xlu1 %v424_v4, %s4188_s24  ;;  %v432_v59 = vsel %vm359_vm0, %v430_v46, %v431_v43  ;;  %v436_v4 = vrot.slane %v4502_v54, 1  ;;  %v4531_v46 = vld [vmem:[%s4239_s23 + $0x180] sm:$0xff] }
  0x75   : > { %7188 = vst [vmem:[#allocation8_spill] sm:$0xff] %v4531_v46 }
  0x76   : > { %532 = vrot.lane.b32.xlu0 %v422_v11, %s4188_s24  ;;  %v4475_v21 = vpop.permute.xlu2 %468  ;;  %v437_v43 = vsel %vm359_vm0, %v435_v20, %v436_v4  ;;  %v4545_v20 = vld [vmem:[%s4239_s23 + $0x1a8] sm:$0xf] }
  0x77   : > { %7183 = vst [vmem:[#allocation3_spill] sm:$0xff] %v4475_v21 }
  0x78   : > { %7192 = vst [vmem:[#allocation12_spill] sm:$0xff] %v4545_v20 }
  0x7c   : > { %542 = vrot.lane.b32.xlu2 %v428_v17, %s4188_s24  ;;  %540 = vrot.lane.b32.xlu1 %v429_v25, %s4188_s24  ;;  %v439_v25 = vsel %vm359_vm0, %v436_v4, %v438_v62 }
  0x7e   : > { %538 = vrot.lane.b32.xlu0 %v427_v35, %s4188_s24  ;;  %v4494_v45 = vpop.permute.xlu2 %476  ;;  %v4522_v35 = vld [vmem:[%s4239_s23 + $0x190] sm:$0xf] }
  0x7f   : > { %7184 = vst [vmem:[#allocation4_spill] sm:$0xff] %v4494_v45 }
  0x84   : > { %548 = vrot.lane.b32.xlu2 %v433_v37, %s4188_s24  ;;  %546 = vrot.lane.b32.xlu1 %v434_v49, %s4188_s24  ;;  %v4525_v37 = vld [vmem:[%s4239_s23 + $0x188] sm:$0xff]  ;;  %v443_v49 = vrot.slane %v4522_v35, 1 }
  0x86   : > { %544 = vrot.lane.b32.xlu0 %v432_v59, %s4188_s24  ;;  %v4513_v11 = vpop.permute.xlu2 %482  ;;  %v4515_v17 = vpop.permute.xlu1 %464  ;;  %v441_v59 = vrot.slane %v4525_v37, 1 }
  0x87   : > { %7185 = vst [vmem:[#allocation5_spill] sm:$0xff] %v4513_v11  ;;  %v440_v11 = vrot.slane %v4531_v46, 1 }
  0x88   : > { %7186 = vst [vmem:[#allocation6_spill] sm:$0xff] %v4515_v17  ;;  %v4518_v22 = vpop.permute.xlu0 %460 }
  0x89   : > { %7187 = vst [vmem:[#allocation7_spill] sm:$0xff] %v4518_v22  ;;  %v442_v45 = vsel %vm359_vm0, %v440_v11, %v441_v59 }
  0x8c   : > { %554 = vrot.lane.b32.xlu2 %v438_v62, %s4188_s24  ;;  %552 = vrot.lane.b32.xlu1 %v439_v25, %s4188_s24  ;;  %v444_v62 = vsel %vm359_vm0, %v441_v59, %v443_v49  ;;  %v4548_v25 = vld [vmem:[%s4239_s23 + $0x1a0] sm:$0xff] }
  0x8d   : > { %7193 = vst [vmem:[#allocation13_spill] sm:$0xff] %v4548_v25  ;;  %v4568_v59 = vld [vmem:[%s4239_s23 + $0x1c0] sm:$0xf] }
  0x8e   : > { %550 = vrot.lane.b32.xlu0 %v437_v43, %s4188_s24  ;;  %v4536_v17 = vpop.permute.xlu2 %488  ;;  %v4538_v22 = vpop.permute.xlu1 %466  ;;  %v4554_v43 = vld [vmem:[%s4239_s23 + $0x198] sm:$0xff]  ;;  %7198 = vst [vmem:[#allocation18_spill] sm:$0xff] %v4568_v59 }
  0x8f   : > { %7189 = vst [vmem:[#allocation9_spill] sm:$0xff] %v4536_v17  ;;  %v448_v17 = vrot.slane %v4545_v20, 1  ;;  %v445_v61 = vrot.slane %v4554_v43, 1 }
  0x90   : > { %7190 = vst [vmem:[#allocation10_spill] sm:$0xff] %v4538_v22  ;;  %v4541_v4 = vpop.permute.xlu0 %462 }
  0x91   : > { %7191 = vst [vmem:[#allocation11_spill] sm:$0xff] %v4541_v4  ;;  %v446_v4 = vrot.slane %v4548_v25, 1 }
  0x92   : > { %7194 = vst [vmem:[#allocation14_spill] sm:$0xff] %v4554_v43 }
  0x93   : > { %v447_v25 = vsel %vm359_vm0, %v445_v61, %v446_v4 }
  0x94   : > { %560 = vrot.lane.b32.xlu2 %v443_v49, %s4188_s24  ;;  %558 = vrot.lane.b32.xlu1 %v444_v62, %s4188_s24  ;;  %v449_v49 = vsel %vm359_vm0, %v446_v4, %v448_v17  ;;  %v4571_v62 = vld [vmem:[%s4239_s23 + $0x1b8] sm:$0xff] }
  0x95   : > { %7199 = vst [vmem:[#allocation19_spill] sm:$0xff] %v4571_v62  ;;  %v4591_v4 = vld [vmem:[%s4239_s23 + $0x1d8] sm:$0xf] }
  0x96   : > { %556 = vrot.lane.b32.xlu0 %v442_v45, %s4188_s24  ;;  %v4559_v22 = vpop.permute.xlu2 %494  ;;  %v4561_v21 = vpop.permute.xlu1 %474  ;;  %v4577_v45 = vld [vmem:[%s4239_s23 + $0x1b0] sm:$0xff] }
  0x97   : > { %7195 = vst [vmem:[#allocation15_spill] sm:$0xff] %v4559_v22  ;;  %v453_v22 = vrot.slane %v4568_v59, 1  ;;  %v450_v20 = vrot.slane %v4577_v45, 1 }
  0x98   : > { %7196 = vst [vmem:[#allocation16_spill] sm:$0xff] %v4561_v21  ;;  %v4564_v11 = vpop.permute.xlu0 %472 }
  0x99   : > { %7197 = vst [vmem:[#allocation17_spill] sm:$0xff] %v4564_v11  ;;  %v451_v11 = vrot.slane %v4571_v62, 1 }
  0x9a   : > { %7200 = vst [vmem:[#allocation20_spill] sm:$0xff] %v4577_v45 }
  0x9b   : > { %v452_v59 = vsel %vm359_vm0, %v450_v20, %v451_v11 }
  0x9c   : > { %566 = vrot.lane.b32.xlu2 %v448_v17, %s4188_s24  ;;  %564 = vrot.lane.b32.xlu1 %v449_v49, %s4188_s24  ;;  %v454_v17 = vsel %vm359_vm0, %v451_v11, %v453_v22  ;;  %v4594_v49 = vld [vmem:[%s4239_s23 + $0x1d0] sm:$0xff]  ;;  %v644_v11 = vrot.slane %v4245_v1, 2  ;;  %v649_v1 = vrot.slane %v4242_v0, 2 }
  0x9e   : > { %562 = vrot.lane.b32.xlu0 %v447_v25, %s4188_s24  ;;  %v4582_v21 = vpop.permute.xlu2 %500  ;;  %v4584_v43 = vpop.permute.xlu1 %480  ;;  %v4600_v25 = vld [vmem:[%s4239_s23 + $0x1c8] sm:$0xff] }
  0x9f   : > { %7201 = vst [vmem:[#allocation21_spill] sm:$0xff] %v4582_v21  ;;  %v458_v21 = vrot.slane %v4591_v4, 1  ;;  %v455_v62 = vrot.slane %v4600_v25, 1 }
  0xa0   : > { %7202 = vst [vmem:[#allocation22_spill] sm:$0xff] %v4584_v43  ;;  %v4587_v61 = vpop.permute.xlu0 %478  ;;  %v456_v43 = vrot.slane %v4594_v49, 1 }
  0xa1   : > { %7203 = vst [vmem:[#allocation23_spill] sm:$0xff] %v4587_v61 }
  0xa2   : > { %v457_v20 = vsel %vm359_vm0, %v455_v62, %v456_v43 }
  0xa4   : > { %572 = vrot.lane.b32.xlu2 %v453_v22, %s4188_s24  ;;  %570 = vrot.lane.b32.xlu1 %v454_v17, %s4188_s24  ;;  %v459_v22 = vsel %vm359_vm0, %v456_v43, %v458_v21 }
  0xa6   : > { %568 = vrot.lane.b32.xlu0 %v452_v59, %s4188_s24  ;;  %v4605_v61 = vpop.permute.xlu2 %506  ;;  %v4607_v45 = vpop.permute.xlu1 %486  ;;  %v642_v59 = vrot.slane %v4253_v5, 2  ;;  %v647_v5 = vrot.slane %v4257_v7, 2 }
  0xa7   : > { %7204 = vst [vmem:[#allocation24_spill] sm:$0xff] %v4605_v61 }
  0xa8   : > { %7205 = vst [vmem:[#allocation25_spill] sm:$0xff] %v4607_v45  ;;  %v4610_v46 = vpop.permute.xlu0 %484  ;;  %v645_v43 = vsel %vm640_vm1, %v642_v59, %v644_v11 }
  0xa9   : > { %7206 = vst [vmem:[#allocation26_spill] sm:$0xff] %v4610_v46  ;;  %v641_v46 = vrot.slane %v4248_v2, 2 }
  0xac   : > { %578 = vrot.lane.b32.xlu2 %v458_v21, %s4188_s24  ;;  %576 = vrot.lane.b32.xlu1 %v459_v22, %s4188_s24  ;;  %v643_v21 = vsel %vm640_vm1, %v641_v46, %v642_v59  ;;  %v646_v22 = vrot.slane %v4260_v8, 2  ;;  %v650_v46 = vsel %vm640_vm1, %v647_v5, %v649_v1  ;;  %v654_v59 = vrot.slane %v4272_v15, 2 }
  0xae   : > { %574 = vrot.lane.b32.xlu0 %v457_v20, %s4188_s24  ;;  %v4619_v17 = vpop.permute.xlu2 %512  ;;  %v4621_v61 = vpop.permute.xlu1 %492  ;;  %s4194_s24 = smov 48  }
  0xaf   : > { %7207 = vst [vmem:[#allocation27_spill] sm:$0xff] %v4619_v17  ;;  %v651_v17 = vrot.slane %v4281_v18, 2 }
  0xb0   : > { %v4624_v45 = vpop.permute.xlu0 %490 }
  0xb4   : > { %745 = vrot.lane.b32.xlu2 %v644_v11, %s4189_s25  ;;  %743 = vrot.lane.b32.xlu1 %v645_v43, %s4189_s25  ;;  %v648_v11 = vsel %vm640_vm1, %v646_v22, %v647_v5  ;;  %v652_v43 = vrot.slane %v4275_v16, 2  ;;  %v659_v22 = vrot.slane %v4289_v23, 2 }
  0xb6   : > { %741 = vrot.lane.b32.xlu0 %v643_v21, %s4189_s25  ;;  %v4633_v62 = vpop.permute.xlu2 %518  ;;  %v4635_v2 = vpop.permute.xlu1 %498  ;;  %v655_v5 = vsel %vm640_vm1, %v652_v43, %v654_v59 }
  0xb7   : > { %7208 = vst [vmem:[#allocation28_spill] sm:$0xff] %v4633_v62 }
  0xb8   : > { %7209 = vst [vmem:[#allocation29_spill] sm:$0xff] %v4635_v2  ;;  %v4638_v20 = vpop.permute.xlu0 %496 }
  0xbc   : > { %751 = vrot.lane.b32.xlu2 %v649_v1, %s4189_s25  ;;  %749 = vrot.lane.b32.xlu1 %v650_v46, %s4189_s25  ;;  %v653_v1 = vsel %vm640_vm1, %v651_v17, %v652_v43  ;;  %v657_v46 = vrot.slane %v4292_v24, 2  ;;  %v664_v43 = vrot.slane %v4306_v31, 2 }
  0xbe   : > { %747 = vrot.lane.b32.xlu0 %v648_v11, %s4189_s25  ;;  %v4647_v21 = vpop.permute.xlu2 %524  ;;  %v4649_v62 = vpop.permute.xlu1 %504  ;;  %v660_v17 = vsel %vm640_vm1, %v657_v46, %v659_v22 }
  0xbf   : > { %7210 = vst [vmem:[#allocation30_spill] sm:$0xff] %v4647_v21 }
  0xc0   : > { %7211 = vst [vmem:[#allocation31_spill] sm:$0xff] %v4649_v62  ;;  %v4652_v2 = vpop.permute.xlu0 %502  ;;  %v656_v62 = vrot.slane %v4298_v26, 2 }
  0xc1   : > { %7212 = vst [vmem:[#allocation32_spill] sm:$0xff] %v4652_v2 }
  0xc4   : > { %757 = vrot.lane.b32.xlu2 %v654_v59, %s4189_s25  ;;  %755 = vrot.lane.b32.xlu1 %v655_v5, %s4189_s25  ;;  %v658_v59 = vsel %vm640_vm1, %v656_v62, %v657_v46  ;;  %v662_v5 = vrot.slane %v4309_v32, 2  ;;  %v669_v46 = vrot.slane %v4323_v39, 2 }
  0xc6   : > { %753 = vrot.lane.b32.xlu0 %v653_v1, %s4189_s25  ;;  %v4661_v11 = vpop.permute.xlu2 %530  ;;  %v4663_v21 = vpop.permute.xlu1 %510  ;;  %v665_v62 = vsel %vm640_vm1, %v662_v5, %v664_v43 }
  0xc7   : > { %7213 = vst [vmem:[#allocation33_spill] sm:$0xff] %v4661_v11 }
  0xc8   : > { %7214 = vst [vmem:[#allocation34_spill] sm:$0xff] %v4663_v21  ;;  %v4666_v2 = vpop.permute.xlu0 %508 }
  0xc9   : > { %7215 = vst [vmem:[#allocation35_spill] sm:$0xff] %v4666_v2  ;;  %v661_v2 = vrot.slane %v4315_v34, 2 }
  0xcc   : > { %763 = vrot.lane.b32.xlu2 %v659_v22, %s4189_s25  ;;  %761 = vrot.lane.b32.xlu1 %v660_v17, %s4189_s25  ;;  %v663_v22 = vsel %vm640_vm1, %v661_v2, %v662_v5  ;;  %v667_v17 = vrot.slane %v4326_v40, 2  ;;  %v674_v5 = vrot.slane %v4340_v47, 2 }
  0xce   : > { %759 = vrot.lane.b32.xlu0 %v658_v59, %s4189_s25  ;;  %v4675_v1 = vpop.permute.xlu2 %536  ;;  %v4677_v11 = vpop.permute.xlu1 %516  ;;  %v670_v2 = vsel %vm640_vm1, %v667_v17, %v669_v46 }
  0xcf   : > { %7216 = vst [vmem:[#allocation36_spill] sm:$0xff] %v4675_v1 }
  0xd0   : > { %7217 = vst [vmem:[#allocation37_spill] sm:$0xff] %v4677_v11  ;;  %v4680_v21 = vpop.permute.xlu0 %514 }
  0xd1   : > { %7218 = vst [vmem:[#allocation38_spill] sm:$0xff] %v4680_v21  ;;  %v666_v21 = vrot.slane %v4332_v42, 2 }
  0xd4   : > { %769 = vrot.lane.b32.xlu2 %v664_v43, %s4189_s25  ;;  %767 = vrot.lane.b32.xlu1 %v665_v62, %s4189_s25  ;;  %v668_v43 = vsel %vm640_vm1, %v666_v21, %v667_v17  ;;  %v672_v62 = vrot.slane %v4343_v48, 2  ;;  %v679_v17 = vrot.slane %v4357_v55, 2 }
  0xd6   : > { %765 = vrot.lane.b32.xlu0 %v663_v22, %s4189_s25  ;;  %v4689_v59 = vpop.permute.xlu2 %542  ;;  %v4691_v1 = vpop.permute.xlu1 %522  ;;  %v675_v21 = vsel %vm640_vm1, %v672_v62, %v674_v5 }
  0xd7   : > { %7219 = vst [vmem:[#allocation39_spill] sm:$0xff] %v4689_v59 }
  0xd8   : > { %7220 = vst [vmem:[#allocation40_spill] sm:$0xff] %v4691_v1  ;;  %v4694_v11 = vpop.permute.xlu0 %520  ;;  %v671_v1 = vrot.slane %v4349_v50, 2 }
  0xd9   : > { %7221 = vst [vmem:[#allocation41_spill] sm:$0xff] %v4694_v11 }
  0xdc   : > { %775 = vrot.lane.b32.xlu2 %v669_v46, %s4189_s25  ;;  %773 = vrot.lane.b32.xlu1 %v670_v2, %s4189_s25  ;;  %v673_v46 = vsel %vm640_vm1, %v671_v1, %v672_v62  ;;  %v677_v2 = vrot.slane %v4360_v56, 2  ;;  %v684_v62 = vrot.slane %v4374_v63, 2 }
  0xde   : > { %771 = vrot.lane.b32.xlu0 %v668_v43, %s4189_s25  ;;  %v4703_v22 = vpop.permute.xlu2 %548  ;;  %v4705_v59 = vpop.permute.xlu1 %528  ;;  %v680_v1 = vsel %vm640_vm1, %v677_v2, %v679_v17 }
  0xdf   : > { %7222 = vst [vmem:[#allocation42_spill] sm:$0xff] %v4703_v22 }
  0xe0   : > { %7223 = vst [vmem:[#allocation43_spill] sm:$0xff] %v4705_v59  ;;  %v4708_v11 = vpop.permute.xlu0 %526  ;;  %v676_v59 = vrot.slane %v4366_v58, 2 }
  0xe1   : > { %7224 = vst [vmem:[#allocation44_spill] sm:$0xff] %v4708_v11 }
  0xe4   : > { %781 = vrot.lane.b32.xlu2 %v674_v5, %s4189_s25  ;;  %779 = vrot.lane.b32.xlu1 %v675_v21, %s4189_s25  ;;  %v678_v5 = vsel %vm640_vm1, %v676_v59, %v677_v2  ;;  %v682_v21 = vrot.slane %v4377_v3, 2  ;;  %v689_v2 = vrot.slane %v4391_v13, 2  ;;  %v694_v13 = vrot.slane %v4408_v27, 2 }
  0xe5   : > { %v699_v27 = vrot.slane %v4425_v38, 2  ;;  %v704_v38 = vrot.slane %v4442_v52, 2  ;;  %v709_v52 = vrot.slane %v4461_v9, 2  ;;  %v714_v9 = vrot.slane %v4480_v29, 2 }
  0xe6   : > { %777 = vrot.lane.b32.xlu0 %v673_v46, %s4189_s25  ;;  %v4717_v43 = vpop.permute.xlu2 %554  ;;  %v4719_v22 = vpop.permute.xlu1 %534  ;;  %v685_v59 = vsel %vm640_vm1, %v682_v21, %v684_v62  ;;  %v719_v29 = vrot.slane %v4499_v51, 2  ;;  %v724_v51 = vrot.slane %v4522_v35, 2 }
  0xe7   : > { %7225 = vst [vmem:[#allocation45_spill] sm:$0xff] %v4717_v43 }
  0xe8   : > { %7226 = vst [vmem:[#allocation46_spill] sm:$0xff] %v4719_v22  ;;  %v4722_v11 = vpop.permute.xlu0 %532  ;;  %v681_v22 = vrot.slane %v4383_v6, 2 }
  0xe9   : > { %7227 = vst [vmem:[#allocation47_spill] sm:$0xff] %v4722_v11 }
  0xec   : > { %787 = vrot.lane.b32.xlu2 %v679_v17, %s4189_s25  ;;  %785 = vrot.lane.b32.xlu1 %v680_v1, %s4189_s25  ;;  %v683_v17 = vsel %vm640_vm1, %v681_v22, %v682_v21  ;;  %v687_v1 = vrot.slane %v4394_v14, 2  ;;  %v692_v14 = vrot.slane %v4411_v28, 2  ;;  %v697_v28 = vrot.slane %v4428_v41, 2 }
  0xed   : > { %v702_v41 = vrot.slane %v4445_v53, 2  ;;  %v707_v53 = vrot.slane %v4464_v10, 2  ;;  %v712_v10 = vrot.slane %v4483_v33, 2  ;;  %v717_v33 = vrot.slane %v4502_v54, 2 }
  0xee   : > { %783 = vrot.lane.b32.xlu0 %v678_v5, %s4189_s25  ;;  %v4731_v46 = vpop.permute.xlu2 %560  ;;  %v4733_v43 = vpop.permute.xlu1 %540  ;;  %v690_v22 = vsel %vm640_vm1, %v687_v1, %v689_v2  ;;  %v722_v54 = vrot.slane %v4525_v37, 2 }
  0xef   : > { %7228 = vst [vmem:[#allocation48_spill] sm:$0xff] %v4731_v46 }
  0xf0   : > { %7229 = vst [vmem:[#allocation49_spill] sm:$0xff] %v4733_v43  ;;  %v4736_v11 = vpop.permute.xlu0 %538  ;;  %v686_v43 = vrot.slane %v4400_v19, 2  ;;  %v691_v19 = vrot.slane %v4417_v30, 2  ;;  %v696_v30 = vrot.slane %v4434_v44, 2  ;;  %v701_v44 = vrot.slane %v4451_v57, 2 }
  0xf1   : > { %7230 = vst [vmem:[#allocation50_spill] sm:$0xff] %v4736_v11  ;;  %v706_v57 = vrot.slane %v4470_v12, 2  ;;  %v711_v12 = vrot.slane %v4489_v36, 2  ;;  %v716_v36 = vrot.slane %v4508_v60, 2  ;;  %v7241_v60 = vld [vmem:[#allocation8_spill] sm:$0xff] }
  0xf4   : > { %793 = vrot.lane.b32.xlu2 %v684_v62, %s4189_s25  ;;  %791 = vrot.lane.b32.xlu1 %v685_v59, %s4189_s25  ;;  %v688_v62 = vsel %vm640_vm1, %v686_v43, %v687_v1  ;;  %v695_v43 = vsel %vm640_vm1, %v692_v14, %v694_v13 }
  0xf6   : > { %789 = vrot.lane.b32.xlu0 %v683_v17, %s4189_s25  ;;  %v4745_v5 = vpop.permute.xlu2 %566  ;;  %v4747_v46 = vpop.permute.xlu1 %546 }
  0xf7   : > { %7231 = vst [vmem:[#allocation51_spill] sm:$0xff] %v4745_v5  ;;  %v7247_v5 = vld [vmem:[#allocation20_spill] sm:$0xff] }
  0xf8   : > { %v4750_v11 = vpop.permute.xlu0 %544 }
  0xfc   : > { %799 = vrot.lane.b32.xlu2 %v689_v2, %s4189_s25  ;;  %797 = vrot.lane.b32.xlu1 %v690_v22, %s4189_s25  ;;  %v693_v2 = vsel %vm640_vm1, %v691_v19, %v692_v14  ;;  %v700_v14 = vsel %vm640_vm1, %v697_v28, %v699_v27 }
  0xfe   : > { %795 = vrot.lane.b32.xlu0 %v688_v62, %s4189_s25  ;;  %v4759_v21 = vpop.permute.xlu2 %572  ;;  %v4761_v59 = vpop.permute.xlu1 %552 }
  0xff   : > { %7232 = vst [vmem:[#allocation52_spill] sm:$0xff] %v4759_v21  ;;  %v7244_v21 = vld [vmem:[#allocation14_spill] sm:$0xff] }
 0x100   : > { %v4764_v17 = vpop.permute.xlu0 %550 }
 0x104   : > { %805 = vrot.lane.b32.xlu2 %v694_v13, %s4189_s25  ;;  %803 = vrot.lane.b32.xlu1 %v695_v43, %s4189_s25  ;;  %v698_v13 = vsel %vm640_vm1, %v696_v30, %v697_v28  ;;  %v705_v28 = vsel %vm640_vm1, %v702_v41, %v704_v38 }
 0x106   : > { %801 = vrot.lane.b32.xlu0 %v693_v2, %s4189_s25  ;;  %v4773_v1 = vpop.permute.xlu2 %578  ;;  %v4775_v22 = vpop.permute.xlu1 %558 }
 0x107   : > { %7233 = vst [vmem:[#allocation53_spill] sm:$0xff] %v4773_v1  ;;  %v725_v1 = vsel %vm640_vm1, %v722_v54, %v724_v51 }
 0x108   : > { %v4778_v62 = vpop.permute.xlu0 %556 }
 0x109   : > { %7234 = vst [vmem:[#allocation54_spill] sm:$0xff] %v4778_v62  ;;  %v7304_v62 = vld [vmem:[#allocation11_spill] sm:$0xff] }
 0x10c   : > { %811 = vrot.lane.b32.xlu2 %v699_v27, %s4189_s25  ;;  %809 = vrot.lane.b32.xlu1 %v700_v14, %s4189_s25  ;;  %v703_v27 = vsel %vm640_vm1, %v701_v44, %v702_v41  ;;  %v710_v41 = vsel %vm640_vm1, %v707_v53, %v709_v52 }
 0x10e   : > { %807 = vrot.lane.b32.xlu0 %v698_v13, %s4189_s25  ;;  %v4787_v19 = vpop.permute.xlu2 %745  ;;  %v4789_v43 = vpop.permute.xlu1 %564 }
 0x10f   : > { %7235 = vst [vmem:[#allocation55_spill] sm:$0xff] %v4789_v43 }
 0x110   : > { %v4792_v2 = vpop.permute.xlu0 %562 }
 0x111   : > { %7236 = vst [vmem:[#allocation56_spill] sm:$0xff] %v4792_v2  ;;  %v7300_v2 = vld [vmem:[#allocation7_spill] sm:$0xff] }
 0x114   : > { %817 = vrot.lane.b32.xlu2 %v704_v38, %s4189_s25  ;;  %815 = vrot.lane.b32.xlu1 %v705_v28, %s4189_s25  ;;  %v708_v38 = vsel %vm640_vm1, %v706_v57, %v707_v53  ;;  %v715_v53 = vsel %vm640_vm1, %v712_v10, %v714_v9 }
 0x116   : > { %813 = vrot.lane.b32.xlu0 %v703_v27, %s4189_s25  ;;  %v4801_v30 = vpop.permute.xlu2 %751  ;;  %v4803_v14 = vpop.permute.xlu1 %570 }
 0x117   : > { %7237 = vst [vmem:[#allocation57_spill] sm:$0xff] %v4803_v14 }
 0x118   : > { %v4806_v13 = vpop.permute.xlu0 %568 }
 0x119   : > { %7238 = vst [vmem:[#allocation58_spill] sm:$0xff] %v4806_v13 }
 0x11c   : > { %823 = vrot.lane.b32.xlu2 %v709_v52, %s4189_s25  ;;  %821 = vrot.lane.b32.xlu1 %v710_v41, %s4189_s25  ;;  %v713_v52 = vsel %vm640_vm1, %v711_v12, %v712_v10  ;;  %v720_v10 = vsel %vm640_vm1, %v717_v33, %v719_v29 }
 0x11e   : > { %819 = vrot.lane.b32.xlu0 %v708_v38, %s4189_s25  ;;  %v4815_v44 = vpop.permute.xlu2 %757  ;;  %v4817_v28 = vpop.permute.xlu1 %576 }
 0x11f   : > { %7239 = vst [vmem:[#allocation59_spill] sm:$0xff] %v4817_v28 }
 0x120   : > { %v4820_v27 = vpop.permute.xlu0 %574 }
 0x121   : > { %7240 = vst [vmem:[#allocation60_spill] sm:$0xff] %v4820_v27 }
 0x124   : > { %829 = vrot.lane.b32.xlu2 %v714_v9, %s4189_s25  ;;  %827 = vrot.lane.b32.xlu1 %v715_v53, %s4189_s25  ;;  %v718_v9 = vsel %vm640_vm1, %v716_v36, %v717_v33  ;;  %v7243_v36 = vld [vmem:[#allocation13_spill] sm:$0xff] }
 0x125   : > { %v727_v37 = vrot.slane %v7243_v36, 2 }
 0x126   : > { %825 = vrot.lane.b32.xlu0 %v713_v52, %s4189_s25  ;;  %v4829_v57 = vpop.permute.xlu2 %763  ;;  %v4831_v41 = vpop.permute.xlu1 %743  ;;  %v721_v52 = vrot.slane %v7241_v60, 2  ;;  %v726_v60 = vrot.slane %v7244_v21, 2  ;;  %v731_v21 = vrot.slane %v7247_v5, 2  ;;  %v736_v5 = vrot.slane %v4600_v25, 2 }
 0x128   : > { %v4834_v38 = vpop.permute.xlu0 %741  ;;  %v723_v33 = vsel %vm640_vm1, %v721_v52, %v722_v54  ;;  %v728_v54 = vsel %vm640_vm1, %v726_v60, %v727_v37  ;;  %v7246_v52 = vld [vmem:[#allocation19_spill] sm:$0xff] }
 0x12c   : > { %835 = vrot.lane.b32.xlu2 %v719_v29, %s4189_s25  ;;  %833 = vrot.lane.b32.xlu1 %v720_v10, %s4189_s25  ;;  %v7242_v29 = vld [vmem:[#allocation12_spill] sm:$0xff] }
 0x12d   : > { %v729_v35 = vrot.slane %v7242_v29, 2  ;;  %v732_v29 = vrot.slane %v7246_v52, 2 }
 0x12e   : > { %831 = vrot.lane.b32.xlu0 %v718_v9, %s4189_s25  ;;  %v4843_v12 = vpop.permute.xlu2 %769  ;;  %v750_v53 = vpop.permute.xlu1 %749 }
 0x12f   : > { %v730_v14 = vsel %vm640_vm1, %v727_v37, %v729_v35  ;;  %v733_v37 = vsel %vm640_vm1, %v731_v21, %v732_v29  ;;  %v7249_v21 = vld [vmem:[#allocation3_spill] sm:$0xff] }
 0x130   : > { %v748_v28 = vpop.permute.xlu0 %747 }
 0x134   : > { %841 = vrot.lane.b32.xlu2 %v724_v51, %s4189_s25  ;;  %839 = vrot.lane.b32.xlu1 %v725_v1, %s4189_s25  ;;  %v7245_v1 = vld [vmem:[#allocation18_spill] sm:$0xff] }
 0x135   : > { %v734_v51 = vrot.slane %v7245_v1, 2 }
 0x136   : > { %837 = vrot.lane.b32.xlu0 %v723_v33, %s4189_s25  ;;  %v4853_v10 = vpop.permute.xlu2 %775  ;;  %v756_v9 = vpop.permute.xlu1 %755 }
 0x137   : > { %v735_v13 = vsel %vm640_vm1, %v732_v29, %v734_v51 }
 0x138   : > { %v754_v27 = vpop.permute.xlu0 %753 }
 0x13c   : > { %847 = vrot.lane.b32.xlu2 %v729_v35, %s4189_s25  ;;  %845 = vrot.lane.b32.xlu1 %v730_v14, %s4189_s25  ;;  %v739_v14 = vrot.slane %v4591_v4, 2  ;;  %v737_v35 = vrot.slane %v4594_v49, 2 }
 0x13e   : > { %843 = vrot.lane.b32.xlu0 %v728_v54, %s4189_s25  ;;  %v4863_v33 = vpop.permute.xlu2 %781  ;;  %v762_v36 = vpop.permute.xlu1 %761  ;;  %v740_v52 = vsel %vm640_vm1, %v737_v35, %v739_v14  ;;  %v738_v29 = vsel %vm640_vm1, %v736_v5, %v737_v35  ;;  %v7250_v5 = vld [vmem:[#allocation10_spill] sm:$0xff] }
 0x140   : > { %v760_v43 = vpop.permute.xlu0 %759 }
 0x144   : > { %853 = vrot.lane.b32.xlu2 %v734_v51, %s4189_s25  ;;  %851 = vrot.lane.b32.xlu1 %v735_v13, %s4189_s25  ;;  %v7248_v51 = vld [vmem:[#allocation2_spill] sm:$0xff] }
 0x145   : > { %v927_v25 = vsel %vm921_vm2, %v4242_v0, %v7248_v51  ;;  %v7252_v51 = vld [vmem:[#allocation16_spill] sm:$0xff] }
 0x146   : > { %849 = vrot.lane.b32.xlu0 %v733_v37, %s4189_s25  ;;  %v4873_v60 = vpop.permute.xlu2 %787  ;;  %v768_v54 = vpop.permute.xlu1 %767  ;;  %v926_v37 = vsel %vm921_vm2, %v4257_v7, %v7249_v21 }
 0x147   : > { %v4896_v35 = vsel %vm982_vm3, %v926_v37, %v750_v53  ;;  %v7253_v37 = vld [vmem:[#allocation17_spill] sm:$0xff] }
 0x148   : > { %v766_v1 = vpop.permute.xlu0 %765 }
 0x14c   : > { %859 = vrot.lane.b32.xlu2 %v739_v14, %s4189_s25  ;;  %857 = vrot.lane.b32.xlu1 %v740_v52, %s4189_s25  ;;  %v4893_v14 = vsel %vm982_vm3, %v927_v25, %v4801_v30  ;;  %v925_v52 = vsel %vm921_vm2, %v4260_v8, %v7250_v5  ;;  %v929_v25 = vsel %vm921_vm2, %v4275_v16, %v7252_v51 }
 0x14d   : > { %v4906_v0 = vsel %vm982_vm3, %v925_v52, %v748_v28  ;;  %v4925_v21 = vsel %vm982_vm3, %v929_v25, %v756_v9  ;;  %v928_v5 = vsel %vm921_vm2, %v4281_v18, %v7253_v37  ;;  %v7254_v52 = vld [vmem:[#allocation5_spill] sm:$0xff]  ;;  %v7256_v25 = vld [vmem:[#allocation23_spill] sm:$0xff] }
 0x14e   : > { %855 = vrot.lane.b32.xlu0 %v738_v29, %s4189_s25  ;;  %v4881_v4 = vpop.permute.xlu2 %793  ;;  %v4883_v49 = vpop.permute.xlu1 %773  ;;  %v7251_v29 = vld [vmem:[#allocation4_spill] sm:$0xff]  ;;  %v933_v18 = vsel %vm921_vm2, %v4289_v23, %v7254_v52  ;;  %v931_v37 = vsel %vm921_vm2, %v4298_v26, %v7256_v25 }
 0x14f   : > { %v930_v8 = vsel %vm921_vm2, %v4272_v15, %v7251_v29  ;;  %v4935_v15 = vsel %vm982_vm3, %v928_v5, %v754_v27  ;;  %v7255_v29 = vld [vmem:[#allocation22_spill] sm:$0xff]  ;;  %v4953_v27 = vsel %vm982_vm3, %v933_v18, %v4829_v57  ;;  %v4966_v23 = vsel %vm982_vm3, %v931_v37, %v760_v43  ;;  %v7257_v5 = vld [vmem:[#allocation25_spill] sm:$0xff] }
 0x150   : > { %v772_v13 = vpop.permute.xlu0 %771  ;;  %v4922_v28 = vsel %vm982_vm3, %v930_v8, %v4815_v44  ;;  %v932_v8 = vsel %vm921_vm2, %v4292_v24, %v7255_v29  ;;  %v935_v26 = vsel %vm921_vm2, %v4309_v32, %v7257_v5  ;;  %v7258_v18 = vld [vmem:[#allocation26_spill] sm:$0xff]  ;;  %v7259_v37 = vld [vmem:[#allocation9_spill] sm:$0xff] }
 0x151   : > { %v4956_v51 = vsel %vm982_vm3, %v932_v8, %v762_v36  ;;  %v4980_v52 = vsel %vm982_vm3, %v935_v26, %v768_v54  ;;  %v934_v43 = vsel %vm921_vm2, %v4315_v34, %v7258_v18  ;;  %v937_v34 = vsel %vm921_vm2, %v4332_v42, %v4624_v45 }
 0x152   : > { %v4990_v29 = vsel %vm982_vm3, %v934_v43, %v766_v1  ;;  %v5004_v25 = vsel %vm982_vm3, %v937_v34, %v772_v13  ;;  %v936_v1 = vsel %vm921_vm2, %v4306_v31, %v7259_v37  ;;  %v938_v31 = vsel %vm921_vm2, %v4326_v40, %v4621_v61  ;;  %v7260_v40 = vld [vmem:[#allocation15_spill] sm:$0xff] }
 0x153   : > { %v5015_v5 = vsel %vm982_vm3, %v936_v1, %v4843_v12  ;;  %v5034_v12 = vsel %vm982_vm3, %v938_v31, %v4883_v49  ;;  %v939_v61 = vsel %vm921_vm2, %v4323_v39, %v7260_v40  ;;  %v940_v34 = vsel %vm921_vm2, %v4349_v50, %v4638_v20  ;;  %v7264_v20 = vld [vmem:[#allocation29_spill] sm:$0xff] }
 0x154   : > { %1101 = vrot.lane.b32.xlu2 %v4893_v14, %s4190_s26  ;;  %1099 = vrot.lane.b32.xlu1 %v4896_v35, %s4190_s26  ;;  %v5052_v49 = vsel %vm982_vm3, %v939_v61, %v4853_v10  ;;  %v941_v10 = vsel %vm921_vm2, %v4343_v48, %v7264_v20  ;;  %v7267_v48 = vld [vmem:[#allocation21_spill] sm:$0xff] }
 0x155   : > { %7261 = vst [vmem:[#allocation8_spill] sm:$0xff] %v5052_v49 }
 0x156   : > { %1097 = vrot.lane.b32.xlu0 %v4906_v0, %s4190_s26  ;;  %v4910_v7 = vpop.permute.xlu2 %799  ;;  %v4912_v30 = vpop.permute.xlu1 %779 }
 0x158   : > { %v778_v53 = vpop.permute.xlu0 %777 }
 0x159   : > { %v5055_v37 = vsel %vm982_vm3, %v940_v34, %v778_v53  ;;  %v5074_v53 = vsel %vm982_vm3, %v941_v10, %v4912_v30  ;;  %v942_v30 = vsel %vm921_vm2, %v4340_v47, %v7267_v48  ;;  %v7268_v34 = vld [vmem:[#allocation32_spill] sm:$0xff] }
 0x15a   : > { %7262 = vst [vmem:[#allocation12_spill] sm:$0xff] %v5055_v37  ;;  %v943_v20 = vsel %vm921_vm2, %v4366_v58, %v7268_v34  ;;  %v5096_v10 = vsel %vm982_vm3, %v942_v30, %v4863_v33  ;;  %v7272_v33 = vld [vmem:[#allocation31_spill] sm:$0xff] }
 0x15b   : > { %7265 = vst [vmem:[#allocation14_spill] sm:$0xff] %v5074_v53 }
 0x15c   : > { %1107 = vrot.lane.b32.xlu2 %v4922_v28, %s4190_s26  ;;  %1105 = vrot.lane.b32.xlu1 %v4925_v21, %s4190_s26  ;;  %7269 = vst [vmem:[#allocation19_spill] sm:$0xff] %v5096_v10 }
 0x15e   : > { %1103 = vrot.lane.b32.xlu0 %v4935_v15, %s4190_s26  ;;  %v4939_v16 = vpop.permute.xlu2 %805  ;;  %v4941_v44 = vpop.permute.xlu1 %785 }
 0x160   : > { %v4943_v9 = vpop.permute.xlu0 %783 }
 0x164   : > { %1113 = vrot.lane.b32.xlu2 %v4953_v27, %s4190_s26  ;;  %1111 = vrot.lane.b32.xlu1 %v4956_v51, %s4190_s26 }
 0x166   : > { %1109 = vrot.lane.b32.xlu0 %v4966_v23, %s4190_s26  ;;  %v4970_v24 = vpop.permute.xlu2 %811  ;;  %v4972_v57 = vpop.permute.xlu1 %791 }
 0x168   : > { %v4974_v36 = vpop.permute.xlu0 %789 }
 0x16c   : > { %1117 = vrot.lane.b32.xlu2 %v4980_v52, %s4190_s26  ;;  %1262 = vrot.lane.b32.xlu1 %v4935_v15, %s4191_s27 }
 0x16e   : > { %1115 = vrot.lane.b32.xlu0 %v4990_v29, %s4190_s26  ;;  %v4994_v32 = vpop.permute.xlu2 %817  ;;  %v4996_v54 = vpop.permute.xlu1 %797 }
 0x170   : > { %v4998_v8 = vpop.permute.xlu0 %795 }
 0x174   : > { %1264 = vrot.lane.b32.xlu1 %v4925_v21, %s4191_s27  ;;  %1121 = vrot.lane.b32.xlu2 %v5004_v25, %s4190_s26 }
 0x176   : > { %1119 = vrot.lane.b32.xlu0 %v5015_v5, %s4190_s26  ;;  %v5019_v42 = vpop.permute.xlu2 %823  ;;  %v5021_v45 = vpop.permute.xlu1 %803 }
 0x178   : > { %v5023_v13 = vpop.permute.xlu0 %801 }
 0x17c   : > { %1268 = vrot.lane.b32.xlu1 %v4966_v23, %s4191_s27  ;;  %1266 = vrot.lane.b32.xlu2 %v4922_v28, %s4191_s27 }
 0x17e   : > { %1123 = vrot.lane.b32.xlu0 %v5034_v12, %s4190_s26  ;;  %v5038_v26 = vpop.permute.xlu2 %829  ;;  %v5040_v18 = vpop.permute.xlu1 %809 }
 0x180   : > { %v5042_v43 = vpop.permute.xlu0 %807 }
 0x184   : > { %1125 = vrot.lane.b32.xlu1 %v5052_v49, %s4190_s26  ;;  %1127 = vrot.lane.b32.xlu2 %v5055_v37, %s4190_s26 }
 0x186   : > { %1270 = vrot.lane.b32.xlu0 %v4956_v51, %s4191_s27  ;;  %v5063_v39 = vpop.permute.xlu2 %835  ;;  %v5065_v1 = vpop.permute.xlu1 %815 }
 0x187   : > { %7263 = vst [vmem:[#allocation13_spill] sm:$0xff] %v5063_v39  ;;  %v5100_v39 = vsel %vm982_vm3, %v943_v20, %v4943_v9  ;;  %v944_v9 = vsel %vm921_vm2, %v4360_v56, %v7272_v33  ;;  %v7275_v56 = vld [vmem:[#allocation24_spill] sm:$0xff] }
 0x188   : > { %v5067_v50 = vpop.permute.xlu0 %813  ;;  %7270 = vst [vmem:[#allocation20_spill] sm:$0xff] %v5100_v39  ;;  %v5119_v30 = vsel %vm982_vm3, %v944_v9, %v4941_v44  ;;  %v945_v44 = vsel %vm921_vm2, %v4357_v55, %v7275_v56  ;;  %v7279_v55 = vld [vmem:[#allocation34_spill] sm:$0xff] }
 0x189   : > { %7273 = vst [vmem:[#allocation3_spill] sm:$0xff] %v5119_v30  ;;  %v5138_v33 = vsel %vm982_vm3, %v945_v44, %v4873_v60  ;;  %v947_v60 = vsel %vm921_vm2, %v4377_v3, %v7279_v55  ;;  %v7281_v44 = vld [vmem:[#allocation35_spill] sm:$0xff] }
 0x18a   : > { %7276 = vst [vmem:[#allocation4_spill] sm:$0xff] %v5138_v33  ;;  %v5157_v56 = vsel %vm982_vm3, %v947_v60, %v4972_v57 }
 0x18b   : > { %7280 = vst [vmem:[#allocation5_spill] sm:$0xff] %v5157_v56 }
 0x18c   : > { %1272 = vrot.lane.b32.xlu1 %v4953_v27, %s4191_s27  ;;  %1129 = vrot.lane.b32.xlu2 %v5074_v53, %s4190_s26 }
 0x18e   : > { %1274 = vrot.lane.b32.xlu0 %v4990_v29, %s4191_s27  ;;  %v5082_v31 = vpop.permute.xlu2 %841  ;;  %v5084_v40 = vpop.permute.xlu1 %821 }
 0x18f   : > { %7266 = vst [vmem:[#allocation18_spill] sm:$0xff] %v5082_v31 }
 0x190   : > { %v5086_v61 = vpop.permute.xlu0 %819 }
 0x194   : > { %1131 = vrot.lane.b32.xlu1 %v5096_v10, %s4190_s26  ;;  %1133 = vrot.lane.b32.xlu2 %v5100_v39, %s4190_s26 }
 0x196   : > { %1276 = vrot.lane.b32.xlu0 %v4980_v52, %s4191_s27  ;;  %v5108_v47 = vpop.permute.xlu2 %847  ;;  %v5110_v58 = vpop.permute.xlu1 %827 }
 0x197   : > { %7271 = vst [vmem:[#allocation2_spill] sm:$0xff] %v5108_v47 }
 0x198   : > { %v5112_v48 = vpop.permute.xlu0 %825 }
 0x19c   : > { %1280 = vrot.lane.b32.xlu1 %v5004_v25, %s4191_s27  ;;  %1135 = vrot.lane.b32.xlu2 %v5119_v30, %s4190_s26 }
 0x19e   : > { %1278 = vrot.lane.b32.xlu0 %v5015_v5, %s4191_s27  ;;  %v5127_v34 = vpop.permute.xlu2 %853  ;;  %v5129_v20 = vpop.permute.xlu1 %833 }
 0x19f   : > { %7274 = vst [vmem:[#allocation10_spill] sm:$0xff] %v5127_v34 }
 0x1a0   : > { %v5131_v47 = vpop.permute.xlu0 %831 }
 0x1a4   : > { %1137 = vrot.lane.b32.xlu1 %v5138_v33, %s4190_s26  ;;  %1284 = vrot.lane.b32.xlu2 %v5052_v49, %s4191_s27  ;;  %v946_v49 = vsel %vm921_vm2, %v4383_v6, %v7281_v44  ;;  %v7285_v6 = vld [vmem:[#allocation27_spill] sm:$0xff] }
 0x1a5   : > { %v948_v60 = vsel %vm921_vm2, %v4374_v63, %v7285_v6 }
 0x1a6   : > { %1282 = vrot.lane.b32.xlu0 %v5034_v12, %s4191_s27  ;;  %v5146_v9 = vpop.permute.xlu2 %859  ;;  %v5148_v34 = vpop.permute.xlu1 %839  ;;  %v5183_v44 = vsel %vm982_vm3, %v948_v60, %v4881_v4  ;;  %v289_v60 = vld [vmem:[%s7148_s1 + $0x20] sm:$0xf] }
 0x1a7   : > { %7277 = vst [vmem:[#allocation16_spill] sm:$0xff] %v5146_v9  ;;  %v5168_v9 = vsel %vm982_vm3, %v946_v49, %v4974_v36  ;;  %4006 = vmatpush.msk.msra.mxu0 %vm1989_vm4, %v289_v60  ;;  %4083 = vmatpush.msk.msra.mxu2 %vm1989_vm4, %v289_v60 }
 0x1a8   : > { %v5150_v31 = vpop.permute.xlu0 %837  ;;  %7282 = vst [vmem:[#allocation22_spill] sm:$0xff] %v5168_v9  ;;  %4084 = vmatpush.msk.msra.mxu3 %vm1989_vm4, %v289_v60 }
 0x1a9   : > { %7278 = vst [vmem:[#allocation17_spill] sm:$0xff] %v5150_v31 }
 0x1aa   : > { %7286 = vst [vmem:[#allocation26_spill] sm:$0xff] %v5183_v44 }
 0x1ac   : > { %1286 = vrot.lane.b32.xlu1 %v5055_v37, %s4191_s27  ;;  %1141 = vrot.lane.b32.xlu2 %v5157_v56, %s4190_s26  ;;  %v7301_v37 = vld [vmem:[#allocation40_spill] sm:$0xff] }
 0x1ae   : > { %1139 = vrot.lane.b32.xlu0 %v5168_v9, %s4190_s26  ;;  %v5172_v3 = vpop.permute.xlu2 %1101  ;;  %v5174_v57 = vpop.permute.xlu1 %845 }
 0x1af   : > { %7283 = vst [vmem:[#allocation23_spill] sm:$0xff] %v5174_v57 }
 0x1b0   : > { %v5176_v55 = vpop.permute.xlu0 %843 }
 0x1b1   : > { %7284 = vst [vmem:[#allocation25_spill] sm:$0xff] %v5176_v55 }
 0x1b4   : > { %1143 = vrot.lane.b32.xlu1 %v5183_v44, %s4190_s26  ;;  %1292 = vrot.lane.b32.xlu2 %v5100_v39, %s4191_s27  ;;  %v7292_v39 = vld [vmem:[#allocation38_spill] sm:$0xff] }
 0x1b6   : > { %1288 = vrot.lane.b32.xlu0 %v5074_v53, %s4191_s27  ;;  %v5191_v36 = vpop.permute.xlu2 %1107  ;;  %v5193_v49 = vpop.permute.xlu1 %851 }
 0x1b7   : > { %7287 = vst [vmem:[#allocation9_spill] sm:$0xff] %v5193_v49 }
 0x1b8   : > { %v5195_v57 = vpop.permute.xlu0 %849 }
 0x1b9   : > { %7288 = vst [vmem:[#allocation15_spill] sm:$0xff] %v5195_v57  ;;  %v7291_v57 = vld [vmem:[#allocation37_spill] sm:$0xff] }
 0x1bc   : > { %1294 = vrot.lane.b32.xlu1 %v5119_v30, %s4191_s27  ;;  %1298 = vrot.lane.b32.xlu2 %v5168_v9, %s4191_s27  ;;  %v286_v9 = vld [vmem:[%s7148_s1 + $0x8] sm:$0xff]  ;;  %v4142_v30 = vld [vmem:[%s4239_s23 + $0xe0] sm:$0xff] }
 0x1be   : > { %1290 = vrot.lane.b32.xlu0 %v5096_v10, %s4191_s27  ;;  %v5203_v63 = vpop.permute.xlu2 %1113  ;;  %v5205_v4 = vpop.permute.xlu1 %857  ;;  %v4143_v10 = vld [vmem:[%s4239_s23 + $0xd8] sm:$0xff] }
 0x1bf   : > { %7289 = vst [vmem:[#allocation29_spill] sm:$0xff] %v5205_v4  ;;  %v288_v4 = vld [vmem:[%s7148_s1 + $0x18] sm:$0xff]  ;;  %v949_v53 = vsel %vm921_vm2, %v4143_v10, %v7292_v39  ;;  %v7295_v10 = vld [vmem:[#allocation41_spill] sm:$0xff] }
 0x1c0   : > { %v5207_v6 = vpop.permute.xlu0 %855  ;;  %2005 = vmatpush.msra.mxu0 %v288_v4  ;;  %4085 = vmatpush.msra.mxu2 %v288_v4 }
 0x1c1   : > { %7290 = vst [vmem:[#allocation21_spill] sm:$0xff] %v5207_v6  ;;  %4086 = vmatpush.msra.mxu3 %v288_v4  ;;  %v5243_v4 = vsel %vm982_vm3, %v949_v53, %v4998_v8  ;;  %v4144_v53 = vld [vmem:[%s4239_s23 + $0xf0] sm:$0xff] }
 0x1c2   : > { %7294 = vst [vmem:[#allocation31_spill] sm:$0xff] %v5243_v4 }
 0x1c4   : > { %1300 = vrot.lane.b32.xlu1 %v5157_v56, %s4191_s27  ;;  %1302 = vrot.lane.b32.xlu2 %v5183_v44, %s4191_s27  ;;  %v287_v56 = vld [vmem:[%s7148_s1 + $0x10] sm:$0xff] }
 0x1c5   : > { %2006 = vmatpush.msra.mxu0 %v287_v56  ;;  %4087 = vmatpush.msra.mxu2 %v287_v56 }
 0x1c6   : > { %1296 = vrot.lane.b32.xlu0 %v5138_v33, %s4191_s27  ;;  %v5221_v6 = vpop.permute.xlu2 %1117  ;;  %v5223_v49 = vpop.permute.xlu1 %1099  ;;  %v950_v33 = vsel %vm921_vm2, %v4142_v30, %v7291_v57  ;;  %v285_v30 = vld [vmem:[%s7148_s1] sm:$0xff]  ;;  %4088 = vmatpush.msra.mxu3 %v287_v56  ;;  %v4145_v57 = vld [vmem:[%s4239_s23 + $0xe8] sm:$0xf] }
 0x1c7   : > { %2007 = vmatpush.msra.mxu0 %v286_v9  ;;  %4089 = vmatpush.msra.mxu2 %v286_v9  ;;  %v5239_v60 = vsel %vm982_vm3, %v950_v33, %v4996_v54  ;;  %v952_v33 = vsel %vm921_vm2, %v4144_v53, %v7295_v10  ;;  %v4146_v10 = vld [vmem:[%s4239_s23 + $0x108] sm:$0xff] }
 0x1c8   : > { %v1098_v44 = vpop.permute.xlu0 %1097  ;;  %7293 = vst [vmem:[#allocation32_spill] sm:$0xff] %v5239_v60  ;;  %4090 = vmatpush.msra.mxu3 %v286_v9  ;;  %v5265_v56 = vsel %vm982_vm3, %v952_v33, %v5023_v13 }
 0x1c9   : > { %2008 = vmatpush.msra.mxu0 %v285_v30  ;;  %4091 = vmatpush.msra.mxu2 %v285_v30  ;;  %7296 = vst [vmem:[#allocation24_spill] sm:$0xff] %v5265_v56 }
 0x1ca   : > { %4092 = vmatpush.msra.mxu3 %v285_v30 }
 0x1cc   : > { %1306 = vrot.lane.b32.xlu1 %v5239_v60, %s4191_s27  ;;  %1145 = vrot.lane.b32.xlu2 %v5243_v4, %s4190_s26 }
 0x1ce   : > { %1304 = vrot.lane.b32.xlu0 %v5243_v4, %s4191_s27  ;;  %v5254_v54 = vpop.permute.xlu1 %1105  ;;  %v5256_v8 = vpop.permute.xlu2 %1121  ;;  %v7297_v4 = vld [vmem:[#allocation28_spill] sm:$0xff] }
 0x1cf   : > { %v951_v55 = vsel %vm921_vm2, %v4145_v57, %v7297_v4  ;;  %v7299_v4 = vld [vmem:[#allocation44_spill] sm:$0xff] }
 0x1d0   : > { %v5258_v39 = vpop.permute.xlu0 %1103  ;;  %v5276_v9 = vsel %vm982_vm3, %v951_v55, %v4910_v7  ;;  %v955_v33 = vsel %vm921_vm2, %v4146_v10, %v7299_v4  ;;  %v4148_v55 = vld [vmem:[%s4239_s23 + $0xf8] sm:$0xff] }
 0x1d1   : > { %7298 = vst [vmem:[#allocation34_spill] sm:$0xff] %v5276_v9  ;;  %v5289_v57 = vsel %vm982_vm3, %v955_v33, %v5042_v43  ;;  %v953_v31 = vsel %vm921_vm2, %v4148_v55, %v7301_v37 }
 0x1d2   : > { %v5305_v43 = vsel %vm982_vm3, %v953_v31, %v5021_v45  ;;  %v4149_v45 = vld [vmem:[%s4239_s23 + $0x100] sm:$0xf]  ;;  %v7303_v31 = vld [vmem:[#allocation30_spill] sm:$0xff] }
 0x1d3   : > { %7302 = vst [vmem:[#allocation35_spill] sm:$0xff] %v5305_v43 }
 0x1d4   : > { %1147 = vrot.lane.b32.xlu2 %v5239_v60, %s4190_s26  ;;  %1310 = vrot.lane.b32.xlu1 %v5265_v56, %s4191_s27  ;;  %v4147_v60 = vld [vmem:[%s4239_s23] sm:$0xff] }
 0x1d5   : > { %v922_v7 = vsel %vm921_vm2, %v4147_v60, %v7300_v2 }
 0x1d6   : > { %1308 = vrot.lane.b32.xlu0 %v5276_v9, %s4191_s27  ;;  %v5280_v30 = vpop.permute.xlu1 %1111  ;;  %v1267_v13 = vpop.permute.xlu2 %1266  ;;  %v983_v10 = vsel %vm982_vm3, %v922_v7, %v4834_v38 }
 0x1d7   : > { %v1425_v2 = vsel %vm1424_vm5, %v983_v10, %v1098_v44  ;;  %v954_v44 = vsel %vm921_vm2, %v4149_v45, %v7303_v31 }
 0x1d8   : > { %v5282_v53 = vpop.permute.xlu0 %1109  ;;  %v5320_v10 = vsel %vm982_vm3, %v954_v44, %v4939_v16 }
 0x1dc   : > { %1151 = vrot.lane.b32.xlu1 %v5265_v56, %s4190_s26  ;;  %1316 = vrot.lane.b32.xlu2 %v5289_v57, %s4191_s27  ;;  %v4150_v56 = vld [vmem:[%s4239_s23 + $0x8] sm:$0xff] }
 0x1de   : > { %1312 = vrot.lane.b32.xlu0 %v5305_v43, %s4191_s27  ;;  %v1263_v37 = vpop.permute.xlu1 %1262  ;;  %v5310_v60 = vpop.permute.xlu2 %1127 }
 0x1df   : > { %v1480_v4 = vsel %vm1479_vm6, %v1425_v2, %v1263_v37  ;;  %v923_v2 = vsel %vm921_vm2, %v4150_v56, %v7304_v62 }
 0x1e0   : > { %v1588_v33 = vrot.slane %v1480_v4, 2  ;;  %v1589_v55 = vrot.slane %v1480_v4, 4  ;;  %v1590_v38 = vrot.slane %v1480_v4, 6  ;;  %1696 = vst [vmem:[#allocation1] ss:$4 sm:$0xff] %v1480_v4  ;;  %v5313_v7 = vpop.permute.xlu0 %1115  ;;  %v984_v37 = vsel %vm982_vm3, %v923_v2, %v4831_v41  ;;  %v4152_v2 = vld [vmem:[%s4239_s23 + $0x110] sm:$0xff] }
 0x1e1   : > { %v1426_v16 = vsel %vm1424_vm5, %v984_v37, %v5223_v49  ;;  %v7306_v37 = vld [vmem:[#allocation43_spill] sm:$0xff] }
 0x1e2   : > { %1698 = vst [vmem:[#allocation1 + $0x1] ss:$4 sm:$0xff] %v1588_v33  ;;  %v4151_v33 = vld [vmem:[%s4239_s23 + $0x10] sm:$0xf] }
 0x1e3   : > { %1700 = vst [vmem:[#allocation1 + $0x2] ss:$4 sm:$0xff] %v1589_v55  ;;  %v7305_v55 = vld [vmem:[#allocation6_spill] sm:$0xff] }
 0x1e4   : > { %1702 = vst [vmem:[#allocation1 + $0x3] ss:$4 sm:$0xff] %v1590_v38  ;;  %1314 = vrot.lane.b32.xlu1 %v5320_v10, %s4191_s27  ;;  %1153 = vrot.lane.b32.xlu2 %v5305_v43, %s4190_s26  ;;  %v924_v38 = vsel %vm921_vm2, %v4151_v33, %v7305_v55  ;;  %v956_v43 = vsel %vm921_vm2, %v4152_v2, %v7306_v37  ;;  %v7307_v33 = vld [vmem:[#allocation47_spill] sm:$0xff]  ;;  %v7308_v2 = vld [vmem:[#allocation33_spill] sm:$0xff] }
 0x1e5   : > { %v985_v49 = vsel %vm982_vm3, %v924_v38, %v4787_v19 }
 0x1e6   : > { %1149 = vrot.lane.b32.xlu0 %v5276_v9, %s4190_s26  ;;  %v1265_v4 = vpop.permute.xlu1 %1264  ;;  %v5335_v62 = vpop.permute.xlu2 %1129  ;;  %v5355_v9 = vsel %vm982_vm3, %v956_v43, %v5040_v18  ;;  %v1428_v18 = vsel %vm1424_vm5, %v4906_v0, %v5258_v39 }
 0x1e7   : > { %v1481_v56 = vsel %vm1479_vm6, %v1426_v16, %v1265_v4  ;;  %v1427_v16 = vsel %vm1424_vm5, %v985_v49, %v5172_v3  ;;  %v4153_v4 = vld [vmem:[%s4239_s23 + $0x120] sm:$0xff] }
 0x1e8   : > { %v1591_v45 = vrot.slane %v1481_v56, 2  ;;  %v1592_v31 = vrot.slane %v1481_v56, 4  ;;  %1704 = vst [vmem:[#allocation1 + $0x20] ss:$4 sm:$0xff] %v1481_v56  ;;  %v5341_v41 = vpop.permute.xlu0 %1119  ;;  %v1593_v44 = vrot.slane %v1481_v56, 6  ;;  %v958_v55 = vsel %vm921_vm2, %v4153_v4, %v7307_v33 }
 0x1e9   : > { %v1482_v19 = vsel %vm1479_vm6, %v1427_v16, %v1267_v13  ;;  %v5360_v38 = vsel %vm982_vm3, %v958_v55, %v5067_v50 }
 0x1ea   : > { %1706 = vst [vmem:[#allocation1 + $0x21] ss:$4 sm:$0xff] %v1591_v45 }
 0x1eb   : > { %v1711_v56 = vld.sshfl [vmem:[#allocation1] sm:$0xff pattern:$0x73625140]  ;;  %1708 = vst [vmem:[#allocation1 + $0x22] ss:$4 sm:$0xff] %v1592_v31 }
 0x1ec   : > { %1713 = vst [vmem:[#allocation1] ss:$4 sm:$0xff] %v1482_v19  ;;  %4007 = vmatmul.msk.f32.vlgmr.msra.gmra.mxu0 %vm1906_vm7, %v1711_v56  ;;  %1318 = vrot.lane.b32.xlu1 %v5355_v9, %s4191_s27 }
 0x1ed   : > { %1710 = vst [vmem:[#allocation1 + $0x23] ss:$4 sm:$0xff] %v1593_v44  ;;  %1322 = vrot.lane.b32.xlu2 %v5360_v38, %s4191_s27  ;;  %v4154_v44 = vld [vmem:[%s4239_s23 + $0x118] sm:$0xf] }
 0x1ee   : > { %1157 = vrot.lane.b32.xlu0 %v5289_v57, %s4190_s26  ;;  %v1269_v50 = vpop.permute.xlu1 %1268  ;;  %v5372_v3 = vpop.permute.xlu2 %1133  ;;  %v957_v37 = vsel %vm921_vm2, %v4154_v44, %v7308_v2  ;;  %v1431_v2 = vsel %vm1424_vm5, %v4935_v15, %v5282_v53 }
 0x1ef   : > { %v1483_v13 = vsel %vm1479_vm6, %v1428_v18, %v1269_v50  ;;  %v5382_v0 = vsel %vm982_vm3, %v957_v37, %v4970_v24  ;;  %v1429_v24 = vsel %vm1424_vm5, %v4896_v35, %v5254_v54  ;;  %v1430_v54 = vsel %vm1424_vm5, %v4893_v14, %v5191_v36  ;;  %v7310_v14 = vld [vmem:[#allocation50_spill] sm:$0xff] }
 0x1f0   : > { %v1594_v43 = vrot.slane %v1483_v13, 2  ;;  %v1595_v45 = vrot.slane %v1483_v13, 4  ;;  %1714 = vst [vmem:[#allocation1 + $0x1] ss:$4 sm:$0xff] %v1483_v13  ;;  %v5375_v31 = vpop.permute.xlu0 %1123  ;;  %v1596_v49 = vrot.slane %v1483_v13, 6  ;;  %v4155_v13 = vld [vmem:[%s4239_s23 + $0x128] sm:$0xff] }
 0x1f2   : > { %1715 = vst [vmem:[#allocation1 + $0x2] ss:$4 sm:$0xff] %v1594_v43  ;;  %v7309_v43 = vld [vmem:[#allocation46_spill] sm:$0xff] }
 0x1f3   : > { %1716 = vst [vmem:[#allocation1 + $0x3] ss:$4 sm:$0xff] %v1595_v45  ;;  %v959_v45 = vsel %vm921_vm2, %v4155_v13, %v7309_v43 }
 0x1f4   : > { %v1712_v39 = vld.sshfl [vmem:[#allocation1 + $0x20] sm:$0xff pattern:$0x73625140]  ;;  %1320 = vrot.lane.b32.xlu1 %v5382_v0, %s4191_s27  ;;  %v5406_v35 = vsel %vm982_vm3, %v959_v45, %v5065_v1 }
 0x1f5   : > { %1717 = vst [vmem:[#allocation1 + $0x20] ss:$4 sm:$0xff] %v1596_v49  ;;  %4008 = vmatmul.msk.f32.gmra.mxu0 %vm1906_vm7, %v1712_v39  ;;  %1159 = vrot.lane.b32.xlu2 %v5355_v9, %s4190_s26 }
 0x1f6   : > { %1155 = vrot.lane.b32.xlu0 %v5320_v10, %s4190_s26  ;;  %v5391_v16 = vpop.permute.xlu1 %1125  ;;  %v5393_v4 = vpop.permute.xlu2 %1135 }
 0x1f8   : > { %v1271_v33 = vpop.permute.xlu0 %1270 }
 0x1f9   : > { %v1484_v55 = vsel %vm1479_vm6, %v1429_v24, %v1271_v33  ;;  %v4156_v24 = vld [vmem:[%s4239_s23 + $0x138] sm:$0xff] }
 0x1fa   : > { %v1721_v19 = vld.sshfl [vmem:[#allocation1] sm:$0xff pattern:$0x73625140]  ;;  %v1597_v56 = vrot.slane %v1484_v55, 2  ;;  %v1598_v18 = vrot.slane %v1484_v55, 4  ;;  %v1599_v50 = vrot.slane %v1484_v55, 6  ;;  %v961_v36 = vsel %vm921_vm2, %v4156_v24, %v7310_v14 }
 0x1fb   : > { %1718 = vst [vmem:[#allocation1 + $0x21] ss:$4 sm:$0xff] %v1484_v55 }
 0x1fc   : > { %1719 = vst [vmem:[#allocation1 + $0x22] ss:$4 sm:$0xff] %v1597_v56  ;;  %1161 = vrot.lane.b32.xlu1 %v5382_v0, %s4190_s26  ;;  %v5428_v56 = vsel %vm982_vm3, %v961_v36, %v5086_v61  ;;  %v4159_v36 = vld [vmem:[%s4239_s23 + $0x140] sm:$0xff] }
 0x1fd   : > { %1720 = vst [vmem:[#allocation1 + $0x23] ss:$4 sm:$0xff] %v1598_v18  ;;  %4009 = vmatmul.msk.f32.gmra.mxu0 %vm1906_vm7, %v1721_v19  ;;  %1163 = vrot.lane.b32.xlu2 %v5360_v38, %s4190_s26  ;;  %v4157_v18 = vld [vmem:[%s4239_s23 + $0x130] sm:$0xf] }
 0x1fe   : > { %1723 = vst [vmem:[#allocation1] ss:$4 sm:$0xff] %v1599_v50  ;;  %1324 = vrot.lane.b32.xlu0 %v5406_v35, %s4191_s27  ;;  %v1273_v49 = vpop.permute.xlu1 %1272  ;;  %v5416_v44 = vpop.permute.xlu2 %1284  ;;  %v7311_v50 = vld [vmem:[#allocation36_spill] sm:$0xff] }
 0x1ff   : > { %v1485_v1 = vsel %vm1479_vm6, %v1430_v54, %v1273_v49  ;;  %v960_v15 = vsel %vm921_vm2, %v4157_v18, %v7311_v50  ;;  %v1433_v50 = vsel %vm1424_vm5, %v4922_v28, %v5203_v63  ;;  %v1436_v63 = vsel %vm1424_vm5, %v4953_v27, %v5341_v41 }
 0x200   : > { %1724 = vst [vmem:[#allocation1 + $0x1] ss:$4 sm:$0xff] %v1485_v1  ;;  %v1275_v37 = vpop.permute.xlu0 %1274  ;;  %v5437_v13 = vsel %vm982_vm3, %v960_v15, %v4994_v32  ;;  %v1432_v32 = vsel %vm1424_vm5, %v4925_v21, %v5280_v30 }
 0x201   : > { %v1486_v39 = vsel %vm1479_vm6, %v1431_v2, %v1275_v37  ;;  %v4158_v37 = vld [vmem:[%s4239_s23 + $0x148] sm:$0xf] }
 0x202   : > { %v1600_v33 = vrot.slane %v1486_v39, 2  ;;  %v1601_v55 = vrot.slane %v1486_v39, 4  ;;  %v1602_v19 = vrot.slane %v1486_v39, 6  ;;  %1725 = vst [vmem:[#allocation1 + $0x2] ss:$4 sm:$0xff] %v1486_v39  ;;  %v7312_v39 = vld [vmem:[#allocation39_spill] sm:$0xff] }
 0x203   : > { %v963_v24 = vsel %vm921_vm2, %v4158_v37, %v7312_v39  ;;  %v1491_v37 = vsel %vm1479_vm6, %v1436_v63, %v5416_v44 }
 0x204   : > { %v1722_v53 = vld.sshfl [vmem:[#allocation1 + $0x20] sm:$0xff pattern:$0x73625140]  ;;  %1726 = vst [vmem:[#allocation1 + $0x3] ss:$4 sm:$0xff] %v1600_v33  ;;  %1328 = vrot.lane.b32.xlu1 %v5428_v56, %s4191_s27 }
 0x205   : > { %1727 = vst [vmem:[#allocation1 + $0x20] ss:$4 sm:$0xff] %v1601_v55  ;;  %4010 = vmatmul.msk.f32.gmra.mxu0 %vm1906_vm7, %v1722_v53  ;;  %1165 = vrot.lane.b32.xlu2 %v5406_v35, %s4190_s26  ;;  %v7313_v33 = vld [vmem:[#allocation49_spill] sm:$0xff] }
 0x206   : > { %1728 = vst [vmem:[#allocation1 + $0x21] ss:$4 sm:$0xff] %v1602_v19  ;;  %1326 = vrot.lane.b32.xlu0 %v5437_v13, %s4191_s27  ;;  %v5444_v61 = vpop.permute.xlu1 %1131  ;;  %v5446_v43 = vpop.permute.xlu2 %1141  ;;  %v962_v55 = vsel %vm921_vm2, %v4159_v36, %v7313_v33  ;;  %v5460_v19 = vsel %vm982_vm3, %v963_v24, %v5019_v42  ;;  %v1434_v42 = vsel %vm1424_vm5, %v4966_v23, %v5313_v7  ;;  %v4160_v7 = vld [vmem:[%s4239_s23 + $0x150] sm:$0xff] }
 0x207   : > { %v5466_v21 = vsel %vm982_vm3, %v962_v55, %v5084_v40  ;;  %v4161_v55 = vld [vmem:[%s4239_s23 + $0x158] sm:$0xff] }
 0x208   : > { %v1277_v45 = vpop.permute.xlu0 %1276 }
 0x209   : > { %v1487_v54 = vsel %vm1479_vm6, %v1432_v32, %v1277_v45 }
 0x20a   : > { %v1603_v49 = vrot.slane %v1487_v54, 2  ;;  %v1604_v1 = vrot.slane %v1487_v54, 4  ;;  %v1605_v2 = vrot.slane %v1487_v54, 6  ;;  %1729 = vst [vmem:[#allocation1 + $0x22] ss:$4 sm:$0xff] %v1487_v54  ;;  %v964_v54 = vsel %vm921_vm2, %v4160_v7, %v4750_v11 }
 0x20b   : > { %v1731_v14 = vld.sshfl [vmem:[#allocation1] sm:$0xff pattern:$0x73625140] }
 0x20c   : > { %1730 = vst [vmem:[#allocation1 + $0x23] ss:$4 sm:$0xff] %v1603_v49  ;;  %1167 = vrot.lane.b32.xlu1 %v5437_v13, %s4190_s26 }
 0x20d   : > { %1733 = vst [vmem:[#allocation1] ss:$4 sm:$0xff] %v1604_v1  ;;  %4011 = vmatmul.msk.f32.gmra.mxu0 %vm1906_vm7, %v1731_v14  ;;  %1332 = vrot.lane.b32.xlu2 %v5460_v19, %s4191_s27  ;;  %v5488_v1 = vsel %vm982_vm3, %v964_v54, %v5112_v48  ;;  %v1435_v48 = vsel %vm1424_vm5, %v4956_v51, %v5221_v6 }
 0x20e   : > { %1734 = vst [vmem:[#allocation1 + $0x1] ss:$4 sm:$0xff] %v1605_v2  ;;  %1330 = vrot.lane.b32.xlu0 %v5466_v21, %s4191_s27  ;;  %v1281_v30 = vpop.permute.xlu1 %1280  ;;  %v5476_v18 = vpop.permute.xlu2 %1292 }
 0x20f   : > { %v1489_v40 = vsel %vm1479_vm6, %v1434_v42, %v1281_v30  ;;  %v965_v42 = vsel %vm921_vm2, %v4161_v55, %v4747_v46  ;;  %v1437_v46 = vsel %vm1424_vm5, %v4990_v29, %v5256_v8  ;;  %v4163_v8 = vld [vmem:[%s4239_s23 + $0x168] sm:$0xff] }
 0x210   : > { %v1606_v15 = vrot.slane %v1489_v40, 2  ;;  %1736 = vst [vmem:[#allocation1 + $0x3] ss:$4 sm:$0xff] %v1489_v40  ;;  %v1279_v53 = vpop.permute.xlu0 %1278  ;;  %v1607_v32 = vrot.slane %v1489_v40, 4  ;;  %v1608_v23 = vrot.slane %v1489_v40, 6  ;;  %v5515_v27 = vsel %vm982_vm3, %v965_v42, %v5110_v58  ;;  %v4162_v40 = vld [vmem:[%s4239_s23 + $0x170] sm:$0xff] }
 0x211   : > { %v1488_v45 = vsel %vm1479_vm6, %v1433_v50, %v1279_v53  ;;  %v968_v50 = vsel %vm921_vm2, %v4162_v40, %v4761_v59  ;;  %v4165_v55 = vld [vmem:[%s4239_s23 + $0x188] sm:$0xff] }
 0x212   : > { %1735 = vst [vmem:[#allocation1 + $0x2] ss:$4 sm:$0xff] %v1488_v45  ;;  %v5537_v29 = vsel %vm982_vm3, %v968_v50, %v5129_v20  ;;  %v1438_v20 = vsel %vm1424_vm5, %v4980_v52, %v5375_v31  ;;  %v971_v42 = vsel %vm921_vm2, %v4165_v55, %v4775_v22 }
 0x213   : > { %v1732_v49 = vld.sshfl [vmem:[#allocation1 + $0x20] sm:$0xff pattern:$0x73625140] }
 0x214   : > { %1737 = vst [vmem:[#allocation1 + $0x20] ss:$4 sm:$0xff] %v1606_v15  ;;  %1171 = vrot.lane.b32.xlu1 %v5466_v21, %s4190_s26 }
 0x215   : > { %1738 = vst [vmem:[#allocation1 + $0x21] ss:$4 sm:$0xff] %v1607_v32  ;;  %4012 = vmatmul.msk.f32.gmra.mxu0 %vm1906_vm7, %v1732_v49  ;;  %1334 = vrot.lane.b32.xlu2 %v5488_v1, %s4191_s27  ;;  %v967_v32 = vsel %vm921_vm2, %v4163_v8, %v4764_v17  ;;  %v7317_v8 = vld [vmem:[#allocation12_spill] sm:$0xff] }
 0x216   : > { %1739 = vst [vmem:[#allocation1 + $0x22] ss:$4 sm:$0xff] %v1608_v23  ;;  %1169 = vrot.lane.b32.xlu0 %v5428_v56, %s4190_s26  ;;  %v5497_v11 = vpop.permute.xlu1 %1137  ;;  %v5499_v28 = vpop.permute.xlu2 %1298  ;;  %v5546_v45 = vsel %vm982_vm3, %v967_v32, %v5131_v47  ;;  %v1440_v47 = vsel %vm1424_vm5, %v5004_v25, %v5310_v60  ;;  %v1443_v32 = vsel %vm1424_vm5, %v7317_v8, %v5372_v3  ;;  %v7321_v3 = vld [vmem:[#allocation8_spill] sm:$0xff] }
 0x217   : > { %v1495_v7 = vsel %vm1479_vm6, %v1440_v47, %v5476_v18  ;;  %v1498_v47 = vsel %vm1479_vm6, %v1443_v32, %v5499_v28  ;;  %v1442_v28 = vsel %vm1424_vm5, %v7321_v3, %v5444_v61  ;;  %v7330_v3 = vld [vmem:[#allocation15_spill] sm:$0xff] }
 0x218   : > { %v1283_v2 = vpop.permute.xlu0 %1282  ;;  %v1619_v25 = vrot.slane %v1495_v7, 4 }
 0x219   : > { %v1741_v39 = vld.sshfl [vmem:[#allocation1] sm:$0xff pattern:$0x73625140]  ;;  %v1490_v24 = vsel %vm1479_vm6, %v1435_v48, %v1283_v2 }
 0x21a   : > { %1746 = vst [vmem:[#allocation1 + $0x3] ss:$4 sm:$0xff] %v1491_v37  ;;  %v1609_v14 = vrot.slane %v1490_v24, 2  ;;  %v1610_v36 = vrot.slane %v1490_v24, 4  ;;  %v1611_v33 = vrot.slane %v1490_v24, 6  ;;  %v7314_v37 = vld [vmem:[#allocation42_spill] sm:$0xff] }
 0x21b   : > { %1740 = vst [vmem:[#allocation1 + $0x23] ss:$4 sm:$0xff] %v1490_v24  ;;  %v4164_v2 = vld [vmem:[%s4239_s23 + $0x160] sm:$0xf]  ;;  %v1618_v24 = vrot.slane %v1495_v7, 2 }
 0x21c   : > { %1743 = vst [vmem:[#allocation1] ss:$4 sm:$0xff] %v1609_v14  ;;  %1175 = vrot.lane.b32.xlu1 %v5488_v1, %s4190_s26 }
 0x21d   : > { %1744 = vst [vmem:[#allocation1 + $0x1] ss:$4 sm:$0xff] %v1610_v36  ;;  %4013 = vmatmul.msk.f32.gmra.mxu0 %vm1906_vm7, %v1741_v39  ;;  %1177 = vrot.lane.b32.xlu2 %v5515_v27, %s4190_s26  ;;  %v966_v39 = vsel %vm921_vm2, %v4164_v2, %v7314_v37  ;;  %v7320_v37 = vld [vmem:[#allocation25_spill] sm:$0xff] }
 0x21e   : > { %1745 = vst [vmem:[#allocation1 + $0x2] ss:$4 sm:$0xff] %v1611_v33  ;;  %1336 = vrot.lane.b32.xlu0 %v5515_v27, %s4191_s27  ;;  %v1287_v51 = vpop.permute.xlu1 %1286  ;;  %v5527_v58 = vpop.permute.xlu2 %1302  ;;  %v5573_v52 = vsel %vm982_vm3, %v966_v39, %v5038_v26  ;;  %v1439_v26 = vsel %vm1424_vm5, %v5015_v5, %v5391_v16  ;;  %v7315_v5 = vld [vmem:[#allocation54_spill] sm:$0xff] }
 0x21f   : > { %v1492_v6 = vsel %vm1479_vm6, %v1437_v46, %v1287_v51  ;;  %v5591_v46 = vsel %vm982_vm3, %v971_v42, %v5148_v34  ;;  %v1441_v51 = vsel %vm1424_vm5, %v5034_v12, %v5335_v62  ;;  %v1620_v62 = vrot.slane %v1495_v7, 6 }
 0x220   : > { %v1612_v41 = vrot.slane %v1492_v6, 2  ;;  %v5530_v44 = vpop.permute.xlu0 %1139  ;;  %v1613_v30 = vrot.slane %v1492_v6, 4  ;;  %v1614_v53 = vrot.slane %v1492_v6, 6  ;;  %v1626_v42 = vrot.slane %v1498_v47, 6 }
 0x222   : > { %v1742_v15 = vld.sshfl [vmem:[#allocation1 + $0x20] sm:$0xff pattern:$0x73625140] }
 0x223   : > { %1747 = vst [vmem:[#allocation1 + $0x20] ss:$4 sm:$0xff] %v1492_v6  ;;  %v4166_v6 = vld [vmem:[%s4239_s23 + $0x180] sm:$0xff] }
 0x224   : > { %1748 = vst [vmem:[#allocation1 + $0x21] ss:$4 sm:$0xff] %v1612_v41  ;;  %1342 = vrot.lane.b32.xlu1 %v5537_v29, %s4191_s27  ;;  %v970_v16 = vsel %vm921_vm2, %v4166_v6, %v7315_v5  ;;  %v7324_v6 = vld [vmem:[#allocation48_spill] sm:$0xff] }
 0x225   : > { %1749 = vst [vmem:[#allocation1 + $0x22] ss:$4 sm:$0xff] %v1613_v30  ;;  %4014 = vmatmul.msk.f32.gmra.mxu0 %vm1906_vm7, %v1742_v15  ;;  %1173 = vrot.lane.b32.xlu2 %v5460_v19, %s4190_s26  ;;  %v1751_v54 = vld.sshfl [vmem:[#allocation1] sm:$0xff pattern:$0x73625140] }
 0x226   : > { %1750 = vst [vmem:[#allocation1 + $0x23] ss:$4 sm:$0xff] %v1614_v53  ;;  %1340 = vrot.lane.b32.xlu0 %v5546_v45, %s4191_s27  ;;  %v5553_v59 = vpop.permute.xlu1 %1143  ;;  %v5555_v17 = vpop.permute.xlu2 %1145  ;;  %v7316_v30 = vld [vmem:[#allocation17_spill] sm:$0xff] }
 0x227   : > { %v5604_v22 = vsel %vm982_vm3, %v970_v16, %v7316_v30  ;;  %v1625_v16 = vrot.slane %v1498_v47, 4 }
 0x228   : > { %v1289_v23 = vpop.permute.xlu0 %1288 }
 0x229   : > { %v1493_v49 = vsel %vm1479_vm6, %v1438_v20, %v1289_v23  ;;  %v4167_v23 = vld [vmem:[%s4239_s23 + $0x198] sm:$0xff] }
 0x22a   : > { %v1615_v48 = vrot.slane %v1493_v49, 2  ;;  %v1616_v63 = vrot.slane %v1493_v49, 4  ;;  %1753 = vst [vmem:[#allocation1] ss:$4 sm:$0xff] %v1493_v49  ;;  %v1617_v31 = vrot.slane %v1493_v49, 6 }
 0x22c   : > { %1754 = vst [vmem:[#allocation1 + $0x1] ss:$4 sm:$0xff] %v1615_v48  ;;  %1181 = vrot.lane.b32.xlu1 %v5546_v45, %s4190_s26 }
 0x22d   : > { %v1752_v60 = vld.sshfl [vmem:[#allocation1 + $0x20] sm:$0xff pattern:$0x73625140]  ;;  %1755 = vst [vmem:[#allocation1 + $0x2] ss:$4 sm:$0xff] %v1616_v63  ;;  %4015 = vmatmul.msk.f32.gmra.mxu0 %vm1906_vm7, %v1751_v54  ;;  %1183 = vrot.lane.b32.xlu2 %v5537_v29, %s4190_s26  ;;  %v7318_v54 = vld [vmem:[#allocation56_spill] sm:$0xff] }
 0x22e   : > { %1759 = vst [vmem:[#allocation1 + $0x22] ss:$4 sm:$0xff] %v1618_v24  ;;  %1338 = vrot.lane.b32.xlu0 %v5573_v52, %s4191_s27  ;;  %v1295_v18 = vpop.permute.xlu1 %1294  ;;  %v5580_v14 = vpop.permute.xlu2 %1147  ;;  %v973_v49 = vsel %vm921_vm2, %v4167_v23, %v7318_v54  ;;  %v7319_v63 = vld [vmem:[#allocation45_spill] sm:$0xff] }
 0x22f   : > { %1760 = vst [vmem:[#allocation1 + $0x23] ss:$4 sm:$0xff] %v1619_v25  ;;  %v1496_v41 = vsel %vm1479_vm6, %v1441_v51, %v1295_v18  ;;  %v5626_v39 = vsel %vm982_vm3, %v973_v49, %v7320_v37  ;;  %v7322_v24 = vld [vmem:[#allocation13_spill] sm:$0xff]  ;;  %v4169_v51 = vld [vmem:[%s4239_s23 + $0x190] sm:$0xf] }
 0x230   : > { %1758 = vst [vmem:[#allocation1 + $0x21] ss:$4 sm:$0xff] %v1495_v7  ;;  %v1291_v36 = vpop.permute.xlu0 %1290  ;;  %v1621_v40 = vrot.slane %v1496_v41, 2  ;;  %v1622_v15 = vrot.slane %v1496_v41, 4  ;;  %v1623_v48 = vrot.slane %v1496_v41, 6  ;;  %v972_v5 = vsel %vm921_vm2, %v4169_v51, %v7324_v6 }
 0x231   : > { %1756 = vst [vmem:[#allocation1 + $0x3] ss:$4 sm:$0xff] %v1617_v31  ;;  %v1494_v33 = vsel %vm1479_vm6, %v1439_v26, %v1291_v36  ;;  %v4168_v7 = vld [vmem:[%s4239_s23 + $0x178] sm:$0xf]  ;;  %v7323_v26 = vld [vmem:[#allocation14_spill] sm:$0xff] }
 0x232   : > { %1757 = vst [vmem:[#allocation1 + $0x20] ss:$4 sm:$0xff] %v1494_v33  ;;  %v969_v2 = vsel %vm921_vm2, %v4168_v7, %v7319_v63  ;;  %v1444_v36 = vsel %vm1424_vm5, %v7323_v26, %v5393_v4  ;;  %v4171_v63 = vld [vmem:[%s4239_s23 + $0x1a0] sm:$0xff] }
 0x233   : > { %v5635_v25 = vsel %vm982_vm3, %v969_v2, %v7322_v24  ;;  %v7329_v2 = vld [vmem:[#allocation55_spill] sm:$0xff] }
 0x234   : > { %1348 = vrot.lane.b32.xlu1 %v5591_v46, %s4191_s27  ;;  %v974_v37 = vsel %vm921_vm2, %v4171_v63, %v7329_v2 }
 0x235   : > { %4016 = vmatmul.msk.f32.gmra.mxu0 %vm1906_vm7, %v1752_v60  ;;  %1179 = vrot.lane.b32.xlu2 %v5573_v52, %s4190_s26  ;;  %v1624_v60 = vrot.slane %v1498_v47, 2 }
 0x236   : > { %1346 = vrot.lane.b32.xlu0 %v5604_v22, %s4191_s27  ;;  %v1301_v12 = vpop.permute.xlu1 %1300  ;;  %v5611_v34 = vpop.permute.xlu2 %1316 }
 0x237   : > { %v1499_v33 = vsel %vm1479_vm6, %v1444_v36, %v1301_v12 }
 0x238   : > { %v1761_v50 = vld.sshfl [vmem:[#allocation1] sm:$0xff pattern:$0x73625140]  ;;  %v1297_v53 = vpop.permute.xlu0 %1296  ;;  %v1627_v30 = vrot.slane %v1499_v33, 2  ;;  %v1629_v4 = vrot.slane %v1499_v33, 6 }
 0x239   : > { %1763 = vst [vmem:[#allocation1] ss:$4 sm:$0xff] %v1620_v62  ;;  %v1762_v20 = vld.sshfl [vmem:[#allocation1 + $0x20] sm:$0xff pattern:$0x73625140]  ;;  %v1497_v31 = vsel %vm1479_vm6, %v1442_v28, %v1297_v53  ;;  %v7325_v62 = vld [vmem:[#allocation18_spill] sm:$0xff] }
 0x23a   : > { %1764 = vst [vmem:[#allocation1 + $0x1] ss:$4 sm:$0xff] %v1496_v41  ;;  %v1628_v53 = vrot.slane %v1499_v33, 4 }
 0x23b   : > { %1765 = vst [vmem:[#allocation1 + $0x2] ss:$4 sm:$0xff] %v1621_v40  ;;  %v5654_v40 = vsel %vm982_vm3, %v972_v5, %v7325_v62  ;;  %v4172_v5 = vld [vmem:[%s4239_s23 + $0x1a8] sm:$0xf] }
 0x23c   : > { %1766 = vst [vmem:[#allocation1 + $0x3] ss:$4 sm:$0xff] %v1622_v15  ;;  %1187 = vrot.lane.b32.xlu1 %v5604_v22, %s4190_s26 }
 0x23d   : > { %1767 = vst [vmem:[#allocation1 + $0x20] ss:$4 sm:$0xff] %v1623_v48  ;;  %4017 = vmatmul.msk.f32.gmra.mxu0 %vm1906_vm7, %v1761_v50  ;;  %1352 = vrot.lane.b32.xlu2 %v5626_v39, %s4191_s27  ;;  %v7326_v50 = vld [vmem:[#allocation20_spill] sm:$0xff]  ;;  %v4170_v48 = vld [vmem:[%s4239_s23 + $0x1b0] sm:$0xff] }
 0x23e   : > { %1769 = vst [vmem:[#allocation1 + $0x22] ss:$4 sm:$0xff] %v1498_v47  ;;  %1344 = vrot.lane.b32.xlu0 %v5635_v25, %s4191_s27  ;;  %v1307_v61 = vpop.permute.xlu1 %1306  ;;  %v5643_v18 = vpop.permute.xlu2 %1153  ;;  %v1446_v15 = vsel %vm1424_vm5, %v7326_v50, %v5530_v44  ;;  %v7327_v47 = vld [vmem:[#allocation19_spill] sm:$0xff]  ;;  %v7328_v44 = vld [vmem:[#allocation58_spill] sm:$0xff] }
 0x23f   : > { %1770 = vst [vmem:[#allocation1 + $0x23] ss:$4 sm:$0xff] %v1624_v60  ;;  %v976_v7 = vsel %vm921_vm2, %v4170_v48, %v7328_v44  ;;  %v7332_v60 = vld [vmem:[#allocation3_spill] sm:$0xff]  ;;  %v7335_v50 = vld [vmem:[#allocation2_spill] sm:$0xff] }
 0x240   : > { %1768 = vst [vmem:[#allocation1 + $0x21] ss:$4 sm:$0xff] %v1497_v31  ;;  %v1305_v55 = vpop.permute.xlu0 %1304  ;;  %v1447_v31 = vsel %vm1424_vm5, %v7332_v60, %v5446_v43  ;;  %v7339_v60 = vld [vmem:[#allocation60_spill] sm:$0xff] }
 0x241   : > { %v1501_v23 = vsel %vm1479_vm6, %v1446_v15, %v1305_v55 }
 0x242   : > { %v1630_v28 = vrot.slane %v1501_v23, 2  ;;  %v1631_v26 = vrot.slane %v1501_v23, 4  ;;  %v1632_v55 = vrot.slane %v1501_v23, 6 }
 0x243   : > { %v1771_v41 = vld.sshfl [vmem:[#allocation1] sm:$0xff pattern:$0x73625140] }
 0x244   : > { %1774 = vst [vmem:[#allocation1 + $0x1] ss:$4 sm:$0xff] %v1626_v42  ;;  %1189 = vrot.lane.b32.xlu1 %v5591_v46, %s4190_s26 }
 0x245   : > { %1773 = vst [vmem:[#allocation1] ss:$4 sm:$0xff] %v1625_v16  ;;  %4018 = vmatmul.msk.f32.gmra.mxu0 %vm1906_vm7, %v1762_v20  ;;  %1350 = vrot.lane.b32.xlu2 %v5654_v40, %s4191_s27  ;;  %v1445_v20 = vsel %vm1424_vm5, %v7327_v47, %v5497_v11  ;;  %v5682_v11 = vsel %vm982_vm3, %v976_v7, %v7330_v3  ;;  %v7333_v16 = vld [vmem:[#allocation51_spill] sm:$0xff]  ;;  %v7338_v3 = vld [vmem:[#allocation57_spill] sm:$0xff] }
 0x246   : > { %1775 = vst [vmem:[#allocation1 + $0x2] ss:$4 sm:$0xff] %v1499_v33  ;;  %1185 = vrot.lane.b32.xlu0 %v5635_v25, %s4190_s26  ;;  %v1311_v12 = vpop.permute.xlu1 %1310  ;;  %v1500_v49 = vsel %vm1479_vm6, %v1445_v20, %v5527_v58  ;;  %v7331_v58 = vld [vmem:[#allocation23_spill] sm:$0xff]  ;;  %v1502_v33 = vsel %vm1479_vm6, %v1447_v31, %v1307_v61 }
 0x247   : > { %1776 = vst [vmem:[#allocation1 + $0x3] ss:$4 sm:$0xff] %v1627_v30  ;;  %v1772_v8 = vld.sshfl [vmem:[#allocation1 + $0x20] sm:$0xff pattern:$0x73625140]  ;;  %v5666_v32 = vpop.permute.xlu2 %1322  ;;  %v5688_v24 = vsel %vm982_vm3, %v974_v37, %v7331_v58  ;;  %v1633_v43 = vrot.slane %v1502_v33, 2 }
 0x248   : > { %1778 = vst [vmem:[#allocation1 + $0x21] ss:$4 sm:$0xff] %v1629_v4  ;;  %v1309_v54 = vpop.permute.xlu0 %1308  ;;  %v7334_v30 = vld [vmem:[#allocation4_spill] sm:$0xff]  ;;  %v1634_v62 = vrot.slane %v1502_v33, 4  ;;  %v1635_v20 = vrot.slane %v1502_v33, 6  ;;  %v4174_v58 = vld [vmem:[%s4239_s23 + $0x1c8] sm:$0xff] }
 0x249   : > { %1777 = vst [vmem:[#allocation1 + $0x20] ss:$4 sm:$0xff] %v1628_v53  ;;  %v1448_v61 = vsel %vm1424_vm5, %v7334_v30, %v5553_v59  ;;  %v7336_v53 = vld [vmem:[#allocation22_spill] sm:$0xff]  ;;  %v4173_v37 = vld [vmem:[%s4239_s23 + $0x1b8] sm:$0xff]  ;;  %v979_v31 = vsel %vm921_vm2, %v4174_v58, %v7339_v60 }
 0x24a   : > { %1779 = vst [vmem:[#allocation1 + $0x22] ss:$4 sm:$0xff] %v1500_v49  ;;  %v1449_v47 = vsel %vm1424_vm5, %v7336_v53, %v5555_v17  ;;  %v7337_v17 = vld [vmem:[#allocation5_spill] sm:$0xff]  ;;  %v7347_v58 = vld [vmem:[#allocation24_spill] sm:$0xff] }
 0x24b   : > { %1780 = vst [vmem:[#allocation1 + $0x23] ss:$4 sm:$0xff] %v1501_v23  ;;  %v1503_v23 = vsel %vm1479_vm6, %v1448_v61, %v1309_v54  ;;  %v1504_v49 = vsel %vm1479_vm6, %v1449_v47, %v1311_v12  ;;  %v1450_v12 = vsel %vm1424_vm5, %v7337_v17, %v5580_v14  ;;  %v7340_v14 = vld [vmem:[#allocation9_spill] sm:$0xff]  ;;  %v7343_v47 = vld [vmem:[#allocation52_spill] sm:$0xff]  ;;  %v7345_v17 = vld [vmem:[#allocation10_spill] sm:$0xff] }
 0x24c   : > { %1193 = vrot.lane.b32.xlu1 %v5626_v39, %s4190_s26  ;;  %v1636_v54 = vrot.slane %v1504_v49, 2  ;;  %v1637_v44 = vrot.slane %v1504_v49, 4  ;;  %v1638_v2 = vrot.slane %v1504_v49, 6  ;;  %v4175_v53 = vld [vmem:[%s4239_s23 + $0x1c0] sm:$0xf] }
 0x24d   : > { %4019 = vmatmul.msk.f32.gmra.mxu0 %vm1906_vm7, %v1771_v41  ;;  %1358 = vrot.lane.b32.xlu2 %v5682_v11, %s4191_s27  ;;  %v975_v41 = vsel %vm921_vm2, %v4172_v5, %v7333_v16 }
 0x24e   : > { %v1781_v36 = vld.sshfl [vmem:[#allocation1] sm:$0xff pattern:$0x73625140]  ;;  %1354 = vrot.lane.b32.xlu0 %v5688_v24, %s4191_s27  ;;  %v1152_v42 = vpop.permute.xlu1 %1151  ;;  %v5711_v15 = vsel %vm982_vm3, %v975_v41, %v7335_v50 }
 0x24f   : > { %1786 = vst [vmem:[#allocation1 + $0x3] ss:$4 sm:$0xff] %v1502_v33  ;;  %v5699_v51 = vpop.permute.xlu2 %1159 }
 0x250   : > { %1783 = vst [vmem:[#allocation1] ss:$4 sm:$0xff] %v1630_v28  ;;  %v1313_v6 = vpop.permute.xlu0 %1312  ;;  %v977_v28 = vsel %vm921_vm2, %v4173_v37, %v7338_v3 }
 0x251   : > { %1784 = vst [vmem:[#allocation1 + $0x1] ss:$4 sm:$0xff] %v1631_v26  ;;  %v1505_v7 = vsel %vm1479_vm6, %v1450_v12, %v1313_v6  ;;  %v1038_v26 = vsel %vm982_vm3, %v977_v28, %v7340_v14  ;;  %v7346_v12 = vld [vmem:[#allocation32_spill] sm:$0xff]  ;;  %v7348_v14 = vld [vmem:[#allocation53_spill] sm:$0xff] }
 0x252   : > { %v5707_v4 = vld.sshfl [vmem:[#allocation1 + $0x20] sm:$0xff pattern:$0x73625140]  ;;  %1785 = vst [vmem:[#allocation1 + $0x2] ss:$4 sm:$0xff] %v1632_v55  ;;  %v1639_v33 = vrot.slane %v1505_v7, 2 }
 0x253   : > { %1787 = vst [vmem:[#allocation1 + $0x20] ss:$4 sm:$0xff] %v1633_v43  ;;  %v7341_v55 = vld [vmem:[#allocation21_spill] sm:$0xff]  ;;  %v7342_v43 = vld [vmem:[#allocation31_spill] sm:$0xff]  ;;  %v1640_v16 = vrot.slane %v1505_v7, 4  ;;  %v1641_v30 = vrot.slane %v1505_v7, 6 }
 0x254   : > { %1788 = vst [vmem:[#allocation1 + $0x21] ss:$4 sm:$0xff] %v1634_v62  ;;  %1356 = vrot.lane.b32.xlu1 %v5711_v15, %s4191_s27  ;;  %v1040_v6 = vsel %vm982_vm3, %v979_v31, %v7341_v55  ;;  %v1452_v5 = vsel %vm1424_vm5, %v7342_v43, %v1152_v42  ;;  %v4176_v31 = vld [vmem:[%s4239_s23 + $0x1d8] sm:$0xf]  ;;  %v4177_v55 = vld [vmem:[%s4239_s23 + $0x1d0] sm:$0xff] }
 0x255   : > { %1789 = vst [vmem:[#allocation1 + $0x22] ss:$4 sm:$0xff] %v1635_v20  ;;  %4020 = vmatmul.msk.f32.gmra.mxu0 %vm1906_vm7, %v1772_v8  ;;  %1195 = vrot.lane.b32.xlu2 %v5688_v24, %s4190_s26  ;;  %v1507_v42 = vsel %vm1479_vm6, %v1452_v5, %v5611_v34  ;;  %v1453_v34 = vsel %vm1424_vm5, %v7346_v12, %v5643_v18  ;;  %v7350_v5 = vld [vmem:[#allocation16_spill] sm:$0xff] }
 0x256   : > { %1790 = vst [vmem:[#allocation1 + $0x23] ss:$4 sm:$0xff] %v1503_v23  ;;  %1191 = vrot.lane.b32.xlu0 %v5654_v40, %s4190_s26  ;;  %v1315_v59 = vpop.permute.xlu1 %1314  ;;  %v1642_v20 = vrot.slane %v1507_v42, 2  ;;  %v7344_v23 = vld [vmem:[#allocation26_spill] sm:$0xff] }
 0x257   : > { %v5728_v48 = vpop.permute.xlu2 %1163 }
 0x258   : > { %v1150_v8 = vpop.permute.xlu0 %1149 }
 0x259   : > { %v5731_v63 = vld.sshfl [vmem:[#allocation1] sm:$0xff pattern:$0x73625140] }
 0x25a   : > { %1793 = vst [vmem:[#allocation1] ss:$4 sm:$0xff] %v1504_v49  ;;  %v1451_v49 = vsel %vm1424_vm5, %v7344_v23, %v1150_v8  ;;  %v1644_v8 = vrot.slane %v1507_v42, 6 }
 0x25b   : > { %1794 = vst [vmem:[#allocation1 + $0x1] ss:$4 sm:$0xff] %v1636_v54  ;;  %v1643_v54 = vrot.slane %v1507_v42, 4 }
 0x25c   : > { %1795 = vst [vmem:[#allocation1 + $0x2] ss:$4 sm:$0xff] %v1637_v44  ;;  %1360 = vrot.lane.b32.xlu1 %v1038_v26, %s4191_s27 }
 0x25d   : > { %1796 = vst [vmem:[#allocation1 + $0x3] ss:$4 sm:$0xff] %v1638_v2  ;;  %v5746_v41 = vld.sshfl [vmem:[#allocation1 + $0x20] sm:$0xff pattern:$0x73625140]  ;;  %4021 = vmatmul.msk.f32.gmra.mxu0 %vm1906_vm7, %v1781_v36  ;;  %1364 = vrot.lane.b32.xlu2 %v1040_v6, %s4191_s27  ;;  %v978_v36 = vsel %vm921_vm2, %v4175_v53, %v7343_v47  ;;  %v1506_v2 = vsel %vm1479_vm6, %v1451_v49, %v1315_v59  ;;  %v7349_v6 = vld [vmem:[#allocation59_spill] sm:$0xff] }
 0x25e   : > { %1797 = vst [vmem:[#allocation1 + $0x20] ss:$4 sm:$0xff] %v1505_v7  ;;  %1199 = vrot.lane.b32.xlu0 %v5682_v11, %s4190_s26  ;;  %v1319_v61 = vpop.permute.xlu1 %1318  ;;  %v1039_v11 = vsel %vm982_vm3, %v978_v36, %v7345_v17  ;;  %v980_v43 = vsel %vm921_vm2, %v4177_v55, %v7349_v6 }
 0x25f   : > { %1798 = vst [vmem:[#allocation1 + $0x21] ss:$4 sm:$0xff] %v1639_v33  ;;  %v5754_v62 = vpop.permute.xlu2 %1165  ;;  %v1508_v7 = vsel %vm1479_vm6, %v1453_v34, %v1319_v61  ;;  %v7351_v61 = vld [vmem:[#allocation29_spill] sm:$0xff] }
 0x260   : > { %1799 = vst [vmem:[#allocation1 + $0x22] ss:$4 sm:$0xff] %v1640_v16  ;;  %v1158_v50 = vpop.permute.xlu0 %1157  ;;  %v1645_v37 = vrot.slane %v1508_v7, 2  ;;  %v1646_v28 = vrot.slane %v1508_v7, 4 }
 0x261   : > { %1800 = vst [vmem:[#allocation1 + $0x23] ss:$4 sm:$0xff] %v1641_v30  ;;  %v1455_v59 = vsel %vm1424_vm5, %v7347_v58, %v1158_v50  ;;  %v1647_v30 = vrot.slane %v1508_v7, 6  ;;  %v7352_v50 = vld [vmem:[#allocation34_spill] sm:$0xff] }
 0x262   : > { %v1510_v33 = vsel %vm1479_vm6, %v1455_v59, %v5666_v32 }
 0x263   : > { %v1648_v32 = vrot.slane %v1510_v33, 2  ;;  %v1650_v12 = vrot.slane %v1510_v33, 6 }
 0x264   : > { %v5766_v44 = vld.sshfl [vmem:[#allocation1] sm:$0xff pattern:$0x73625140]  ;;  %1362 = vrot.lane.b32.xlu1 %v1039_v11, %s4191_s27 }
 0x265   : > { %1804 = vst [vmem:[#allocation1 + $0x1] ss:$4 sm:$0xff] %v1507_v42  ;;  %4022 = vmatmul.msk.f32.gmra.mxu0 %vm1906_vm7, %v5707_v4  ;;  %1201 = vrot.lane.b32.xlu2 %v1038_v26, %s4190_s26  ;;  %v981_v26 = vsel %vm921_vm2, %v4176_v31, %v7348_v14  ;;  %v1041_v42 = vsel %vm982_vm3, %v980_v43, %v7351_v61 }
 0x266   : > { %1805 = vst [vmem:[#allocation1 + $0x2] ss:$4 sm:$0xff] %v1642_v20  ;;  %1197 = vrot.lane.b32.xlu0 %v5711_v15, %s4190_s26  ;;  %v1321_v18 = vpop.permute.xlu1 %1320  ;;  %v1042_v16 = vsel %vm982_vm3, %v981_v26, %v7350_v5  ;;  %v7353_v20 = vld [vmem:[#allocation35_spill] sm:$0xff] }
 0x267   : > { %1806 = vst [vmem:[#allocation1 + $0x3] ss:$4 sm:$0xff] %v1643_v54  ;;  %v5779_v4 = vpop.permute.xlu2 %1332  ;;  %v1456_v23 = vsel %vm1424_vm5, %v7353_v20, %v5699_v51 }
 0x268   : > { %v1802_v3 = vld.sshfl [vmem:[#allocation1 + $0x20] sm:$0xff pattern:$0x73625140]  ;;  %1803 = vst [vmem:[#allocation1] ss:$4 sm:$0xff] %v1506_v2  ;;  %v1156_v60 = vpop.permute.xlu0 %1155  ;;  %v1458_v2 = vsel %vm1424_vm5, %v5289_v57, %v5728_v48 }
 0x269   : > { %1807 = vst [vmem:[#allocation1 + $0x20] ss:$4 sm:$0xff] %v1644_v8  ;;  %4026 = vmatmul.msk.f32.vlgmr.msra.gmra.mxu2 %vm1906_vm7, %v1802_v3  ;;  %v1454_v53 = vsel %vm1424_vm5, %v7352_v50, %v1156_v60 }
 0x26a   : > { %1808 = vst [vmem:[#allocation1 + $0x21] ss:$4 sm:$0xff] %v1508_v7  ;;  %v1509_v49 = vsel %vm1479_vm6, %v1454_v53, %v1321_v18 }
 0x26b   : > { %1809 = vst [vmem:[#allocation1 + $0x22] ss:$4 sm:$0xff] %v1645_v37 }
 0x26c   : > { %1810 = vst [vmem:[#allocation1 + $0x23] ss:$4 sm:$0xff] %v1646_v28  ;;  %1203 = vrot.lane.b32.xlu1 %v1039_v11, %s4190_s26  ;;  %v1649_v11 = vrot.slane %v1510_v33, 4 }
 0x26d   : > { %4023 = vmatmul.msk.f32.gmra.mxu0 %vm1906_vm7, %v5731_v63  ;;  %1368 = vrot.lane.b32.xlu2 %v1042_v16, %s4191_s27 }
 0x26e   : > { %1366 = vrot.lane.b32.xlu0 %v1041_v42, %s4191_s27  ;;  %v1162_v47 = vpop.permute.xlu1 %1161 }
 0x26f   : > { %v1811_v36 = vld.sshfl [vmem:[#allocation1] sm:$0xff pattern:$0x73625140]  ;;  %v1335_v54 = vpop.permute.xlu2 %1334  ;;  %v1457_v58 = vsel %vm1424_vm5, %v5320_v10, %v1162_v47  ;;  %v1459_v10 = vsel %vm1424_vm5, %v5355_v9, %v5754_v62 }
 0x270   : > { %1813 = vst [vmem:[#allocation1] ss:$4 sm:$0xff] %v1647_v30  ;;  %v1325_v17 = vpop.permute.xlu0 %1324 }
 0x271   : > { %1815 = vst [vmem:[#allocation1 + $0x2] ss:$4 sm:$0xff] %v1510_v33  ;;  %4027 = vmatmul.msk.f32.gmra.mxu2 %vm1906_vm7, %v1811_v36  ;;  %v1511_v63 = vsel %vm1479_vm6, %v1456_v23, %v1325_v17 }
 0x272   : > { %1816 = vst [vmem:[#allocation1 + $0x3] ss:$4 sm:$0xff] %v1648_v32  ;;  %v1651_v7 = vrot.slane %v1511_v63, 2  ;;  %v1652_v18 = vrot.slane %v1511_v63, 4  ;;  %v1653_v8 = vrot.slane %v1511_v63, 6 }
 0x273   : > { %v1812_v34 = vld.sshfl [vmem:[#allocation1 + $0x20] sm:$0xff pattern:$0x73625140]  ;;  %1814 = vst [vmem:[#allocation1 + $0x1] ss:$4 sm:$0xff] %v1509_v49 }
 0x274   : > { %1817 = vst [vmem:[#allocation1 + $0x20] ss:$4 sm:$0xff] %v1649_v11 }
 0x275   : > { %1818 = vst [vmem:[#allocation1 + $0x21] ss:$4 sm:$0xff] %v1650_v12  ;;  %4024 = vmatmul.msk.f32.gmra.mxu0 %vm1906_vm7, %v5746_v41 }
 0x276   : > { %1819 = vst [vmem:[#allocation1 + $0x22] ss:$4 sm:$0xff] %v1511_v63  ;;  %v1329_v51 = vpop.permute.xlu1 %1328 }
 0x277   : > { %1820 = vst [vmem:[#allocation1 + $0x23] ss:$4 sm:$0xff] %v1651_v7  ;;  %v1513_v37 = vsel %vm1479_vm6, %v1458_v2, %v1329_v51  ;;  %v1178_v57 = vpop.permute.xlu2 %1177 }
 0x278   : > { %v1327_v3 = vpop.permute.xlu0 %1326  ;;  %v1654_v41 = vrot.slane %v1513_v37, 2  ;;  %v1655_v60 = vrot.slane %v1513_v37, 4  ;;  %v1656_v31 = vrot.slane %v1513_v37, 6  ;;  %v1465_v12 = vsel %vm1424_vm5, %v5466_v21, %v1178_v57 }
 0x279   : > { %4028 = vmatmul.msk.f32.gmra.mxu2 %vm1906_vm7, %v1812_v34  ;;  %v1512_v59 = vsel %vm1479_vm6, %v1457_v58, %v1327_v3  ;;  %v5842_v3 = vpop.f32.mrf.mxu0 }
 0x27a   : > { %v1821_v28 = vld.sshfl [vmem:[#allocation1] sm:$0xff pattern:$0x73625140] }
 0x27b   : > { %1823 = vst [vmem:[#allocation1] ss:$4 sm:$0xff] %v1652_v18 }
 0x27c   : > { %1824 = vst [vmem:[#allocation1 + $0x1] ss:$4 sm:$0xff] %v1653_v8 }
 0x27d   : > { %1826 = vst [vmem:[#allocation1 + $0x3] ss:$4 sm:$0xff] %v1513_v37  ;;  %4025 = vmatmul.msk.f32.gmra.mxu0 %vm1906_vm7, %v5766_v44 }
 0x27e   : > { %v1822_v48 = vld.sshfl [vmem:[#allocation1 + $0x20] sm:$0xff pattern:$0x73625140]  ;;  %1825 = vst [vmem:[#allocation1 + $0x2] ss:$4 sm:$0xff] %v1512_v59  ;;  %v1168_v14 = vpop.permute.xlu1 %1167 }
 0x27f   : > { %1827 = vst [vmem:[#allocation1 + $0x20] ss:$4 sm:$0xff] %v1654_v41  ;;  %v1460_v26 = vsel %vm1424_vm5, %v5382_v0, %v1168_v14  ;;  %v1174_v62 = vpop.permute.xlu2 %1173 }
 0x280   : > { %1828 = vst [vmem:[#allocation1 + $0x21] ss:$4 sm:$0xff] %v1655_v60  ;;  %v1331_v33 = vpop.permute.xlu0 %1330  ;;  %v1515_v44 = vsel %vm1479_vm6, %v1460_v26, %v5779_v4  ;;  %v1463_v41 = vsel %vm1424_vm5, %v5437_v13, %v1174_v62 }
 0x281   : > { %4029 = vmatmul.msk.f32.gmra.mxu2 %vm1906_vm7, %v1821_v28  ;;  %1829 = vst [vmem:[#allocation1 + $0x22] ss:$4 sm:$0xff] %v1656_v31  ;;  %v1514_v55 = vsel %vm1479_vm6, %v1459_v10, %v1331_v33  ;;  %v5848_v57 = vpop.f32.mrf.mxu0 }
 0x282   : > { %1830 = vst [vmem:[#allocation1 + $0x23] ss:$4 sm:$0xff] %v1514_v55  ;;  %v1657_v6 = vrot.slane %v1514_v55, 2  ;;  %v1658_v43 = vrot.slane %v1514_v55, 4  ;;  %v1659_v16 = vrot.slane %v1514_v55, 6 }
 0x285   : > { %v1831_v5 = vld.sshfl [vmem:[#allocation1] sm:$0xff pattern:$0x73625140] }
 0x286   : > { %1836 = vst [vmem:[#allocation1 + $0x3] ss:$4 sm:$0xff] %v1515_v44  ;;  %v1172_v9 = vpop.permute.xlu1 %1171 }
 0x287   : > { %1833 = vst [vmem:[#allocation1] ss:$4 sm:$0xff] %v1657_v6  ;;  %v1462_v47 = vsel %vm1424_vm5, %v5406_v35, %v1172_v9  ;;  %v1184_v23 = vpop.permute.xlu2 %1183 }
 0x288   : > { %1834 = vst [vmem:[#allocation1 + $0x1] ss:$4 sm:$0xff] %v1658_v43  ;;  %v1170_v0 = vpop.permute.xlu0 %1169 }
 0x289   : > { %4030 = vmatmul.msk.f32.gmra.mxu2 %vm1906_vm7, %v1822_v48  ;;  %v1832_v30 = vld.sshfl [vmem:[#allocation1 + $0x20] sm:$0xff pattern:$0x73625140]  ;;  %1835 = vst [vmem:[#allocation1 + $0x2] ss:$4 sm:$0xff] %v1659_v16  ;;  %v1461_v61 = vsel %vm1424_vm5, %v5360_v38, %v1170_v0  ;;  %v1468_v48 = vsel %vm1424_vm5, %v5515_v27, %v1184_v23  ;;  %v5859_v0 = vpop.f32.mrf.mxu0 }
 0x28a   : > { %v1516_v42 = vsel %vm1479_vm6, %v1461_v61, %v1335_v54 }
 0x28b   : > { %v1660_v4 = vrot.slane %v1516_v42, 2  ;;  %v1661_v50 = vrot.slane %v1516_v42, 4  ;;  %v1662_v53 = vrot.slane %v1516_v42, 6  ;;  %1837 = vst [vmem:[#allocation1 + $0x20] ss:$4 sm:$0xff] %v1516_v42 }
 0x28d   : > { %1838 = vst [vmem:[#allocation1 + $0x21] ss:$4 sm:$0xff] %v1660_v4 }
 0x28e   : > { %1839 = vst [vmem:[#allocation1 + $0x22] ss:$4 sm:$0xff] %v1661_v50  ;;  %v1176_v32 = vpop.permute.xlu1 %1175 }
 0x28f   : > { %1840 = vst [vmem:[#allocation1 + $0x23] ss:$4 sm:$0xff] %v1662_v53  ;;  %v1464_v35 = vsel %vm1424_vm5, %v5428_v56, %v1176_v32  ;;  %v1180_v8 = vpop.permute.xlu2 %1179 }
 0x290   : > { %v1337_v36 = vpop.permute.xlu0 %1336  ;;  %v1841_v20 = vld.sshfl [vmem:[#allocation1] sm:$0xff pattern:$0x73625140]  ;;  %v1466_v61 = vsel %vm1424_vm5, %v5460_v19, %v1180_v8 }
 0x291   : > { %4031 = vmatmul.msk.f32.gmra.mxu2 %vm1906_vm7, %v1831_v5  ;;  %v1517_v38 = vsel %vm1479_vm6, %v1462_v47, %v1337_v36 }
 0x292   : > { %v1663_v49 = vrot.slane %v1517_v38, 2  ;;  %v1664_v17 = vrot.slane %v1517_v38, 4  ;;  %v1665_v63 = vrot.slane %v1517_v38, 6  ;;  %1843 = vst [vmem:[#allocation1] ss:$4 sm:$0xff] %v1517_v38  ;;  %v5869_v38 = vpop.f32.mrf.mxu0 }
 0x294   : > { %1844 = vst [vmem:[#allocation1 + $0x1] ss:$4 sm:$0xff] %v1663_v49 }
 0x295   : > { %1845 = vst [vmem:[#allocation1 + $0x2] ss:$4 sm:$0xff] %v1664_v17 }
 0x296   : > { %1846 = vst [vmem:[#allocation1 + $0x3] ss:$4 sm:$0xff] %v1665_v63  ;;  %v1343_v11 = vpop.permute.xlu1 %1342  ;;  %v1842_v7 = vld.sshfl [vmem:[#allocation1 + $0x20] sm:$0xff pattern:$0x73625140] }
 0x297   : > { %v1520_v34 = vsel %vm1479_vm6, %v1465_v12, %v1343_v11  ;;  %v1353_v31 = vpop.permute.xlu2 %1352 }
 0x298   : > { %v1341_v54 = vpop.permute.xlu0 %1340  ;;  %v1669_v37 = vrot.slane %v1520_v34, 2  ;;  %v1670_v28 = vrot.slane %v1520_v34, 4  ;;  %v1671_v26 = vrot.slane %v1520_v34, 6 }
 0x299   : > { %4032 = vmatmul.msk.f32.gmra.mxu2 %vm1906_vm7, %v1832_v30  ;;  %v1519_v51 = vsel %vm1479_vm6, %v1464_v35, %v1341_v54 }
 0x29a   : > { %v1666_v2 = vrot.slane %v1519_v51, 2  ;;  %v1667_v18 = vrot.slane %v1519_v51, 4  ;;  %1848 = vst [vmem:[#allocation1 + $0x21] ss:$4 sm:$0xff] %v1519_v51  ;;  %v1668_v58 = vrot.slane %v1519_v51, 6  ;;  %v5876_v51 = vpop.f32.mrf.mxu0 }
 0x29c   : > { %1849 = vst [vmem:[#allocation1 + $0x22] ss:$4 sm:$0xff] %v1666_v2 }
 0x29d   : > { %v1851_v21 = vld.sshfl [vmem:[#allocation1] sm:$0xff pattern:$0x73625140]  ;;  %1850 = vst [vmem:[#allocation1 + $0x23] ss:$4 sm:$0xff] %v1667_v18 }
 0x29e   : > { %1854 = vst [vmem:[#allocation1 + $0x1] ss:$4 sm:$0xff] %v1520_v34  ;;  %v1182_v56 = vpop.permute.xlu1 %1181 }
 0x29f   : > { %1855 = vst [vmem:[#allocation1 + $0x2] ss:$4 sm:$0xff] %v1669_v37  ;;  %v1467_v13 = vsel %vm1424_vm5, %v5488_v1, %v1182_v56  ;;  %v1351_v62 = vpop.permute.xlu2 %1350 }
 0x2a0   : > { %1856 = vst [vmem:[#allocation1 + $0x3] ss:$4 sm:$0xff] %v1670_v28  ;;  %v1339_v59 = vpop.permute.xlu0 %1338 }
 0x2a1   : > { %4033 = vmatmul.msk.f32.gmra.mxu2 %vm1906_vm7, %v1841_v20  ;;  %1853 = vst [vmem:[#allocation1] ss:$4 sm:$0xff] %v1668_v58  ;;  %v1518_v60 = vsel %vm1479_vm6, %v1463_v41, %v1339_v59 }
 0x2a2   : > { %1847 = vst [vmem:[#allocation1 + $0x20] ss:$4 sm:$0xff] %v1518_v60 }
 0x2a6   : > { %v1349_v14 = vpop.permute.xlu1 %1348 }
 0x2a7   : > { %v1523_v10 = vsel %vm1479_vm6, %v1468_v48, %v1349_v14  ;;  %v1359_v23 = vpop.permute.xlu2 %1358 }
 0x2a8   : > { %v1675_v33 = vrot.slane %v1523_v10, 2  ;;  %v1347_v55 = vpop.permute.xlu0 %1346  ;;  %v1861_v43 = vld.sshfl [vmem:[#allocation1] sm:$0xff pattern:$0x73625140]  ;;  %v1677_v20 = vrot.slane %v1523_v10, 6  ;;  %v1676_v49 = vrot.slane %v1523_v10, 4 }
 0x2a9   : > { %4034 = vmatmul.msk.f32.gmra.mxu2 %vm1906_vm7, %v1842_v7  ;;  %v1852_v44 = vld.sshfl [vmem:[#allocation1 + $0x20] sm:$0xff pattern:$0x73625140]  ;;  %v1522_v6 = vsel %vm1479_vm6, %v1467_v13, %v1347_v55  ;;  %1865 = vst [vmem:[#allocation1 + $0x2] ss:$4 sm:$0xff] %v1523_v10 }
 0x2aa   : > { %1857 = vst [vmem:[#allocation1 + $0x20] ss:$4 sm:$0xff] %v1671_v26  ;;  %v1672_v5 = vrot.slane %v1522_v6, 2  ;;  %v1673_v16 = vrot.slane %v1522_v6, 4  ;;  %v1674_v27 = vrot.slane %v1522_v6, 6 }
 0x2ab   : > { %1866 = vst [vmem:[#allocation1 + $0x3] ss:$4 sm:$0xff] %v1675_v33 }
 0x2ac   : > { %1859 = vst [vmem:[#allocation1 + $0x22] ss:$4 sm:$0xff] %v1522_v6 }
 0x2ad   : > { %1860 = vst [vmem:[#allocation1 + $0x23] ss:$4 sm:$0xff] %v1672_v5 }
 0x2ae   : > { %v1188_v9 = vpop.permute.xlu1 %1187  ;;  %1863 = vst [vmem:[#allocation1] ss:$4 sm:$0xff] %v1673_v16 }
 0x2af   : > { %v1470_v1 = vsel %vm1424_vm5, %v5546_v45, %v1188_v9  ;;  %1864 = vst [vmem:[#allocation1 + $0x1] ss:$4 sm:$0xff] %v1674_v27  ;;  %v1196_v34 = vpop.permute.xlu2 %1195 }
 0x2b0   : > { %v1345_v30 = vpop.permute.xlu0 %1344  ;;  %v1525_v42 = vsel %vm1479_vm6, %v1470_v1, %v1353_v31  ;;  %v5885_v31 = vpop.f32.mrf.mxu0  ;;  %v1474_v14 = vsel %vm1424_vm5, %v5591_v46, %v1196_v34 }
 0x2b1   : > { %4035 = vmatmul.msk.f32.gmra.mxu2 %vm1906_vm7, %v1851_v21  ;;  %v1521_v4 = vsel %vm1479_vm6, %v1466_v61, %v1345_v30  ;;  %v1678_v50 = vrot.slane %v1525_v42, 2  ;;  %v1679_v53 = vrot.slane %v1525_v42, 4  ;;  %v1680_v32 = vrot.slane %v1525_v42, 6  ;;  %v5905_v30 = vld [vmem:[%s7149_s2] ss:$0 sm:$0xff] }
 0x2b2   : > { %1858 = vst [vmem:[#allocation1 + $0x21] ss:$4 sm:$0xff] %v1521_v4  ;;  %v2138_v34 = vmul.f32 %v5905_v30, %v5869_v38 }
 0x2b6   : > { %v1190_v47 = vpop.permute.xlu1 %1189  ;;  %v1871_v36 = vld.sshfl [vmem:[#allocation1] sm:$0xff pattern:$0x73625140] }
 0x2b7   : > { %1873 = vst [vmem:[#allocation1] ss:$4 sm:$0xff] %v1678_v50  ;;  %v1471_v35 = vsel %vm1424_vm5, %v5537_v29, %v1190_v47  ;;  %v1365_v60 = vpop.permute.xlu2 %1364 }
 0x2b8   : > { %v1186_v45 = vpop.permute.xlu0 %1185  ;;  %1874 = vst [vmem:[#allocation1 + $0x1] ss:$4 sm:$0xff] %v1679_v53  ;;  %v5896_v27 = vpop.f32.mrf.mxu0 }
 0x2b9   : > { %4036 = vmatmul.msk.f32.gmra.mxu2 %vm1906_vm7, %v1852_v44  ;;  %v1469_v19 = vsel %vm1424_vm5, %v5573_v52, %v1186_v45  ;;  %1875 = vst [vmem:[#allocation1 + $0x2] ss:$4 sm:$0xff] %v1680_v32  ;;  %v1862_v17 = vld.sshfl [vmem:[#allocation1 + $0x20] sm:$0xff pattern:$0x73625140] }
 0x2ba   : > { %1868 = vst [vmem:[#allocation1 + $0x21] ss:$4 sm:$0xff] %v1677_v20  ;;  %v1524_v63 = vsel %vm1479_vm6, %v1469_v19, %v1351_v62  ;;  %v5918_v45 = vld [vmem:[%s7149_s2 + $0x1] ss:$0 sm:$0xff] }
 0x2bb   : > { %1867 = vst [vmem:[#allocation1 + $0x20] ss:$4 sm:$0xff] %v1676_v49  ;;  %v2136_v49 = vmul.f32 %v5905_v30, %v5848_v57 }
 0x2bc   : > { %1870 = vst [vmem:[#allocation1 + $0x23] ss:$4 sm:$0xff] %v1525_v42 }
 0x2bd   : > { %1869 = vst [vmem:[#allocation1 + $0x22] ss:$4 sm:$0xff] %v1524_v63  ;;  %v2179_v63 = vadd.f32 %v5918_v45, %v2136_v49 }
 0x2be   : > { %v1194_v11 = vpop.permute.xlu1 %1193 }
 0x2bf   : > { %v1473_v2 = vsel %vm1424_vm5, %v5604_v22, %v1194_v11  ;;  %v1202_v16 = vpop.permute.xlu2 %1201  ;;  %v2137_v11 = vmul.f32 %v5905_v30, %v5859_v0 }
 0x2c0   : > { %v1355_v12 = vpop.permute.xlu0 %1354  ;;  %v1528_v28 = vsel %vm1479_vm6, %v1473_v2, %v1359_v23  ;;  %v1477_v4 = vsel %vm1424_vm5, %v5688_v24, %v1202_v16 }
 0x2c1   : > { %4037 = vmatmul.msk.f32.gmra.mxu2 %vm1906_vm7, %v1861_v43  ;;  %v1526_v52 = vsel %vm1479_vm6, %v1471_v35, %v1355_v12  ;;  %v1684_v58 = vrot.slane %v1528_v28, 2  ;;  %v1685_v41 = vrot.slane %v1528_v28, 4  ;;  %v1686_v59 = vrot.slane %v1528_v28, 6 }
 0x2c2   : > { %v1681_v54 = vrot.slane %v1526_v52, 2  ;;  %v1682_v7 = vrot.slane %v1526_v52, 4  ;;  %1876 = vst [vmem:[#allocation1 + $0x3] ss:$4 sm:$0xff] %v1526_v52  ;;  %v1683_v18 = vrot.slane %v1526_v52, 6  ;;  %v2220_v35 = vmax.f32 %v2179_v63, 0.0 }
 0x2c3   : > { %v2180_v57 = vadd.f32 %v5918_v45, %v2137_v11 }
 0x2c4   : > { %v1872_v8 = vld.sshfl [vmem:[#allocation1 + $0x20] sm:$0xff pattern:$0x73625140]  ;;  %v2306_v38 = vrot.slane %v2220_v35, 6 }
 0x2c5   : > { %1877 = vst [vmem:[#allocation1 + $0x20] ss:$4 sm:$0xff] %v1681_v54 }
 0x2c6   : > { %v1357_v37 = vpop.permute.xlu1 %1356  ;;  %1878 = vst [vmem:[#allocation1 + $0x21] ss:$4 sm:$0xff] %v1682_v7 }
 0x2c7   : > { %1879 = vst [vmem:[#allocation1 + $0x22] ss:$4 sm:$0xff] %v1683_v18  ;;  %v1369_v53 = vpop.permute.xlu2 %1368 }
 0x2c8   : > { %v1192_v29 = vpop.permute.xlu0 %1191 }
 0x2c9   : > { %4038 = vmatmul.msk.f32.gmra.mxu2 %vm1906_vm7, %v1862_v17  ;;  %v1472_v21 = vsel %vm1424_vm5, %v5635_v25, %v1192_v29  ;;  %v1881_v56 = vld.sshfl [vmem:[#allocation1] sm:$0xff pattern:$0x73625140]  ;;  %v2305_v29 = vrot.slane %v2220_v35, 4 }
 0x2ca   : > { %1883 = vst [vmem:[#allocation1] ss:$4 sm:$0xff] %v1528_v28  ;;  %v1527_v22 = vsel %vm1479_vm6, %v1472_v21, %v1357_v37  ;;  %v2221_v37 = vmax.f32 %v2180_v57, 0.0  ;;  %v2181_v28 = vadd.f32 %v5918_v45, %v2138_v34  ;;  %v2139_v21 = vmul.f32 %v5905_v30, %v5876_v51 }
 0x2cb   : > { %1884 = vst [vmem:[#allocation1 + $0x1] ss:$4 sm:$0xff] %v1684_v58 }
 0x2cc   : > { %1885 = vst [vmem:[#allocation1 + $0x2] ss:$4 sm:$0xff] %v1685_v41  ;;  %v2307_v58 = vrot.slane %v2221_v37, 2  ;;  %v2308_v41 = vrot.slane %v2221_v37, 4 }
 0x2cd   : > { %1886 = vst [vmem:[#allocation1 + $0x3] ss:$4 sm:$0xff] %v1686_v59 }
 0x2ce   : > { %v1361_v48 = vpop.permute.xlu1 %1360  ;;  %1880 = vst [vmem:[#allocation1 + $0x23] ss:$4 sm:$0xff] %v1527_v22  ;;  %v2309_v22 = vrot.slane %v2221_v37, 6 }
 0x2cf   : > { %v1529_v25 = vsel %vm1479_vm6, %v1474_v14, %v1361_v48  ;;  %v2182_v48 = vadd.f32 %v5918_v45, %v2139_v21 }
 0x2d0   : > { %v1200_v10 = vpop.permute.xlu0 %1199  ;;  %v1687_v33 = vrot.slane %v1529_v25, 2  ;;  %v1688_v44 = vrot.slane %v1529_v25, 4  ;;  %v1689_v43 = vrot.slane %v1529_v25, 6 }
 0x2d1   : > { %4039 = vmatmul.msk.f32.gmra.mxu2 %vm1906_vm7, %v1871_v36  ;;  %v1476_v26 = vsel %vm1424_vm5, %v5626_v39, %v1200_v10  ;;  %v2135_v36 = vmul.f32 %v5905_v30, %v5842_v3 }
 0x2d2   : > { %v1531_v13 = vsel %vm1479_vm6, %v1476_v26, %v1365_v60  ;;  %v2422_v60 = vlaneseq }
 0x2d3   : > { %v1690_v46 = vrot.slane %v1531_v13, 2  ;;  %v1691_v9 = vrot.slane %v1531_v13, 4  ;;  %v1692_v50 = vrot.slane %v1531_v13, 6  ;;  %v2178_v3 = vadd.f32 %v5918_v45, %v2135_v36 }
 0x2d4   : > { %v5894_v55 = vld.sshfl [vmem:[#allocation1] sm:$0xff pattern:$0x73625140]  ;;  %v5949_v26 = vshrl.u32 %v2422_v60, 7 }
 0x2d5   : > { %v1882_v6 = vld.sshfl [vmem:[#allocation1 + $0x20] sm:$0xff pattern:$0x73625140]  ;;  %1894 = vst [vmem:[#allocation1 + $0x1] ss:$4 sm:$0xff] %v1531_v13  ;;  %v2219_v12 = vmax.f32 %v2178_v3, 0.0 }
 0x2d6   : > { %v1363_v5 = vpop.permute.xlu1 %1362  ;;  %1887 = vst [vmem:[#allocation1 + $0x20] ss:$4 sm:$0xff] %v1529_v25  ;;  %v2140_v25 = vmul.f32 %v5905_v30, %v5885_v31  ;;  %v2223_v13 = vmax.f32 %v2182_v48, 0.0  ;;  %vm2426_vm8 = vcmp.ge.s32.totalorder %v5949_v26, 1 }
 0x2d7   : > { %1888 = vst [vmem:[#allocation1 + $0x21] ss:$4 sm:$0xff] %v1687_v33  ;;  %v2301_v7 = vrot.slane %v2219_v12, 2  ;;  %v2302_v18 = vrot.slane %v2219_v12, 4  ;;  %v2303_v0 = vrot.slane %v2219_v12, 6 }
 0x2d8   : > { %v1198_v62 = vpop.permute.xlu0 %1197  ;;  %1889 = vst [vmem:[#allocation1 + $0x22] ss:$4 sm:$0xff] %v1688_v44  ;;  %v2183_v33 = vadd.f32 %v5918_v45, %v2140_v25  ;;  %v2313_v44 = vrot.slane %v2223_v13, 2 }
 0x2d9   : > { %4040 = vmatmul.msk.f32.gmra.mxu2 %vm1906_vm7, %v1872_v8  ;;  %v1475_v39 = vsel %vm1424_vm5, %v5654_v40, %v1198_v62  ;;  %1890 = vst [vmem:[#allocation1 + $0x23] ss:$4 sm:$0xff] %v1689_v43  ;;  %v2304_v8 = vrot.slane %v2220_v35, 2  ;;  %v5964_v62 = vadd.s32 16, %v5949_v26 }
 0x2da   : > { %v1530_v1 = vsel %vm1479_vm6, %v1475_v39, %v1363_v5  ;;  %1895 = vst [vmem:[#allocation1 + $0x2] ss:$4 sm:$0xff] %v1690_v46  ;;  %v4192_v5 = vmov 0.0   ;;  %v2224_v46 = vmax.f32 %v2183_v33, 0.0 }
 0x2db   : > { %1896 = vst [vmem:[#allocation1 + $0x3] ss:$4 sm:$0xff] %v1691_v9  ;;  %v2841_v31 = vrot.slane %v4192_v5, 1  ;;  %vm2437_vm9 = vcmp.le.s32.totalorder %v5964_v62, 16 }
 0x2dc   : > { %1893 = vst [vmem:[#allocation1] ss:$4 sm:$0xff] %v1530_v1 }
 0x2dd   : > { %v5967_v1 = vpack.i.bf16 %v2841_v31, %v2841_v31 }
 0x2de   : > { %v1204_v61 = vpop.permute.xlu1 %1203 }
 0x2df   : > { %v1478_v42 = vsel %vm1424_vm5, %v5711_v15, %v1204_v61  ;;  %v5920_v15 = vpop.f32.mrf.mxu0  ;;  %7354 = vst [vmem:[#allocation27_spill] sm:$0xff] %v5967_v1  ;;  %v2315_v61 = vrot.slane %v2223_v13, 6  ;;  %4119 = vrot.lane.b32.xlu0 %v5967_v1, %s4189_s25 }
 0x2e0   : > { %v1367_v40 = vpop.permute.xlu0 %1366  ;;  %v1892_v32 = vld.sshfl [vmem:[#allocation1 + $0x20] sm:$0xff pattern:$0x73625140]  ;;  %v1533_v24 = vsel %vm1479_vm6, %v1478_v42, %v1369_v53  ;;  %v2317_v53 = vrot.slane %v2224_v46, 4  ;;  %v2142_v36 = vmul.f32 %v5905_v30, %v5920_v15 }
 0x2e1   : > { %4041 = vmatmul.msk.f32.gmra.mxu2 %vm1906_vm7, %v1881_v56  ;;  %v1532_v47 = vsel %vm1479_vm6, %v1477_v4, %v1367_v40  ;;  %1897 = vst [vmem:[#allocation1 + $0x20] ss:$4 sm:$0xff] %v1692_v50  ;;  %v2222_v56 = vmax.f32 %v2181_v28, 0.0  ;;  %v2316_v50 = vrot.slane %v2224_v46, 2 }
 0x2e2   : > { %v1693_v20 = vrot.slane %v1532_v47, 2  ;;  %v1694_v23 = vrot.slane %v1532_v47, 4  ;;  %v1695_v19 = vrot.slane %v1532_v47, 6  ;;  %1898 = vst [vmem:[#allocation1 + $0x21] ss:$4 sm:$0xff] %v1532_v47  ;;  %v2318_v47 = vrot.slane %v2224_v46, 6 }
 0x2e3   : > { %v1901_v17 = vld.sshfl [vmem:[#allocation1] sm:$0xff pattern:$0x73625140]  ;;  %v2310_v14 = vrot.slane %v2222_v56, 2  ;;  %v2311_v51 = vrot.slane %v2222_v56, 4  ;;  %v2312_v10 = vrot.slane %v2222_v56, 6 }
 0x2e4   : > { %1899 = vst [vmem:[#allocation1 + $0x22] ss:$4 sm:$0xff] %v1693_v20  ;;  %4045 = vmatmul.msk.f32.vlgmr.msra.gmra.mxu3 %vm1906_vm7, %v1901_v17  ;;  %v2185_v17 = vadd.f32 %v5918_v45, %v2142_v36 }
 0x2e5   : > { %1904 = vst [vmem:[#allocation1 + $0x1] ss:$4 sm:$0xff] %v1533_v24 }
 0x2e6   : > { %1900 = vst [vmem:[#allocation1 + $0x23] ss:$4 sm:$0xff] %v1694_v23 }
 0x2e7   : > { %1903 = vst [vmem:[#allocation1] ss:$4 sm:$0xff] %v1695_v19  ;;  %v5931_v52 = vpop.f32.mrf.mxu0 }
 0x2e8   : > { %v2143_v15 = vmul.f32 %v5905_v30, %v5931_v52 }
 0x2e9   : > { %4042 = vmatmul.msk.f32.gmra.mxu2 %vm1906_vm7, %v1882_v6 }
 0x2ed   : > { %v1902_v54 = vld.sshfl [vmem:[#allocation1 + $0x20] sm:$0xff pattern:$0x73625140] }
 0x2ee   : > { %v1905_v2 = vld.sshfl [vmem:[#allocation1] sm:$0xff pattern:$0x73625140]  ;;  %2464 = vst [vmem:[#allocation1 + $0x20] ss:$4 sm:$0xff] %v2220_v35  ;;  %4046 = vmatmul.msk.f32.gmra.mxu3 %vm1906_vm7, %v1902_v54  ;;  %v2186_v35 = vadd.f32 %v5918_v45, %v2143_v15 }
 0x2ef   : > { %2456 = vst [vmem:[#allocation1] ss:$4 sm:$0xff] %v2219_v12  ;;  %v5942_v59 = vpop.f32.mrf.mxu0  ;;  %v2226_v12 = vmax.f32 %v2185_v17, 0.0 }
 0x2f0   : > { %2458 = vst [vmem:[#allocation1 + $0x1] ss:$4 sm:$0xff] %v2301_v7  ;;  %v2144_v28 = vmul.f32 %v5905_v30, %v5942_v59 }
 0x2f1   : > { %2460 = vst [vmem:[#allocation1 + $0x2] ss:$4 sm:$0xff] %v2302_v18  ;;  %4043 = vmatmul.msk.f32.gmra.mxu2 %vm1906_vm7, %v5894_v55  ;;  %v2141_v55 = vmul.f32 %v5905_v30, %v5896_v27  ;;  %v2314_v27 = vrot.slane %v2223_v13, 4  ;;  %v2322_v52 = vrot.slane %v2226_v12, 2 }
 0x2f2   : > { %2462 = vst [vmem:[#allocation1 + $0x3] ss:$4 sm:$0xff] %v2303_v0  ;;  %v2187_v59 = vadd.f32 %v5918_v45, %v2144_v28 }
 0x2f3   : > { %2466 = vst [vmem:[#allocation1 + $0x21] ss:$4 sm:$0xff] %v2304_v8  ;;  %v2184_v9 = vadd.f32 %v5918_v45, %v2141_v55  ;;  %v2323_v8 = vrot.slane %v2226_v12, 4 }
 0x2f4   : > { %2468 = vst [vmem:[#allocation1 + $0x22] ss:$4 sm:$0xff] %v2305_v29 }
 0x2f5   : > { %2470 = vst [vmem:[#allocation1 + $0x23] ss:$4 sm:$0xff] %v2306_v38  ;;  %v2225_v40 = vmax.f32 %v2184_v9, 0.0  ;;  %v6003_v38 = vpop.f32.mrf.mxu2 }
 0x2f6   : > { %2473 = vst [vmem:[#allocation1] ss:$4 sm:$0xff] %v2221_v37  ;;  %4047 = vmatmul.msk.f32.gmra.mxu3 %vm1906_vm7, %v1905_v2  ;;  %v2227_v2 = vmax.f32 %v2186_v35, 0.0  ;;  %v2324_v37 = vrot.slane %v2226_v12, 6 }
 0x2f7   : > { %2475 = vst [vmem:[#allocation1 + $0x20] ss:$4 sm:$0xff] %v2307_v58  ;;  %v5955_v6 = vpop.f32.mrf.mxu0  ;;  %v2319_v19 = vrot.slane %v2225_v40, 2  ;;  %v2320_v63 = vrot.slane %v2225_v40, 4  ;;  %v2321_v34 = vrot.slane %v2225_v40, 6 }
 0x2f8   : > { %2476 = vst [vmem:[#allocation1 + $0x21] ss:$4 sm:$0xff] %v2308_v41  ;;  %v2325_v58 = vrot.slane %v2227_v2, 2  ;;  %v2326_v41 = vrot.slane %v2227_v2, 4  ;;  %v2145_v60 = vmul.f32 %v5905_v30, %v5955_v6 }
 0x2f9   : > { %2477 = vst [vmem:[#allocation1 + $0x22] ss:$4 sm:$0xff] %v2309_v22  ;;  %4044 = vmatmul.msk.f32.gmra.mxu2 %vm1906_vm7, %v1892_v32 }
 0x2fa   : > { %2478 = vst [vmem:[#allocation1 + $0x23] ss:$4 sm:$0xff] %v2222_v56  ;;  %v2188_v25 = vadd.f32 %v5918_v45, %v2145_v60 }
 0x2fb   : > { %2480 = vst [vmem:[#allocation1] ss:$4 sm:$0xff] %v2310_v14  ;;  %v2327_v14 = vrot.slane %v2227_v2, 6 }
 0x2fc   : > { %2481 = vst [vmem:[#allocation1 + $0x1] ss:$4 sm:$0xff] %v2311_v51 }
 0x2fd   : > { %2482 = vst [vmem:[#allocation1 + $0x2] ss:$4 sm:$0xff] %v2312_v10  ;;  %v2228_v10 = vmax.f32 %v2187_v59, 0.0  ;;  %v6021_v55 = vpop.f32.mrf.mxu2 }
 0x2fe   : > { %2483 = vst [vmem:[#allocation1 + $0x3] ss:$4 sm:$0xff] %v2223_v13 }
 0x2ff   : > { %v5979_v20 = vpop.f32.mrf.mxu0  ;;  %v2328_v6 = vrot.slane %v2228_v10, 2 }
 0x301   : > { %v2479_v43 = vld.sshfl [vmem:[#allocation1 + $0x20] sm:$0xff pattern:$0x73625140] }
 0x302   : > { %2484 = vst [vmem:[#allocation1 + $0x20] ss:$4 sm:$0xff] %v2313_v44  ;;  %v5960_v16 = vsel %vm2426_vm8, %v2479_v43, 0.0  ;;  %v2229_v43 = vmax.f32 %v2188_v25, 0.0 }
 0x303   : > { %v2846_v39 = vrot.slane %v5960_v16, 1 }
 0x305   : > { %v5969_v42 = vld.sshfl [vmem:[#allocation1] sm:$0xff pattern:$0x73625140] }
 0x306   : > { %2487 = vst [vmem:[#allocation1] ss:$4 sm:$0xff] %v2314_v27  ;;  %v2847_v4 = vrot.slane %v5969_v42, 1  ;;  %v2330_v27 = vrot.slane %v2228_v10, 6 }
 0x307   : > { %2488 = vst [vmem:[#allocation1 + $0x1] ss:$4 sm:$0xff] %v2315_v61  ;;  %v2046_v54 = vpop.f32.mrf.mxu0 }
 0x308   : > { %2489 = vst [vmem:[#allocation1 + $0x2] ss:$4 sm:$0xff] %v2224_v46  ;;  %v2848_v32 = vsel %vm359_vm0, %v2846_v39, %v2847_v4  ;;  %v2329_v46 = vrot.slane %v2228_v10, 4  ;;  %v2146_v39 = vmul.f32 %v5905_v30, %v5979_v20 }
 0x309   : > { %v2486_v24 = vld.sshfl [vmem:[#allocation1 + $0x20] sm:$0xff pattern:$0x73625140]  ;;  %2490 = vst [vmem:[#allocation1 + $0x3] ss:$4 sm:$0xff] %v2316_v50  ;;  %2935 = vrot.lane.b32.xlu1 %v2848_v32, %s4189_s25 }
 0x30a   : > { %2491 = vst [vmem:[#allocation1 + $0x20] ss:$4 sm:$0xff] %v2317_v53  ;;  %v5983_v23 = vsel %vm2437_vm9, %v2486_v24, 0.0  ;;  %v2189_v36 = vadd.f32 %v5918_v45, %v2146_v39  ;;  %v2147_v24 = vmul.f32 %v5905_v30, %v2046_v54 }
 0x30b   : > { %2492 = vst [vmem:[#allocation1 + $0x21] ss:$4 sm:$0xff] %v2318_v47  ;;  %v2849_v49 = vrot.slane %v5983_v23, 1  ;;  %v2333_v47 = vrot.slane %v2229_v43, 6 }
 0x30c   : > { %2493 = vst [vmem:[#allocation1 + $0x22] ss:$4 sm:$0xff] %v2225_v40  ;;  %v2332_v40 = vrot.slane %v2229_v43, 4  ;;  %v2230_v17 = vmax.f32 %v2189_v36, 0.0  ;;  %v2190_v15 = vadd.f32 %v5918_v45, %v2147_v24 }
 0x30d   : > { %2494 = vst [vmem:[#allocation1 + $0x23] ss:$4 sm:$0xff] %v2319_v19  ;;  %v2850_v3 = vsel %vm359_vm0, %v2847_v4, %v2849_v49  ;;  %v2331_v4 = vrot.slane %v2229_v43, 2  ;;  %v6039_v49 = vpop.f32.mrf.mxu2 }
 0x30e   : > { %2937 = vrot.lane.b32.xlu2 %v2850_v3, %s4189_s25  ;;  %v2231_v35 = vmax.f32 %v2190_v15, 0.0 }
 0x30f   : > { %v2049_v51 = vpop.f32.mrf.mxu0 }
 0x310   : > { %v2495_v11 = vld.sshfl [vmem:[#allocation1] sm:$0xff pattern:$0x73625140] }
 0x311   : > { %2497 = vst [vmem:[#allocation1] ss:$4 sm:$0xff] %v2320_v63  ;;  %v5994_v57 = vsel %vm2426_vm8, %v2495_v11, 0.0  ;;  %v2148_v63 = vmul.f32 %v5905_v30, %v2049_v51 }
 0x312   : > { %v2851_v18 = vrot.slane %v5994_v57, 1 }
 0x314   : > { %v5996_v7 = vld.sshfl [vmem:[#allocation1 + $0x20] sm:$0xff pattern:$0x73625140] }
 0x315   : > { %2499 = vst [vmem:[#allocation1 + $0x20] ss:$4 sm:$0xff] %v2321_v34  ;;  %v2852_v0 = vrot.slane %v5996_v7, 1  ;;  %v2335_v34 = vrot.slane %v2230_v17, 4 }
 0x316   : > { %2500 = vst [vmem:[#allocation1 + $0x21] ss:$4 sm:$0xff] %v2226_v12  ;;  %v2334_v12 = vrot.slane %v2230_v17, 2 }
 0x317   : > { %2501 = vst [vmem:[#allocation1 + $0x22] ss:$4 sm:$0xff] %v2322_v52  ;;  %v2853_v29 = vsel %vm359_vm0, %v2851_v18, %v2852_v0  ;;  %v2052_v53 = vpop.f32.mrf.mxu0 }
 0x318   : > { %v2498_v21 = vld.sshfl [vmem:[#allocation1] sm:$0xff pattern:$0x73625140]  ;;  %2502 = vst [vmem:[#allocation1 + $0x23] ss:$4 sm:$0xff] %v2323_v8  ;;  %2939 = vrot.lane.b32.xlu0 %v2853_v29, %s4189_s25  ;;  %v2191_v8 = vadd.f32 %v5918_v45, %v2148_v63  ;;  %v2338_v29 = vrot.slane %v2231_v35, 4 }
 0x319   : > { %2504 = vst [vmem:[#allocation1] ss:$4 sm:$0xff] %v2324_v37  ;;  %v6008_v56 = vsel %vm2437_vm9, %v2498_v21, 0.0  ;;  %v2337_v37 = vrot.slane %v2231_v35, 2 }
 0x31a   : > { %2505 = vst [vmem:[#allocation1 + $0x1] ss:$4 sm:$0xff] %v2227_v2  ;;  %v2854_v22 = vrot.slane %v6008_v56, 1  ;;  %v2336_v2 = vrot.slane %v2230_v17, 6  ;;  %v2232_v60 = vmax.f32 %v2191_v8, 0.0 }
 0x31b   : > { %2506 = vst [vmem:[#allocation1 + $0x2] ss:$4 sm:$0xff] %v2325_v58  ;;  %v6054_v58 = vpop.f32.mrf.mxu2 }
 0x31c   : > { %2507 = vst [vmem:[#allocation1 + $0x3] ss:$4 sm:$0xff] %v2326_v41  ;;  %v2855_v48 = vsel %vm359_vm0, %v2852_v0, %v2854_v22  ;;  %v2339_v41 = vrot.slane %v2231_v35, 6  ;;  %v2149_v22 = vmul.f32 %v5905_v30, %v2052_v53  ;;  %v2340_v25 = vrot.slane %v2232_v60, 2 }
 0x31d   : > { %2941 = vrot.lane.b32.xlu1 %v2855_v48, %s4189_s25 }
 0x31e   : > { %v2192_v51 = vadd.f32 %v5918_v45, %v2149_v22 }
 0x31f   : > { %v2503_v13 = vld.sshfl [vmem:[#allocation1 + $0x20] sm:$0xff pattern:$0x73625140]  ;;  %v2055_v52 = vpop.f32.mrf.mxu0 }
 0x320   : > { %2508 = vst [vmem:[#allocation1 + $0x20] ss:$4 sm:$0xff] %v2327_v14  ;;  %v6019_v33 = vsel %vm2426_vm8, %v2503_v13, 0.0 }
 0x321   : > { %v2856_v44 = vrot.slane %v6019_v33, 1 }
 0x323   : > { %v6024_v31 = vld.sshfl [vmem:[#allocation1] sm:$0xff pattern:$0x73625140] }
 0x324   : > { %2511 = vst [vmem:[#allocation1] ss:$4 sm:$0xff] %v2228_v10  ;;  %v2857_v9 = vrot.slane %v6024_v31, 1  ;;  %v2150_v10 = vmul.f32 %v5905_v30, %v2055_v52 }
 0x325   : > { %2512 = vst [vmem:[#allocation1 + $0x1] ss:$4 sm:$0xff] %v2328_v6 }
 0x326   : > { %2513 = vst [vmem:[#allocation1 + $0x2] ss:$4 sm:$0xff] %v2329_v46  ;;  %v2858_v61 = vsel %vm359_vm0, %v2856_v44, %v2857_v9  ;;  %v2193_v46 = vadd.f32 %v5918_v45, %v2150_v10 }
 0x327   : > { %v2510_v50 = vld.sshfl [vmem:[#allocation1 + $0x20] sm:$0xff pattern:$0x73625140]  ;;  %2514 = vst [vmem:[#allocation1 + $0x3] ss:$4 sm:$0xff] %v2330_v27  ;;  %2943 = vrot.lane.b32.xlu2 %v2858_v61, %s4189_s25  ;;  %v2058_v13 = vpop.f32.mrf.mxu0  ;;  %v6072_v27 = vpop.f32.mrf.mxu2  ;;  %v2342_v61 = vrot.slane %v2232_v60, 6 }
 0x328   : > { %2515 = vst [vmem:[#allocation1 + $0x20] ss:$4 sm:$0xff] %v2229_v43  ;;  %v6033_v32 = vsel %vm2437_vm9, %v2510_v50, 0.0  ;;  %v2233_v43 = vmax.f32 %v2192_v51, 0.0  ;;  %v2234_v53 = vmax.f32 %v2193_v46, 0.0 }
 0x329   : > { %2516 = vst [vmem:[#allocation1 + $0x21] ss:$4 sm:$0xff] %v2331_v4  ;;  %v2859_v20 = vrot.slane %v6033_v32, 1 }
 0x32a   : > { %2517 = vst [vmem:[#allocation1 + $0x22] ss:$4 sm:$0xff] %v2332_v40  ;;  %v2343_v40 = vrot.slane %v2233_v43, 2  ;;  %v2345_v24 = vrot.slane %v2233_v43, 6 }
 0x32b   : > { %2518 = vst [vmem:[#allocation1 + $0x23] ss:$4 sm:$0xff] %v2333_v47  ;;  %v2860_v19 = vsel %vm359_vm0, %v2857_v9, %v2859_v20  ;;  %v2341_v9 = vrot.slane %v2232_v60, 4  ;;  %v2344_v47 = vrot.slane %v2233_v43, 4 }
 0x32c   : > { %2945 = vrot.lane.b32.xlu0 %v2860_v19, %s4189_s25  ;;  %v2151_v19 = vmul.f32 %v5905_v30, %v2058_v13 }
 0x32e   : > { %v2519_v3 = vld.sshfl [vmem:[#allocation1] sm:$0xff pattern:$0x73625140] }
 0x32f   : > { %2521 = vst [vmem:[#allocation1] ss:$4 sm:$0xff] %v2230_v17  ;;  %v6046_v11 = vsel %vm2426_vm8, %v2519_v3, 0.0  ;;  %v2061_v17 = vpop.f32.mrf.mxu0  ;;  %v2346_v3 = vrot.slane %v2234_v53, 2  ;;  %v6089_v52 = vpop.f32.mrf.mxu2 }
 0x330   : > { %v2861_v18 = vrot.slane %v6046_v11, 1 }
 0x332   : > { %v6048_v54 = vld.sshfl [vmem:[#allocation1 + $0x20] sm:$0xff pattern:$0x73625140] }
 0x333   : > { %2523 = vst [vmem:[#allocation1 + $0x20] ss:$4 sm:$0xff] %v2334_v12  ;;  %v2862_v0 = vrot.slane %v6048_v54, 1  ;;  %v2194_v12 = vadd.f32 %v5918_v45, %v2151_v19 }
 0x334   : > { %2524 = vst [vmem:[#allocation1 + $0x21] ss:$4 sm:$0xff] %v2335_v34 }
 0x335   : > { %2525 = vst [vmem:[#allocation1 + $0x22] ss:$4 sm:$0xff] %v2336_v2  ;;  %v2863_v28 = vsel %vm359_vm0, %v2861_v18, %v2862_v0  ;;  %v2347_v2 = vrot.slane %v2234_v53, 4 }
 0x336   : > { %2526 = vst [vmem:[#allocation1 + $0x23] ss:$4 sm:$0xff] %v2231_v35  ;;  %v2522_v21 = vld.sshfl [vmem:[#allocation1] sm:$0xff pattern:$0x73625140]  ;;  %2947 = vrot.lane.b32.xlu1 %v2863_v28, %s4189_s25  ;;  %v2152_v35 = vmul.f32 %v5905_v30, %v2061_v17  ;;  %v2348_v28 = vrot.slane %v2234_v53, 6 }
 0x337   : > { %2528 = vst [vmem:[#allocation1] ss:$4 sm:$0xff] %v2337_v37  ;;  %v6060_v59 = vsel %vm2437_vm9, %v2522_v21, 0.0  ;;  %v2064_v21 = vpop.f32.mrf.mxu0 }
 0x338   : > { %2529 = vst [vmem:[#allocation1 + $0x1] ss:$4 sm:$0xff] %v2338_v29  ;;  %v2864_v48 = vrot.slane %v6060_v59, 1  ;;  %v2195_v8 = vadd.f32 %v5918_v45, %v2152_v35  ;;  %v2153_v10 = vmul.f32 %v5905_v30, %v2064_v21 }
 0x339   : > { %2530 = vst [vmem:[#allocation1 + $0x2] ss:$4 sm:$0xff] %v2339_v41 }
 0x33a   : > { %2531 = vst [vmem:[#allocation1 + $0x3] ss:$4 sm:$0xff] %v2232_v60  ;;  %v2865_v14 = vsel %vm359_vm0, %v2862_v0, %v2864_v48  ;;  %v2235_v0 = vmax.f32 %v2194_v12, 0.0  ;;  %v2236_v22 = vmax.f32 %v2195_v8, 0.0 }
 0x33b   : > { %2949 = vrot.lane.b32.xlu2 %v2865_v14, %s4189_s25 }
 0x33c   : > { %v2349_v41 = vrot.slane %v2235_v0, 2  ;;  %v2350_v14 = vrot.slane %v2235_v0, 4  ;;  %v2351_v51 = vrot.slane %v2235_v0, 6 }
 0x33d   : > { %v2527_v44 = vld.sshfl [vmem:[#allocation1 + $0x20] sm:$0xff pattern:$0x73625140] }
 0x33e   : > { %2532 = vst [vmem:[#allocation1 + $0x20] ss:$4 sm:$0xff] %v2340_v25  ;;  %v6069_v6 = vsel %vm2426_vm8, %v2527_v44, 0.0  ;;  %v6103_v44 = vpop.f32.mrf.mxu2 }
 0x33f   : > { %v2866_v39 = vrot.slane %v6069_v6, 1 }
 0x341   : > { %v6075_v4 = vld.sshfl [vmem:[#allocation1] sm:$0xff pattern:$0x73625140] }
 0x342   : > { %2535 = vst [vmem:[#allocation1] ss:$4 sm:$0xff] %v2341_v9  ;;  %v2867_v50 = vrot.slane %v6075_v4, 1  ;;  %v2353_v9 = vrot.slane %v2236_v22, 4 }
 0x343   : > { %2536 = vst [vmem:[#allocation1 + $0x1] ss:$4 sm:$0xff] %v2342_v61  ;;  %v2154_v61 = vmul.f32 %v5905_v30, %v6003_v38 }
 0x344   : > { %2537 = vst [vmem:[#allocation1 + $0x2] ss:$4 sm:$0xff] %v2233_v43  ;;  %v2868_v36 = vsel %vm359_vm0, %v2866_v39, %v2867_v50  ;;  %v2352_v43 = vrot.slane %v2236_v22, 2 }
 0x345   : > { %v2534_v20 = vld.sshfl [vmem:[#allocation1 + $0x20] sm:$0xff pattern:$0x73625140]  ;;  %2538 = vst [vmem:[#allocation1 + $0x3] ss:$4 sm:$0xff] %v2343_v40  ;;  %2951 = vrot.lane.b32.xlu0 %v2868_v36, %s4189_s25 }
 0x346   : > { %2539 = vst [vmem:[#allocation1 + $0x20] ss:$4 sm:$0xff] %v2344_v47  ;;  %v6083_v15 = vsel %vm2437_vm9, %v2534_v20, 0.0  ;;  %v2197_v47 = vadd.f32 %v5918_v45, %v2154_v61  ;;  %v6121_v19 = vpop.f32.mrf.mxu2 }
 0x347   : > { %2540 = vst [vmem:[#allocation1 + $0x21] ss:$4 sm:$0xff] %v2345_v24  ;;  %v2869_v63 = vrot.slane %v6083_v15, 1 }
 0x348   : > { %2541 = vst [vmem:[#allocation1 + $0x22] ss:$4 sm:$0xff] %v2234_v53  ;;  %v2354_v53 = vrot.slane %v2236_v22, 6  ;;  %v2238_v17 = vmax.f32 %v2197_v47, 0.0 }
 0x349   : > { %2542 = vst [vmem:[#allocation1 + $0x23] ss:$4 sm:$0xff] %v2346_v3  ;;  %v2870_v34 = vsel %vm359_vm0, %v2867_v50, %v2869_v63  ;;  %v2196_v50 = vadd.f32 %v5918_v45, %v2153_v10 }
 0x34a   : > { %2953 = vrot.lane.b32.xlu1 %v2870_v34, %s4189_s25  ;;  %v2155_v34 = vmul.f32 %v5905_v30, %v6021_v55  ;;  %v2156_v55 = vmul.f32 %v5905_v30, %v6039_v49 }
 0x34b   : > { %v2237_v24 = vmax.f32 %v2196_v50, 0.0 }
 0x34c   : > { %v2543_v18 = vld.sshfl [vmem:[#allocation1] sm:$0xff pattern:$0x73625140]  ;;  %v2199_v10 = vadd.f32 %v5918_v45, %v2156_v55  ;;  %v3045_v55 = vrot.slane %v5969_v42, 2 }
 0x34d   : > { %2545 = vst [vmem:[#allocation1] ss:$4 sm:$0xff] %v2347_v2  ;;  %v6095_v37 = vsel %vm2426_vm8, %v2543_v18, 0.0  ;;  %v2355_v63 = vrot.slane %v2237_v24, 2  ;;  %v2356_v12 = vrot.slane %v2237_v24, 4  ;;  %v2357_v2 = vrot.slane %v2237_v24, 6 }
 0x34e   : > { %v2871_v60 = vrot.slane %v6095_v37, 1 }
 0x350   : > { %v6097_v29 = vld.sshfl [vmem:[#allocation1 + $0x20] sm:$0xff pattern:$0x73625140] }
 0x351   : > { %2547 = vst [vmem:[#allocation1 + $0x20] ss:$4 sm:$0xff] %v2348_v28  ;;  %v2872_v48 = vrot.slane %v6097_v29, 1  ;;  %v2359_v28 = vrot.slane %v2238_v17, 4 }
 0x352   : > { %2548 = vst [vmem:[#allocation1 + $0x21] ss:$4 sm:$0xff] %v2235_v0  ;;  %v2358_v0 = vrot.slane %v2238_v17, 2 }
 0x353   : > { %2549 = vst [vmem:[#allocation1 + $0x22] ss:$4 sm:$0xff] %v2349_v41  ;;  %v2873_v25 = vsel %vm359_vm0, %v2871_v60, %v2872_v48  ;;  %v2360_v41 = vrot.slane %v2238_v17, 6 }
 0x354   : > { %v2546_v13 = vld.sshfl [vmem:[#allocation1] sm:$0xff pattern:$0x73625140]  ;;  %2550 = vst [vmem:[#allocation1 + $0x23] ss:$4 sm:$0xff] %v2350_v14  ;;  %2955 = vrot.lane.b32.xlu2 %v2873_v25, %s4189_s25  ;;  %v6140_v14 = vpop.f32.mrf.mxu2 }
 0x355   : > { %2552 = vst [vmem:[#allocation1] ss:$4 sm:$0xff] %v2351_v51  ;;  %v6108_v46 = vsel %vm2437_vm9, %v2546_v13, 0.0  ;;  %v2157_v13 = vmul.f32 %v5905_v30, %v6054_v58 }
 0x356   : > { %2553 = vst [vmem:[#allocation1 + $0x1] ss:$4 sm:$0xff] %v2236_v22  ;;  %v2874_v39 = vrot.slane %v6108_v46, 1  ;;  %v2198_v22 = vadd.f32 %v5918_v45, %v2155_v34 }
 0x357   : > { %2554 = vst [vmem:[#allocation1 + $0x2] ss:$4 sm:$0xff] %v2352_v43  ;;  %v2200_v47 = vadd.f32 %v5918_v45, %v2157_v13 }
 0x358   : > { %2555 = vst [vmem:[#allocation1 + $0x3] ss:$4 sm:$0xff] %v2353_v9  ;;  %v2875_v40 = vsel %vm359_vm0, %v2872_v48, %v2874_v39  ;;  %v2239_v51 = vmax.f32 %v2198_v22, 0.0  ;;  %v2240_v9 = vmax.f32 %v2199_v10, 0.0  ;;  %v3044_v22 = vrot.slane %v5960_v16, 2 }
 0x359   : > { %2957 = vrot.lane.b32.xlu0 %v2875_v40, %s4189_s25  ;;  %v2241_v34 = vmax.f32 %v2200_v47, 0.0 }
 0x35a   : > { %v2361_v43 = vrot.slane %v2239_v51, 2  ;;  %v2362_v39 = vrot.slane %v2239_v51, 4  ;;  %v2363_v50 = vrot.slane %v2239_v51, 6 }
 0x35b   : > { %v2551_v36 = vld.sshfl [vmem:[#allocation1 + $0x20] sm:$0xff pattern:$0x73625140] }
 0x35c   : > { %2556 = vst [vmem:[#allocation1 + $0x20] ss:$4 sm:$0xff] %v2354_v53  ;;  %v6119_v20 = vsel %vm2426_vm8, %v2551_v36, 0.0  ;;  %v2364_v36 = vrot.slane %v2240_v9, 2 }
 0x35d   : > { %v2876_v38 = vrot.slane %v6119_v20, 1 }
 0x35f   : > { %v6124_v3 = vld.sshfl [vmem:[#allocation1] sm:$0xff pattern:$0x73625140] }
 0x360   : > { %2559 = vst [vmem:[#allocation1] ss:$4 sm:$0xff] %v2237_v24  ;;  %v2877_v35 = vrot.slane %v6124_v3, 1  ;;  %v2365_v24 = vrot.slane %v2240_v9, 4 }
 0x361   : > { %2560 = vst [vmem:[#allocation1 + $0x1] ss:$4 sm:$0xff] %v2355_v63  ;;  %v2366_v63 = vrot.slane %v2240_v9, 6 }
 0x362   : > { %2561 = vst [vmem:[#allocation1 + $0x2] ss:$4 sm:$0xff] %v2356_v12  ;;  %v2878_v18 = vsel %vm359_vm0, %v2876_v38, %v2877_v35  ;;  %v6156_v38 = vpop.f32.mrf.mxu2  ;;  %v2158_v12 = vmul.f32 %v5905_v30, %v6072_v27  ;;  %v2367_v27 = vrot.slane %v2241_v34, 2 }
 0x363   : > { %2562 = vst [vmem:[#allocation1 + $0x3] ss:$4 sm:$0xff] %v2357_v2  ;;  %2959 = vrot.lane.b32.xlu1 %v2878_v18, %s4189_s25  ;;  %v2558_v8 = vld.sshfl [vmem:[#allocation1 + $0x20] sm:$0xff pattern:$0x73625140] }
 0x364   : > { %v6133_v21 = vsel %vm2437_vm9, %v2558_v8, 0.0  ;;  %2563 = vst [vmem:[#allocation1 + $0x20] ss:$4 sm:$0xff] %v2238_v17  ;;  %v2159_v8 = vmul.f32 %v5905_v30, %v6089_v52 }
 0x365   : > { %v2879_v60 = vrot.slane %v6133_v21, 1  ;;  %2564 = vst [vmem:[#allocation1 + $0x21] ss:$4 sm:$0xff] %v2358_v0  ;;  %v2201_v0 = vadd.f32 %v5918_v45, %v2158_v12 }
 0x366   : > { %2565 = vst [vmem:[#allocation1 + $0x22] ss:$4 sm:$0xff] %v2359_v28 }
 0x367   : > { %v2880_v48 = vsel %vm359_vm0, %v2877_v35, %v2879_v60  ;;  %2566 = vst [vmem:[#allocation1 + $0x23] ss:$4 sm:$0xff] %v2360_v41  ;;  %v2242_v60 = vmax.f32 %v2201_v0, 0.0 }
 0x368   : > { %2961 = vrot.lane.b32.xlu2 %v2880_v48, %s4189_s25  ;;  %v2202_v48 = vadd.f32 %v5918_v45, %v2159_v8  ;;  %v3049_v8 = vrot.slane %v5994_v57, 2 }
 0x369   : > { %v2372_v47 = vrot.slane %v2242_v60, 6 }
 0x36a   : > { %v2567_v25 = vld.sshfl [vmem:[#allocation1] sm:$0xff pattern:$0x73625140]  ;;  %v6178_v10 = vpop.f32.mrf.mxu2 }
 0x36b   : > { %2569 = vst [vmem:[#allocation1] ss:$4 sm:$0xff] %v2239_v51  ;;  %v6148_v49 = vsel %vm2426_vm8, %v2567_v25, 0.0  ;;  %v2368_v51 = vrot.slane %v2241_v34, 4  ;;  %v2369_v25 = vrot.slane %v2241_v34, 6 }
 0x36c   : > { %7355 = vst [vmem:[#allocation37_spill] sm:$0xff] %v6148_v49  ;;  %v2881_v40 = vrot.slane %v6148_v49, 1 }
 0x36e   : > { %v6150_v61 = vld.sshfl [vmem:[#allocation1 + $0x20] sm:$0xff pattern:$0x73625140] }
 0x36f   : > { %7356 = vst [vmem:[#allocation38_spill] sm:$0xff] %v6150_v61  ;;  %v2882_v53 = vrot.slane %v6150_v61, 1 }
 0x370   : > { %2571 = vst [vmem:[#allocation1 + $0x20] ss:$4 sm:$0xff] %v2361_v43 }
 0x371   : > { %2572 = vst [vmem:[#allocation1 + $0x21] ss:$4 sm:$0xff] %v2362_v39  ;;  %v2883_v58 = vsel %vm359_vm0, %v2881_v40, %v2882_v53  ;;  %v2370_v39 = vrot.slane %v2242_v60, 2  ;;  %v2371_v40 = vrot.slane %v2242_v60, 4 }
 0x372   : > { %2573 = vst [vmem:[#allocation1 + $0x22] ss:$4 sm:$0xff] %v2363_v50  ;;  %2963 = vrot.lane.b32.xlu0 %v2883_v58, %s4189_s25  ;;  %v2570_v17 = vld.sshfl [vmem:[#allocation1] sm:$0xff pattern:$0x73625140]  ;;  %v2243_v50 = vmax.f32 %v2202_v48, 0.0  ;;  %v6201_v0 = vpop.f32.mrf.mxu2 }
 0x373   : > { %2574 = vst [vmem:[#allocation1 + $0x23] ss:$4 sm:$0xff] %v2240_v9  ;;  %v6163_v35 = vsel %vm2437_vm9, %v2570_v17, 0.0  ;;  %v3046_v9 = vsel %vm640_vm1, %v3044_v22, %v3045_v55  ;;  %v3047_v17 = vrot.slane %v5983_v23, 2 }
 0x374   : > { %7357 = vst [vmem:[#allocation41_spill] sm:$0xff] %v6163_v35  ;;  %v2884_v2 = vrot.slane %v6163_v35, 1 }
 0x375   : > { %2576 = vst [vmem:[#allocation1] ss:$4 sm:$0xff] %v2364_v36  ;;  %v2160_v36 = vmul.f32 %v5905_v30, %v6103_v44  ;;  %v3048_v23 = vsel %vm640_vm1, %v3045_v55, %v3047_v17  ;;  %v3055_v55 = vrot.slane %v6024_v31, 2 }
 0x376   : > { %2577 = vst [vmem:[#allocation1 + $0x1] ss:$4 sm:$0xff] %v2365_v24  ;;  %v2885_v18 = vsel %vm359_vm0, %v2882_v53, %v2884_v2  ;;  %v2161_v2 = vmul.f32 %v5905_v30, %v6121_v19 }
 0x377   : > { %2578 = vst [vmem:[#allocation1 + $0x2] ss:$4 sm:$0xff] %v2366_v63  ;;  %2965 = vrot.lane.b32.xlu1 %v2885_v18, %s4189_s25  ;;  %v2373_v63 = vrot.slane %v2243_v50, 2  ;;  %v2203_v44 = vadd.f32 %v5918_v45, %v2160_v36 }
 0x378   : > { %2579 = vst [vmem:[#allocation1 + $0x3] ss:$4 sm:$0xff] %v2241_v34  ;;  %v3050_v34 = vrot.slane %v5996_v7, 2  ;;  %v2204_v19 = vadd.f32 %v5918_v45, %v2161_v2 }
 0x37a   : > { %v2575_v28 = vld.sshfl [vmem:[#allocation1 + $0x20] sm:$0xff pattern:$0x73625140]  ;;  %v6228_v17 = vpop.f32.mrf.mxu2 }
 0x37b   : > { %v6173_v41 = vsel %vm2426_vm8, %v2575_v28, 0.0  ;;  %2580 = vst [vmem:[#allocation1 + $0x20] ss:$4 sm:$0xff] %v2367_v27  ;;  %v2374_v27 = vrot.slane %v2243_v50, 4  ;;  %v3051_v28 = vsel %vm640_vm1, %v3049_v8, %v3050_v34 }
 0x37c   : > { %v2886_v52 = vrot.slane %v6173_v41, 1 }
 0x37f   : > { %v6181_v13 = vld.sshfl [vmem:[#allocation1] sm:$0xff pattern:$0x73625140]  ;;  %3133 = vrot.lane.b32.xlu1 %v3046_v9, %s4193_s17 }
 0x380   : > { %v2887_v43 = vrot.slane %v6181_v13, 1  ;;  %2583 = vst [vmem:[#allocation1] ss:$4 sm:$0xff] %v2368_v51  ;;  %v3054_v51 = vrot.slane %v6019_v33, 2 }
 0x381   : > { %2584 = vst [vmem:[#allocation1 + $0x1] ss:$4 sm:$0xff] %v2369_v25  ;;  %v3052_v25 = vrot.slane %v6008_v56, 2 }
 0x382   : > { %v2888_v53 = vsel %vm359_vm0, %v2886_v52, %v2887_v43  ;;  %2585 = vst [vmem:[#allocation1 + $0x2] ss:$4 sm:$0xff] %v2242_v60  ;;  %v2582_v58 = vld.sshfl [vmem:[#allocation1 + $0x20] sm:$0xff pattern:$0x73625140]  ;;  %v2244_v60 = vmax.f32 %v2203_v44, 0.0  ;;  %v3056_v36 = vsel %vm640_vm1, %v3054_v51, %v3055_v55 }
 0x383   : > { %2967 = vrot.lane.b32.xlu2 %v2888_v53, %s4189_s25  ;;  %2586 = vst [vmem:[#allocation1 + $0x3] ss:$4 sm:$0xff] %v2370_v39  ;;  %v6192_v24 = vsel %vm2437_vm9, %v2582_v58, 0.0  ;;  %v2375_v52 = vrot.slane %v2243_v50, 6  ;;  %v2245_v39 = vmax.f32 %v2204_v19, 0.0 }
 0x384   : > { %2587 = vst [vmem:[#allocation1 + $0x20] ss:$4 sm:$0xff] %v2371_v40  ;;  %v2889_v12 = vrot.slane %v6192_v24, 1  ;;  %v2376_v9 = vrot.slane %v2244_v60, 2  ;;  %v2378_v58 = vrot.slane %v2244_v60, 6 }
 0x385   : > { %2588 = vst [vmem:[#allocation1 + $0x21] ss:$4 sm:$0xff] %v2372_v47  ;;  %v2377_v47 = vrot.slane %v2244_v60, 4  ;;  %v2379_v44 = vrot.slane %v2245_v39, 2 }
 0x386   : > { %2589 = vst [vmem:[#allocation1 + $0x22] ss:$4 sm:$0xff] %v2243_v50  ;;  %v2890_v18 = vsel %vm359_vm0, %v2887_v43, %v2889_v12  ;;  %v2162_v50 = vmul.f32 %v5905_v30, %v6140_v14  ;;  %v2380_v14 = vrot.slane %v2245_v39, 4 }
 0x387   : > { %2590 = vst [vmem:[#allocation1 + $0x23] ss:$4 sm:$0xff] %v2373_v63  ;;  %2969 = vrot.lane.b32.xlu0 %v2890_v18, %s4189_s25  ;;  %3135 = vrot.lane.b32.xlu1 %v3048_v23, %s4193_s17  ;;  %v3053_v63 = vsel %vm640_vm1, %v3050_v34, %v3052_v25  ;;  %v2163_v34 = vmul.f32 %v5905_v30, %v6156_v38  ;;  %v6254_v25 = vpop.f32.mrf.mxu2 }
 0x388   : > { %v2205_v8 = vadd.f32 %v5918_v45, %v2162_v50 }
 0x389   : > { %v2206_v19 = vadd.f32 %v5918_v45, %v2163_v34 }
 0x38a   : > { %v2591_v22 = vld.sshfl [vmem:[#allocation1] sm:$0xff pattern:$0x73625140] }
 0x38b   : > { %3137 = vrot.lane.b32.xlu2 %v3051_v28, %s4193_s17  ;;  %2593 = vst [vmem:[#allocation1] ss:$4 sm:$0xff] %v2374_v27  ;;  %v6212_v48 = vsel %vm2426_vm8, %v2591_v22, 0.0  ;;  %v2381_v28 = vrot.slane %v2245_v39, 6 }
 0x38c   : > { %v2891_v40 = vrot.slane %v6212_v48, 1  ;;  %v3089_v27 = vrot.slane %v6212_v48, 2 }
 0x38e   : > { %v6217_v43 = vld.sshfl [vmem:[#allocation1 + $0x20] sm:$0xff pattern:$0x73625140] }
 0x38f   : > { %v2892_v53 = vrot.slane %v6217_v43, 1  ;;  %2595 = vst [vmem:[#allocation1 + $0x20] ss:$4 sm:$0xff] %v2375_v52  ;;  %3141 = vrot.lane.b32.xlu1 %v3056_v36, %s4193_s17  ;;  %v3090_v18 = vrot.slane %v6217_v43, 2 }
 0x390   : > { %2596 = vst [vmem:[#allocation1 + $0x21] ss:$4 sm:$0xff] %v2244_v60  ;;  %v2246_v60 = vmax.f32 %v2205_v8, 0.0 }
 0x391   : > { %v2893_v56 = vsel %vm359_vm0, %v2891_v40, %v2892_v53  ;;  %2597 = vst [vmem:[#allocation1 + $0x22] ss:$4 sm:$0xff] %v2376_v9  ;;  %v3091_v22 = vsel %vm640_vm1, %v3089_v27, %v3090_v18  ;;  %v2247_v40 = vmax.f32 %v2206_v19, 0.0  ;;  %v2109_v19 = vpop.f32.mrf.mxu2 }
 0x392   : > { %2971 = vrot.lane.b32.xlu0 %v2893_v56, %s4189_s25  ;;  %2598 = vst [vmem:[#allocation1 + $0x23] ss:$4 sm:$0xff] %v2377_v47  ;;  %v2594_v12 = vld.sshfl [vmem:[#allocation1] sm:$0xff pattern:$0x73625140]  ;;  %v2383_v36 = vrot.slane %v2246_v60, 4  ;;  %v2164_v56 = vmul.f32 %v5905_v30, %v6178_v10 }
 0x393   : > { %3139 = vrot.lane.b32.xlu2 %v3053_v63, %s4193_s17  ;;  %v6235_v2 = vsel %vm2437_vm9, %v2594_v12, 0.0  ;;  %2600 = vst [vmem:[#allocation1] ss:$4 sm:$0xff] %v2378_v58  ;;  %v2384_v50 = vrot.slane %v2246_v60, 6  ;;  %v2385_v12 = vrot.slane %v2247_v40, 2  ;;  %v2387_v10 = vrot.slane %v2247_v40, 6 }
 0x394   : > { %2601 = vst [vmem:[#allocation1 + $0x1] ss:$4 sm:$0xff] %v2245_v39  ;;  %v2894_v23 = vrot.slane %v6235_v2, 1  ;;  %v2382_v39 = vrot.slane %v2246_v60, 2  ;;  %v2207_v34 = vadd.f32 %v5918_v45, %v2164_v56  ;;  %v3092_v56 = vrot.slane %v6235_v2, 2 }
 0x395   : > { %2602 = vst [vmem:[#allocation1 + $0x2] ss:$4 sm:$0xff] %v2379_v44 }
 0x396   : > { %2603 = vst [vmem:[#allocation1 + $0x3] ss:$4 sm:$0xff] %v2380_v14  ;;  %v2895_v51 = vsel %vm359_vm0, %v2892_v53, %v2894_v23  ;;  %v3057_v53 = vrot.slane %v6033_v32, 2  ;;  %v2386_v14 = vrot.slane %v2247_v40, 4  ;;  %v2165_v23 = vmul.f32 %v5905_v30, %v6201_v0 }
 0x397   : > { %3169 = vrot.lane.b32.xlu1 %v3091_v22, %s4193_s17  ;;  %v3059_v0 = vrot.slane %v6046_v11, 2 }
 0x398   : > { %v3058_v32 = vsel %vm640_vm1, %v3055_v55, %v3057_v53  ;;  %v2208_v30 = vadd.f32 %v5918_v45, %v2165_v23  ;;  %v6288_v53 = vld [vmem:[%s7149_s2] ss:$0 sm:$0xff] }
 0x399   : > { %v2599_v52 = vld.sshfl [vmem:[#allocation1 + $0x20] sm:$0xff pattern:$0x73625140]  ;;  %v2112_v2 = vpop.f32.mrf.mxu2 }
 0x39a   : > { %2973 = vrot.lane.b32.xlu0 %v2895_v51, %s4189_s25  ;;  %v6252_v38 = vsel %vm2426_vm8, %v2599_v52, 0.0  ;;  %2604 = vst [vmem:[#allocation1 + $0x20] ss:$4 sm:$0xff] %v2381_v28  ;;  %v3039_v51 = vrot.slane %v4192_v5, 2  ;;  %v2248_v52 = vmax.f32 %v2207_v34, 0.0  ;;  %v2166_v5 = vmul.f32 %v6288_v53, %v6228_v17 }
 0x39b   : > { %v2896_v9 = vrot.slane %v6252_v38, 1  ;;  %v3094_v28 = vrot.slane %v6252_v38, 2 }
 0x39c   : > { %v6293_v45 = vpack.i.bf16 %v3039_v51, %v3039_v51 }
 0x39d   : > { %v6257_v47 = vld.sshfl [vmem:[#allocation1] sm:$0xff pattern:$0x73625140] }
 0x39e   : > { %v2897_v58 = vrot.slane %v6257_v47, 1  ;;  %2607 = vst [vmem:[#allocation1] ss:$4 sm:$0xff] %v2246_v60  ;;  %v3095_v55 = vrot.slane %v6257_v47, 2  ;;  %v3060_v60 = vrot.slane %v6048_v54, 2 }
 0x39f   : > { %2608 = vst [vmem:[#allocation1 + $0x1] ss:$4 sm:$0xff] %v2382_v39 }
 0x3a0   : > { %v2898_v63 = vsel %vm359_vm0, %v2896_v9, %v2897_v58  ;;  %2609 = vst [vmem:[#allocation1 + $0x2] ss:$4 sm:$0xff] %v2383_v36  ;;  %v3096_v9 = vsel %vm640_vm1, %v3094_v28, %v3095_v55  ;;  %v2388_v36 = vrot.slane %v2248_v52, 2 }
 0x3a1   : > { %2975 = vrot.lane.b32.xlu2 %v2898_v63, %s4189_s25  ;;  %2610 = vst [vmem:[#allocation1 + $0x3] ss:$4 sm:$0xff] %v2384_v50  ;;  %v2606_v44 = vld.sshfl [vmem:[#allocation1 + $0x20] sm:$0xff pattern:$0x73625140]  ;;  %v2389_v50 = vrot.slane %v2248_v52, 4 }
 0x3a2   : > { %3143 = vrot.lane.b32.xlu0 %v3058_v32, %s4193_s17  ;;  %v2768_v8 = vsel %vm2437_vm9, %v2606_v44, 0.0  ;;  %2611 = vst [vmem:[#allocation1 + $0x20] ss:$4 sm:$0xff] %v2247_v40  ;;  %v3061_v40 = vsel %vm640_vm1, %v3059_v0, %v3060_v60  ;;  %v6301_v44 = vld [vmem:[%s7149_s2 + $0x1] ss:$0 sm:$0xff]  ;;  %v6325_v0 = vpop.permute.xlu2 %2937 }
 0x3a3   : > { %v2899_v27 = vrot.slane %v2768_v8, 1  ;;  %2612 = vst [vmem:[#allocation1 + $0x21] ss:$4 sm:$0xff] %v2385_v12  ;;  %v2390_v12 = vrot.slane %v2248_v52, 6  ;;  %v3097_v32 = vrot.slane %v2768_v8, 2  ;;  %v2209_v17 = vadd.f32 %v6301_v44, %v2166_v5 }
 0x3a4   : > { %2613 = vst [vmem:[#allocation1 + $0x22] ss:$4 sm:$0xff] %v2386_v14  ;;  %v3093_v8 = vsel %vm640_vm1, %v3090_v18, %v3092_v56 }
 0x3a5   : > { %v2900_v22 = vsel %vm359_vm0, %v2897_v58, %v2899_v27  ;;  %2614 = vst [vmem:[#allocation1 + $0x23] ss:$4 sm:$0xff] %v2387_v10  ;;  %v2249_v58 = vmax.f32 %v2208_v30, 0.0  ;;  %v2167_v27 = vmul.f32 %v6288_v53, %v6254_v25  ;;  %v3098_v28 = vsel %vm640_vm1, %v3095_v55, %v3097_v32 }
 0x3a6   : > { %2977 = vrot.lane.b32.xlu1 %v2900_v22, %s4189_s25  ;;  %7358 = vst [vmem:[#allocation28_spill] sm:$0xff] %v6293_v45  ;;  %v2250_v51 = vmax.f32 %v2209_v17, 0.0  ;;  %v2168_v30 = vmul.f32 %v6288_v53, %v2109_v19 }
 0x3a7   : > { %v2391_v14 = vrot.slane %v2249_v58, 2  ;;  %v2392_v10 = vrot.slane %v2249_v58, 4  ;;  %v2393_v23 = vrot.slane %v2249_v58, 6  ;;  %v2210_v55 = vadd.f32 %v6301_v44, %v2167_v27 }
 0x3a8   : > { %v2615_v39 = vld.sshfl [vmem:[#allocation1] sm:$0xff pattern:$0x73625140]  ;;  %v2395_v56 = vrot.slane %v2250_v51, 4  ;;  %v2396_v32 = vrot.slane %v2250_v51, 6 }
 0x3a9   : > { %3173 = vrot.lane.b32.xlu2 %v3096_v9, %s4193_s17  ;;  %2617 = vst [vmem:[#allocation1] ss:$4 sm:$0xff] %v2248_v52  ;;  %v3062_v9 = vrot.slane %v6060_v59, 2  ;;  %v6337_v19 = vsel %vm2426_vm8, %v2615_v39, 0.0 }
 0x3aa   : > { %3145 = vrot.lane.b32.xlu0 %v3061_v40, %s4193_s17  ;;  %v2394_v40 = vrot.slane %v2250_v51, 2 }
 0x3ac   : > { %v6296_v63 = vld.sshfl [vmem:[#allocation1 + $0x20] sm:$0xff pattern:$0x73625140] }
 0x3ad   : > { %2619 = vst [vmem:[#allocation1 + $0x20] ss:$4 sm:$0xff] %v2388_v36  ;;  %v3100_v18 = vrot.slane %v6296_v63, 2  ;;  %v2251_v36 = vmax.f32 %v2210_v55, 0.0  ;;  %v6349_v55 = vpop.permute.xlu1 %2935 }
 0x3ae   : > { %4124 = vrot.lane.b32.xlu1 %v6293_v45, %s4193_s17  ;;  %2620 = vst [vmem:[#allocation1 + $0x21] ss:$4 sm:$0xff] %v2389_v50  ;;  %v3063_v50 = vsel %vm640_vm1, %v3060_v60, %v3062_v9  ;;  %v2169_v60 = vmul.f32 %v6288_v53, %v2112_v2 }
 0x3af   : > { %2621 = vst [vmem:[#allocation1 + $0x22] ss:$4 sm:$0xff] %v2390_v12  ;;  %v2115_v12 = vpop.f32.mrf.mxu2  ;;  %v2397_v59 = vrot.slane %v2251_v36, 2 }
 0x3b0   : > { %v2618_v34 = vld.sshfl [vmem:[#allocation1] sm:$0xff pattern:$0x73625140]  ;;  %2622 = vst [vmem:[#allocation1 + $0x23] ss:$4 sm:$0xff] %v2249_v58  ;;  %v2211_v58 = vadd.f32 %v6301_v44, %v2168_v30 }
 0x3b1   : > { %3171 = vrot.lane.b32.xlu2 %v3093_v8, %s4193_s17  ;;  %2624 = vst [vmem:[#allocation1] ss:$4 sm:$0xff] %v2391_v14  ;;  %v6315_v22 = vsel %vm2437_vm9, %v2618_v34, 0.0  ;;  %v2398_v8 = vrot.slane %v2251_v36, 4  ;;  %v2399_v34 = vrot.slane %v2251_v36, 6 }
 0x3b2   : > { %3175 = vrot.lane.b32.xlu0 %v3098_v28, %s4193_s17  ;;  %2625 = vst [vmem:[#allocation1 + $0x1] ss:$4 sm:$0xff] %v2392_v10  ;;  %v3102_v52 = vrot.slane %v6315_v22, 2  ;;  %v2252_v14 = vmax.f32 %v2211_v58, 0.0  ;;  %v6339_v10 = vpop.permute.xlu2 %2943  ;;  %v2124_v58 = vpop.f32.mrf.mxu3 }
 0x3b3   : > { %2626 = vst [vmem:[#allocation1 + $0x2] ss:$4 sm:$0xff] %v2393_v23  ;;  %v3099_v23 = vrot.slane %v6337_v19, 2 }
 0x3b4   : > { %2627 = vst [vmem:[#allocation1 + $0x3] ss:$4 sm:$0xff] %v2250_v51  ;;  %v6321_v25 = vsel %vm640_vm1, %v3100_v18, %v3102_v52  ;;  %v2400_v28 = vrot.slane %v2252_v14, 2  ;;  %v2212_v51 = vadd.f32 %v6301_v44, %v2169_v60  ;;  %v2170_v52 = vmul.f32 %v6288_v53, %v2115_v12 }
 0x3b5   : > { %v3101_v39 = vsel %vm640_vm1, %v3099_v23, %v3100_v18  ;;  %v2401_v30 = vrot.slane %v2252_v14, 4  ;;  %v6358_v12 = vpop.permute.xlu1 %2941 }
 0x3b6   : > { %v2213_v18 = vadd.f32 %v6301_v44, %v2170_v52 }
 0x3b7   : > { %v6328_v5 = vld.sshfl [vmem:[#allocation1 + $0x20] sm:$0xff pattern:$0x73625140]  ;;  %v2118_v2 = vpop.f32.mrf.mxu2 }
 0x3b8   : > { %2628 = vst [vmem:[#allocation1 + $0x20] ss:$4 sm:$0xff] %v2394_v40  ;;  %v2171_v60 = vmul.f32 %v6288_v53, %v2118_v2 }
 0x3ba   : > { %3147 = vrot.lane.b32.xlu0 %v3063_v50, %s4193_s17  ;;  %v6351_v9 = vpop.permute.xlu2 %2949  ;;  %v2402_v50 = vrot.slane %v2252_v14, 6  ;;  %v2214_v52 = vadd.f32 %v6301_v44, %v2171_v60 }
 0x3bb   : > { %v6333_v17 = vld.sshfl [vmem:[#allocation1] sm:$0xff pattern:$0x73625140] }
 0x3bc   : > { %2631 = vst [vmem:[#allocation1] ss:$4 sm:$0xff] %v2395_v56 }
 0x3bd   : > { %2632 = vst [vmem:[#allocation1 + $0x1] ss:$4 sm:$0xff] %v2396_v32  ;;  %v6369_v2 = vpop.permute.xlu1 %2947 }
 0x3be   : > { %2633 = vst [vmem:[#allocation1 + $0x2] ss:$4 sm:$0xff] %v2251_v36  ;;  %v2253_v36 = vmax.f32 %v2212_v51, 0.0 }
 0x3bf   : > { %2634 = vst [vmem:[#allocation1 + $0x3] ss:$4 sm:$0xff] %v2397_v59  ;;  %v6343_v27 = vld.sshfl [vmem:[#allocation1 + $0x20] sm:$0xff pattern:$0x73625140]  ;;  %v2254_v59 = vmax.f32 %v2213_v18, 0.0  ;;  %v6367_v18 = vpop.permute.xlu0 %4119 }
 0x3c0   : > { %2635 = vst [vmem:[#allocation1 + $0x20] ss:$4 sm:$0xff] %v2398_v8  ;;  %v2403_v32 = vrot.slane %v2253_v36, 2  ;;  %v2404_v8 = vrot.slane %v2253_v36, 4 }
 0x3c1   : > { %2636 = vst [vmem:[#allocation1 + $0x21] ss:$4 sm:$0xff] %v2399_v34  ;;  %v2405_v34 = vrot.slane %v2253_v36, 6  ;;  %v2407_v51 = vrot.slane %v2254_v59, 4 }
 0x3c2   : > { %3177 = vrot.lane.b32.xlu0 %v3101_v39, %s4193_s17  ;;  %2637 = vst [vmem:[#allocation1 + $0x22] ss:$4 sm:$0xff] %v2252_v14  ;;  %v6361_v23 = vpop.permute.xlu2 %2955  ;;  %v2406_v14 = vrot.slane %v2254_v59, 2 }
 0x3c3   : > { %2638 = vst [vmem:[#allocation1 + $0x23] ss:$4 sm:$0xff] %v2400_v28  ;;  %v2121_v28 = vpop.f32.mrf.mxu2 }
 0x3c4   : > { %7359 = vst [vmem:[#allocation44_spill] sm:$0xff] %v6361_v23 }
 0x3c5   : > { %v6379_v49 = vpop.permute.xlu1 %2953 }
 0x3c6   : > { %v6353_v40 = vld.sshfl [vmem:[#allocation1] sm:$0xff pattern:$0x73625140]  ;;  %7361 = vst [vmem:[#allocation40_spill] sm:$0xff] %v6379_v49 }
 0x3c7   : > { %2641 = vst [vmem:[#allocation1] ss:$4 sm:$0xff] %v2401_v30  ;;  %v2172_v30 = vmul.f32 %v6288_v53, %v2121_v28  ;;  %v2940_v35 = vpop.permute.xlu0 %2939 }
 0x3c9   : > { %v2215_v45 = vadd.f32 %v6301_v44, %v2172_v30 }
 0x3ca   : > { %v6356_v56 = vld.sshfl [vmem:[#allocation1 + $0x20] sm:$0xff pattern:$0x73625140] }
 0x3cb   : > { %2643 = vst [vmem:[#allocation1 + $0x20] ss:$4 sm:$0xff] %v2402_v50  ;;  %v2408_v50 = vrot.slane %v2254_v59, 6  ;;  %v2256_v60 = vmax.f32 %v2215_v45, 0.0 }
 0x3cc   : > { %2644 = vst [vmem:[#allocation1 + $0x21] ss:$4 sm:$0xff] %v2253_v36  ;;  %v2127_v36 = vpop.f32.mrf.mxu3 }
 0x3cd   : > { %2645 = vst [vmem:[#allocation1 + $0x22] ss:$4 sm:$0xff] %v2403_v32  ;;  %v2255_v32 = vmax.f32 %v2214_v52, 0.0  ;;  %v2412_v52 = vrot.slane %v2256_v60, 2  ;;  %v2413_v45 = vrot.slane %v2256_v60, 4  ;;  %v2414_v61 = vrot.slane %v2256_v60, 6 }
 0x3ce   : > { %v6363_v39 = vld.sshfl [vmem:[#allocation1] sm:$0xff pattern:$0x73625140]  ;;  %2646 = vst [vmem:[#allocation1 + $0x23] ss:$4 sm:$0xff] %v2404_v8  ;;  %v6372_v8 = vpop.permute.xlu2 %2961 }
 0x3cf   : > { %2648 = vst [vmem:[#allocation1] ss:$4 sm:$0xff] %v2405_v34  ;;  %v2409_v1 = vrot.slane %v2255_v32, 2  ;;  %v2410_v28 = vrot.slane %v2255_v32, 4  ;;  %v6389_v49 = vpop.permute.xlu0 %2945 }
 0x3d0   : > { %2649 = vst [vmem:[#allocation1 + $0x1] ss:$4 sm:$0xff] %v2254_v59 }
 0x3d1   : > { %2650 = vst [vmem:[#allocation1 + $0x2] ss:$4 sm:$0xff] %v2406_v14  ;;  %v2173_v14 = vmul.f32 %v6288_v53, %v2124_v58 }
 0x3d2   : > { %2651 = vst [vmem:[#allocation1 + $0x3] ss:$4 sm:$0xff] %v2407_v51  ;;  %v2411_v51 = vrot.slane %v2255_v32, 6 }
 0x3d3   : > { %7360 = vst [vmem:[#allocation7_spill] sm:$0xff] %v6372_v8  ;;  %v2216_v8 = vadd.f32 %v6301_v44, %v2173_v14 }
 0x3d4   : > { %v2130_v59 = vpop.f32.mrf.mxu3 }
 0x3d5   : > { %v6374_v34 = vld.sshfl [vmem:[#allocation1 + $0x20] sm:$0xff pattern:$0x73625140]  ;;  %v2175_v58 = vmul.f32 %v6288_v53, %v2130_v59 }
 0x3d6   : > { %2652 = vst [vmem:[#allocation1 + $0x20] ss:$4 sm:$0xff] %v2408_v50 }
 0x3d9   : > { %v6376_v23 = vld.sshfl [vmem:[#allocation1] sm:$0xff pattern:$0x73625140] }
 0x3da   : > { %2655 = vst [vmem:[#allocation1] ss:$4 sm:$0xff] %v2255_v32  ;;  %v2174_v32 = vmul.f32 %v6288_v53, %v2127_v36 }
 0x3db   : > { %2656 = vst [vmem:[#allocation1 + $0x1] ss:$4 sm:$0xff] %v2409_v1  ;;  %v2257_v1 = vmax.f32 %v2216_v8, 0.0 }
 0x3dc   : > { %2657 = vst [vmem:[#allocation1 + $0x2] ss:$4 sm:$0xff] %v2410_v28  ;;  %v2218_v28 = vadd.f32 %v6301_v44, %v2175_v58 }
 0x3dd   : > { %v6381_v30 = vpop.permute.xlu2 %2967  ;;  %2658 = vst [vmem:[#allocation1 + $0x3] ss:$4 sm:$0xff] %v2411_v51  ;;  %v6383_v50 = vld.sshfl [vmem:[#allocation1 + $0x20] sm:$0xff pattern:$0x73625140]  ;;  %v6391_v51 = vpop.permute.xlu1 %2959  ;;  %v2416_v8 = vrot.slane %v2257_v1, 4 }
 0x3de   : > { %7362 = vst [vmem:[#allocation30_spill] sm:$0xff] %v6381_v30  ;;  %v2217_v30 = vadd.f32 %v6301_v44, %v2174_v32  ;;  %v2259_v36 = vmax.f32 %v2218_v28, 0.0  ;;  %v2417_v44 = vrot.slane %v2257_v1, 6 }
 0x3df   : > { %7363 = vst [vmem:[#allocation11_spill] sm:$0xff] %v6383_v50 }
 0x3e0   : > { %2659 = vst [vmem:[#allocation1 + $0x20] ss:$4 sm:$0xff] %v2256_v60  ;;  %v3241_v60 = vsel %vm982_vm3, %v5994_v57, %v2940_v35  ;;  %v2258_v59 = vmax.f32 %v2217_v30, 0.0  ;;  %v6405_v57 = vpop.permute.xlu0 %2951  ;;  %v3242_v30 = vsel %vm982_vm3, %v5996_v7, %v6358_v12 }
 0x3e1   : > { %2660 = vst [vmem:[#allocation1 + $0x21] ss:$4 sm:$0xff] %v2412_v52 }
 0x3e2   : > { %2661 = vst [vmem:[#allocation1 + $0x22] ss:$4 sm:$0xff] %v2413_v45  ;;  %v2421_v45 = vrot.slane %v2259_v36, 2  ;;  %v2418_v58 = vrot.slane %v2258_v59, 2  ;;  %v2419_v28 = vrot.slane %v2258_v59, 4 }
 0x3e3   : > { %2662 = vst [vmem:[#allocation1 + $0x23] ss:$4 sm:$0xff] %v2414_v61  ;;  %v2415_v61 = vrot.slane %v2257_v1, 2 }
 0x3e4   : > { %v6394_v50 = vld.sshfl [vmem:[#allocation1] sm:$0xff pattern:$0x73625140] }
 0x3e5   : > { %v3138_v14 = vpop.permute.xlu2 %3137  ;;  %2665 = vst [vmem:[#allocation1] ss:$4 sm:$0xff] %v2257_v1  ;;  %v2420_v1 = vrot.slane %v2258_v59, 6 }
 0x3e6   : > { %v6399_v53 = vsel %vm3273_vm10, %v3241_v60, %v3138_v14 }
 0x3e7   : > { %3440 = vrot.lane.b32.xlu1 %v6399_v53, %s4194_s24 }
 0x3e9   : > { %v6407_v35 = vpop.permute.xlu1 %2965 }
 0x3ea   : > { %v6403_v52 = vld.sshfl [vmem:[#allocation1 + $0x20] sm:$0xff pattern:$0x73625140] }
 0x3eb   : > { %2667 = vst [vmem:[#allocation1 + $0x20] ss:$4 sm:$0xff] %v2415_v61  ;;  %v3239_v61 = vsel %vm982_vm3, %v5960_v16, %v6349_v55  ;;  %v2907_v55 = vrot.slane %v6333_v17, 1 }
 0x3ec   : > { %2668 = vst [vmem:[#allocation1 + $0x21] ss:$4 sm:$0xff] %v2416_v8  ;;  %v6409_v32 = vld.sshfl [vmem:[#allocation1] sm:$0xff pattern:$0x73625140]  ;;  %v6422_v8 = vpop.permute.xlu0 %2957 }
 0x3ed   : > { %2669 = vst [vmem:[#allocation1 + $0x22] ss:$4 sm:$0xff] %v2417_v44  ;;  %v3140_v60 = vpop.permute.xlu2 %3139  ;;  %v2901_v44 = vrot.slane %v6337_v19, 1 }
 0x3ee   : > { %2670 = vst [vmem:[#allocation1 + $0x23] ss:$4 sm:$0xff] %v2258_v59  ;;  %v6415_v14 = vsel %vm3273_vm10, %v3242_v30, %v3140_v60  ;;  %v2902_v59 = vrot.slane %v6296_v63, 1 }
 0x3ef   : > { %2676 = vst [vmem:[#allocation1 + $0x20] ss:$4 sm:$0xff] %v2421_v45  ;;  %3442 = vrot.lane.b32.xlu0 %v6415_v14, %s4194_s24  ;;  %v3240_v45 = vsel %vm982_vm3, %v5969_v42, %v6325_v0  ;;  %v3065_v42 = vrot.slane %v6075_v4, 2  ;;  %v2904_v0 = vrot.slane %v6315_v22, 1  ;;  %v2774_v22 = vsel %vm2437_vm9, %v6343_v27, 0.0 }
 0x3f0   : > { %2672 = vst [vmem:[#allocation1] ss:$4 sm:$0xff] %v2418_v58  ;;  %v3105_v27 = vrot.slane %v6333_v17, 2 }
 0x3f1   : > { %2673 = vst [vmem:[#allocation1 + $0x1] ss:$4 sm:$0xff] %v2419_v28  ;;  %v3134_v7 = vpop.permute.xlu1 %3133 }
 0x3f2   : > { %2674 = vst [vmem:[#allocation1 + $0x2] ss:$4 sm:$0xff] %v2420_v1  ;;  %v6425_v12 = vsel %vm3273_vm10, %v3239_v61, %v3134_v7  ;;  %v3064_v1 = vrot.slane %v6069_v6, 2  ;;  %v3070_v61 = vrot.slane %v6097_v29, 2 }
 0x3f3   : > { %2675 = vst [vmem:[#allocation1 + $0x3] ss:$4 sm:$0xff] %v2259_v36  ;;  %3342 = vrot.lane.b32.xlu2 %v6425_v12, %s4191_s27  ;;  %v6434_v36 = vsel %vm2426_vm8, %v6328_v5, 0.0  ;;  %v2903_v5 = vsel %vm359_vm0, %v2901_v44, %v2902_v59  ;;  %v3069_v44 = vrot.slane %v6095_v37, 2 }
 0x3f4   : > { %v2906_v16 = vrot.slane %v6434_v36, 1  ;;  %v6443_v58 = vpop.permute.xlu0 %2963 }
 0x3f6   : > { %v2908_v60 = vsel %vm359_vm0, %v2906_v16, %v2907_v55  ;;  %v3071_v16 = vsel %vm640_vm1, %v3069_v44, %v3070_v61 }
 0x3f7   : > { %3346 = vrot.lane.b32.xlu0 %v6399_v53, %s4191_s27 }
 0x3f9   : > { %v3136_v28 = vpop.permute.xlu1 %3135 }
 0x3fa   : > { %v6446_v30 = vsel %vm3273_vm10, %v3240_v45, %v3136_v28  ;;  %v3066_v45 = vsel %vm640_vm1, %v3064_v1, %v3065_v42  ;;  %v2905_v28 = vsel %vm359_vm0, %v2902_v59, %v2904_v0  ;;  %v2909_v1 = vrot.slane %v2774_v22, 1 }
 0x3fb   : > { %2979 = vrot.lane.b32.xlu2 %v2903_v5, %s4189_s25  ;;  %3344 = vrot.lane.b32.xlu1 %v6446_v30, %s4191_s27  ;;  %v3067_v5 = vrot.slane %v6083_v15, 2  ;;  %v3243_v15 = vsel %vm982_vm3, %v6019_v33, %v6339_v10  ;;  %v3085_v33 = vrot.slane %v6181_v13, 2  ;;  %v3084_v10 = vrot.slane %v6173_v41, 2 }
 0x3fc   : > { %v6458_v7 = vpop.permute.xlu0 %2969  ;;  %v2910_v44 = vsel %vm359_vm0, %v2907_v55, %v2909_v1 }
 0x3fd   : > { %v3068_v59 = vsel %vm640_vm1, %v3065_v42, %v3067_v5 }
 0x3ff   : > { %2983 = vrot.lane.b32.xlu0 %v2908_v60, %s4189_s25  ;;  %v2976_v60 = vpop.permute.xlu2 %2975 }
 0x400   : > { %v3259_v55 = vsel %vm982_vm3, %v6252_v38, %v2976_v60  ;;  %v3086_v38 = vsel %vm640_vm1, %v3084_v10, %v3085_v33  ;;  %v3072_v10 = vrot.slane %v6108_v46, 2  ;;  %v291_v46 = vld [vmem:[%s7150_s3 + $0x8] sm:$0xff] }
 0x403   : > { %3149 = vrot.lane.b32.xlu2 %v3066_v45, %s4193_s17  ;;  %2981 = vrot.lane.b32.xlu1 %v2905_v28, %s4189_s25  ;;  %v3104_v45 = vrot.slane %v6434_v36, 2  ;;  %v3142_v28 = vpop.permute.xlu1 %3141 }
 0x404   : > { %v2972_v0 = vpop.permute.xlu0 %2971 }
 0x407   : > { %3153 = vrot.lane.b32.xlu0 %v3071_v16, %s4193_s17  ;;  %v3174_v42 = vpop.permute.xlu2 %3173  ;;  %v6485_v16 = vsel %vm3273_vm10, %v3243_v15, %v3142_v28  ;;  %v3244_v28 = vsel %vm982_vm3, %v6024_v31, %v6389_v49  ;;  %v298_v31 = vld [vmem:[%s7150_s3 + $0x40] sm:$0xff]  ;;  %v297_v49 = vld [vmem:[%s7150_s3 + $0x38] sm:$0xff] }
 0x408   : > { %v6494_v5 = vsel %vm3273_vm10, %v3259_v55, %v3174_v42  ;;  %3705 = vmatpush.msra.mxu1 %v298_v31  ;;  %4093 = vmatpush.msrb.mxu3 %v298_v31 }
 0x40a   : > { %3706 = vmatpush.msra.mxu1 %v297_v49  ;;  %4094 = vmatpush.msrb.mxu3 %v297_v49 }
 0x40b   : > { %3179 = vrot.lane.b32.xlu2 %v6321_v25, %s4193_s17  ;;  %3151 = vrot.lane.b32.xlu1 %v3068_v59, %s4193_s17  ;;  %v3106_v25 = vsel %vm640_vm1, %v3104_v45, %v3105_v27  ;;  %v3087_v59 = vrot.slane %v6192_v24, 2  ;;  %v3257_v24 = vsel %vm982_vm3, %v6212_v48, %v2972_v0  ;;  %v3107_v0 = vrot.slane %v2774_v22, 2  ;;  %v294_v22 = vld [vmem:[%s7150_s3 + $0x20] sm:$0xff] }
 0x40c   : > { %v2974_v1 = vpop.permute.xlu0 %2973 }
 0x40d   : > { %v3088_v60 = vsel %vm640_vm1, %v3085_v33, %v3087_v59  ;;  %v3258_v15 = vsel %vm982_vm3, %v6217_v43, %v2974_v1  ;;  %v296_v43 = vld [vmem:[%s7150_s3 + $0x30] sm:$0xff]  ;;  %v295_v1 = vld [vmem:[%s7150_s3 + $0x28] sm:$0xff]  ;;  %v3108_v33 = vsel %vm640_vm1, %v3105_v27, %v3107_v0  ;;  %v2777_v27 = vsel %vm2437_vm9, %v6363_v39, 0.0  ;;  %v293_v59 = vld [vmem:[%s7150_s3 + $0x18] sm:$0xff] }
 0x40e   : > { %3707 = vmatpush.msra.mxu1 %v296_v43  ;;  %4095 = vmatpush.msrb.mxu3 %v296_v43 }
 0x40f   : > { %2985 = vrot.lane.b32.xlu0 %v2910_v44, %s4189_s25  ;;  %v3170_v44 = vpop.permute.xlu1 %3169  ;;  %v3172_v55 = vpop.permute.xlu2 %3171 }
 0x410   : > { %v6515_v42 = vsel %vm3273_vm10, %v3257_v24, %v3170_v44  ;;  %v6531_v48 = vsel %vm3273_vm10, %v3258_v15, %v3172_v55  ;;  %3708 = vmatpush.msra.mxu1 %v295_v1  ;;  %4096 = vmatpush.msrb.mxu3 %v295_v1  ;;  %v2914_v44 = vrot.slane %v2777_v27, 1  ;;  %v3073_v24 = vsel %vm640_vm1, %v3070_v61, %v3072_v10  ;;  %v290_v61 = vld [vmem:[%s7150_s3] sm:$0xff] }
 0x411   : > { %v3110_v15 = vrot.slane %v6356_v56, 2  ;;  %v3074_v1 = vrot.slane %v6119_v20, 2 }
 0x412   : > { %3709 = vmatpush.msra.mxu1 %v294_v22  ;;  %4097 = vmatpush.msrb.mxu3 %v294_v22 }
 0x413   : > { %3444 = vrot.lane.b32.xlu2 %v6485_v16, %s4194_s24  ;;  %3181 = vrot.lane.b32.xlu1 %v3106_v25, %s4193_s17 }
 0x414   : > { %v3144_v45 = vpop.permute.xlu0 %3143  ;;  %3710 = vmatpush.msra.mxu1 %v293_v59  ;;  %4098 = vmatpush.msrb.mxu3 %v293_v59 }
 0x415   : > { %v6518_v25 = vsel %vm3273_vm10, %v3244_v28, %v3144_v45  ;;  %v3245_v45 = vsel %vm982_vm3, %v6046_v11, %v6369_v2  ;;  %v2912_v28 = vrot.slane %v6356_v56, 1  ;;  %v6581_v2 = vsel %vm2426_vm8, %v6353_v40, 0.0 }
 0x416   : > { %v2911_v55 = vrot.slane %v6581_v2, 1  ;;  %v3109_v31 = vrot.slane %v6581_v2, 2 }
 0x417   : > { %3476 = vrot.lane.b32.xlu0 %v6494_v5, %s4194_s24  ;;  %v2915_v11 = vsel %vm359_vm0, %v2912_v28, %v2914_v44 }
 0x418   : > { %v2913_v49 = vsel %vm359_vm0, %v2911_v55, %v2912_v28  ;;  %v3111_v43 = vsel %vm640_vm1, %v3109_v31, %v3110_v15  ;;  %v2978_v0 = vpop.permute.xlu1 %2977  ;;  %v4121_v28 = vunpack.i.l.bf16 %v6367_v18  ;;  %v3077_v55 = vrot.slane %v6133_v21, 2 }
 0x419   : > { %v3260_v22 = vsel %vm982_vm3, %v6257_v47, %v2978_v0 }
 0x41b   : > { %3348 = vrot.lane.b32.xlu2 %v6415_v14, %s4191_s27  ;;  %3165 = vrot.lane.b32.xlu1 %v3086_v38, %s4193_s17  ;;  %v292_v38 = vld [vmem:[%s7150_s3 + $0x10] sm:$0xff] }
 0x41c   : > { %3711 = vmatpush.msra.mxu1 %v292_v38  ;;  %4099 = vmatpush.msrb.mxu3 %v292_v38 }
 0x41e   : > { %3712 = vmatpush.msra.mxu1 %v291_v46  ;;  %4100 = vmatpush.msrb.mxu3 %v291_v46 }
 0x41f   : > { %3167 = vrot.lane.b32.xlu0 %v3088_v60, %s4193_s17  ;;  %v3146_v60 = vpop.permute.xlu0 %3145 }
 0x420   : > { %v6567_v39 = vsel %vm3273_vm10, %v3245_v45, %v3146_v60  ;;  %3713 = vmatpush.msra.mxu1 %v290_v61  ;;  %4101 = vmatpush.msrb.mxu3 %v290_v61  ;;  %v3246_v60 = vsel %vm982_vm3, %v6048_v54, %v6351_v9  ;;  %v3112_v45 = vrot.slane %v2777_v27, 2  ;;  %v4125_v46 = vpop.permute.xlu1 %4124  ;;  %v6619_v54 = vsel %vm2426_vm8, %v6374_v34, 0.0 }
 0x421   : > { %v3237_v9 = vsel %vm982_vm3, 0.0, %v4121_v28  ;;  %v2916_v27 = vrot.slane %v6619_v54, 1 }
 0x423   : > { %3378 = vrot.lane.b32.xlu1 %v6515_v42, %s4191_s27  ;;  %3446 = vrot.lane.b32.xlu2 %v6518_v25, %s4194_s24 }
 0x427   : > { %3380 = vrot.lane.b32.xlu0 %v6531_v48, %s4191_s27  ;;  %v3176_v40 = vpop.permute.xlu0 %3175 }
 0x428   : > { %v6598_v10 = vsel %vm3273_vm10, %v3260_v22, %v3176_v40  ;;  %v3247_v22 = vsel %vm982_vm3, %v6069_v6, %v6405_v57  ;;  %v4122_v6 = vunpack.i.h.bf16 %v6367_v18  ;;  %v4127_v57 = vunpack.i.h.bf16 %v4125_v46 }
 0x42b   : > { %3350 = vrot.lane.b32.xlu1 %v6485_v16, %s4191_s27  ;;  %3183 = vrot.lane.b32.xlu2 %v3108_v33, %s4193_s17  ;;  %v3075_v33 = vrot.slane %v6124_v3, 2 }
 0x42d   : > { %v3076_v59 = vsel %vm640_vm1, %v3074_v1, %v3075_v33 }
 0x42f   : > { %3352 = vrot.lane.b32.xlu0 %v6518_v25, %s4191_s27  ;;  %v3148_v38 = vpop.permute.xlu0 %3147 }
 0x430   : > { %v6608_v44 = vsel %vm3273_vm10, %v3246_v60, %v3148_v38 }
 0x433   : > { %3155 = vrot.lane.b32.xlu2 %v3073_v24, %s4193_s17  ;;  %3448 = vrot.lane.b32.xlu1 %v6567_v39, %s4194_s24  ;;  %v4126_v24 = vunpack.i.l.bf16 %v4125_v46 }
 0x437   : > { %2989 = vrot.lane.b32.xlu0 %v2915_v11, %s4189_s25  ;;  %v3113_v11 = vsel %vm640_vm1, %v3110_v15, %v3112_v45  ;;  %v3178_v31 = vpop.permute.xlu0 %3177  ;;  %v3274_v15 = vsel %vm3273_vm10, %v3237_v9, %v4126_v24 }
 0x43b   : > { %2987 = vrot.lane.b32.xlu2 %v2913_v49, %s4189_s25  ;;  %3185 = vrot.lane.b32.xlu1 %v3111_v43, %s4193_s17  ;;  %v2917_v49 = vrot.slane %v6376_v23, 1 }
 0x43d   : > { %v2918_v21 = vsel %vm359_vm0, %v2916_v27, %v2917_v49 }
 0x443   : > { %3157 = vrot.lane.b32.xlu1 %v3076_v59, %s4193_s17  ;;  %3478 = vrot.lane.b32.xlu2 %v6598_v10, %s4194_s24 }
 0x44b   : > { %3382 = vrot.lane.b32.xlu1 %v6494_v5, %s4191_s27  ;;  %3450 = vrot.lane.b32.xlu2 %v6608_v44, %s4194_s24 }
 0x44d   : > { %v3343_v47 = vpop.permute.xlu2 %3342 }
 0x44e   : > { %v3536_v43 = vsel %vm1479_vm6, %v3274_v15, %v3343_v47  ;;  %v3115_v47 = vrot.slane %v6376_v23, 2 }
 0x453   : > { %3354 = vrot.lane.b32.xlu1 %v6567_v39, %s4191_s27  ;;  %3187 = vrot.lane.b32.xlu2 %v3113_v11, %s4193_s17  ;;  %v7364_v11 = vld [vmem:[#allocation38_spill] sm:$0xff] }
 0x454   : > { %v3080_v9 = vrot.slane %v7364_v11, 2 }
 0x455   : > { %v2980_v61 = vpop.permute.xlu2 %2979 }
 0x456   : > { %v3261_v34 = vsel %vm982_vm3, %v6337_v19, %v2980_v61  ;;  %v3078_v19 = vsel %vm640_vm1, %v3075_v33, %v3077_v55  ;;  %v3114_v33 = vrot.slane %v6619_v54, 2  ;;  %v7365_v61 = vld [vmem:[#allocation11_spill] sm:$0xff]  ;;  %v3238_v55 = vsel %vm982_vm3, 0.0, %v4122_v6 }
 0x457   : > { %v6633_v0 = vsel %vm3273_vm10, %v3261_v34, %v3178_v31  ;;  %v2780_v27 = vsel %vm2437_vm9, %v7365_v61, 0.0  ;;  %v3275_v34 = vsel %vm3273_vm10, %v3238_v55, %v4127_v57 }
 0x458   : > { %3480 = vrot.lane.b32.xlu0 %v6633_v0, %s4194_s24  ;;  %v3116_v24 = vsel %vm640_vm1, %v3114_v33, %v3115_v47  ;;  %v2919_v46 = vrot.slane %v2780_v27, 1 }
 0x459   : > { %v3441_v40 = vpop.permute.xlu1 %3440 }
 0x45a   : > { %v3569_v1 = vsel %vm3568_vm11, %v3536_v43, %v3441_v40  ;;  %v7366_v43 = vld [vmem:[#allocation37_spill] sm:$0xff] }
 0x45b   : > { %4048 = vmatmul.msk.f32.vlgmr.msra.gmra.mxu1 %vm3601_vm12, %v3569_v1  ;;  %2991 = vrot.lane.b32.xlu1 %v2918_v21, %s4189_s25  ;;  %v3079_v18 = vrot.slane %v7366_v43, 2 }
 0x45c   : > { %3159 = vrot.lane.b32.xlu2 %v3078_v19, %s4193_s17 }
 0x45d   : > { %v3150_v59 = vpop.permute.xlu2 %3149  ;;  %v3081_v21 = vsel %vm640_vm1, %v3079_v18, %v3080_v9 }
 0x45e   : > { %v6647_v38 = vsel %vm3273_vm10, %v3247_v22, %v3150_v59  ;;  %v2920_v22 = vsel %vm359_vm0, %v2917_v49, %v2919_v46 }
 0x460   : > { %3452 = vrot.lane.b32.xlu0 %v6647_v38, %s4194_s24 }
 0x461   : > { %v3443_v60 = vpop.permute.xlu0 %3442 }
 0x464   : > { %3384 = vrot.lane.b32.xlu2 %v6598_v10, %s4191_s27 }
 0x465   : > { %v3180_v45 = vpop.permute.xlu2 %3179 }
 0x468   : > { %3189 = vrot.lane.b32.xlu0 %v3116_v24, %s4193_s17 }
 0x469   : > { %v3347_v28 = vpop.permute.xlu0 %3346 }
 0x46a   : > { %v3538_v6 = vsel %vm1479_vm6, %v6425_v12, %v3347_v28 }
 0x46c   : > { %3356 = vrot.lane.b32.xlu2 %v6608_v44, %s4191_s27 }
 0x46d   : > { %v3445_v31 = vpop.permute.xlu2 %3444  ;;  %v3345_v15 = vpop.permute.xlu1 %3344 }
 0x46e   : > { %v3537_v40 = vsel %vm1479_vm6, %v3275_v34, %v3345_v15  ;;  %v3571_v49 = vsel %vm3568_vm11, %v3538_v6, %v3445_v31  ;;  %v2922_v31 = vrot.slane %v6403_v52, 1 }
 0x46f   : > { %v3570_v19 = vsel %vm3568_vm11, %v3537_v40, %v3443_v60  ;;  %v7367_v60 = vld [vmem:[#allocation40_spill] sm:$0xff] }
 0x470   : > { %3161 = vrot.lane.b32.xlu0 %v3081_v21, %s4193_s17  ;;  %4049 = vmatmul.msk.f32.gmra.mxu1 %vm3601_vm12, %v3570_v19 }
 0x471   : > { %v2984_v1 = vpop.permute.xlu0 %2983 }
 0x472   : > { %v3263_v18 = vsel %vm982_vm3, %v6434_v36, %v2984_v1  ;;  %v7368_v36 = vld [vmem:[#allocation41_spill] sm:$0xff]  ;;  %v7369_v1 = vld [vmem:[#allocation44_spill] sm:$0xff] }
 0x474   : > { %2993 = vrot.lane.b32.xlu2 %v2920_v22, %s4189_s25 }
 0x475   : > { %v3349_v59 = vpop.permute.xlu2 %3348  ;;  %v2982_v33 = vpop.permute.xlu1 %2981 }
 0x476   : > { %v3262_v24 = vsel %vm982_vm3, %v6296_v63, %v2982_v33  ;;  %v3248_v63 = vsel %vm982_vm3, %v6075_v4, %v7367_v60  ;;  %v3539_v12 = vsel %vm1479_vm6, %v6446_v30, %v3349_v59  ;;  %v6704_v4 = vsel %vm2426_vm8, %v6394_v50, 0.0 }
 0x477   : > { %v6679_v61 = vsel %vm3273_vm10, %v3262_v24, %v3180_v45  ;;  %v3117_v30 = vrot.slane %v2780_v27, 2  ;;  %v2921_v21 = vrot.slane %v6704_v4, 1  ;;  %v3082_v27 = vrot.slane %v7368_v36, 2 }
 0x478   : > { %3482 = vrot.lane.b32.xlu1 %v6679_v61, %s4194_s24  ;;  %3386 = vrot.lane.b32.xlu0 %v6633_v0, %s4191_s27  ;;  %v3249_v59 = vsel %vm982_vm3, %v6095_v37, %v7369_v1  ;;  %v2783_v37 = vsel %vm2437_vm9, %v6409_v32, 0.0 }
 0x479   : > { %v3154_v57 = vpop.permute.xlu0 %3153  ;;  %4050 = vmatmul.msk.f32.gmra.mxu1 %vm3601_vm12, %v3571_v49  ;;  %v3118_v26 = vsel %vm640_vm1, %v3115_v47, %v3117_v30  ;;  %v2923_v50 = vsel %vm359_vm0, %v2921_v21, %v2922_v31  ;;  %v3083_v60 = vsel %vm640_vm1, %v3080_v9, %v3082_v27 }
 0x47a   : > { %v6724_v6 = vsel %vm3273_vm10, %v3249_v59, %v3154_v57  ;;  %v2924_v57 = vrot.slane %v2783_v37, 1 }
 0x47c   : > { %v2925_v32 = vsel %vm359_vm0, %v2922_v31, %v2924_v57  ;;  %v3250_v31 = vsel %vm982_vm3, %v6097_v29, %v6422_v8 }
 0x47d   : > { %v3152_v28 = vpop.permute.xlu1 %3151  ;;  %v3447_v45 = vpop.permute.xlu2 %3446 }
 0x47e   : > { %v6693_v55 = vsel %vm3273_vm10, %v3248_v63, %v3152_v28  ;;  %v3572_v15 = vsel %vm3568_vm11, %v3539_v12, %v3447_v45  ;;  %v7370_v12 = vld [vmem:[#allocation30_spill] sm:$0xff]  ;;  %v3119_v45 = vrot.slane %v6704_v4, 2 }
 0x47f   : > { %v3255_v28 = vsel %vm982_vm3, %v6173_v41, %v7370_v12 }
 0x480   : > { %3454 = vrot.lane.b32.xlu1 %v6693_v55, %s4194_s24  ;;  %3358 = vrot.lane.b32.xlu0 %v6647_v38, %s4191_s27 }
 0x481   : > { %v2986_v34 = vpop.permute.xlu0 %2985  ;;  %4051 = vmatmul.msk.f32.gmra.mxu1 %vm3601_vm12, %v3572_v15 }
 0x482   : > { %v3264_v47 = vsel %vm982_vm3, %v6333_v17, %v2986_v34  ;;  %v3120_v17 = vrot.slane %v6403_v52, 2 }
 0x484   : > { %v3121_v62 = vsel %vm640_vm1, %v3119_v45, %v3120_v17 }
 0x485   : > { %v3182_v40 = vpop.permute.xlu1 %3181  ;;  %v3184_v46 = vpop.permute.xlu2 %3183 }
 0x486   : > { %v6711_v19 = vsel %vm3273_vm10, %v3263_v18, %v3182_v40  ;;  %v6729_v49 = vsel %vm3273_vm10, %v3264_v47, %v3184_v46  ;;  %v3256_v40 = vsel %vm982_vm3, %v6181_v13, %v6458_v7  ;;  %v3122_v13 = vrot.slane %v2783_v37, 2 }
 0x487   : > { %3484 = vrot.lane.b32.xlu2 %v6711_v19, %s4194_s24 }
 0x488   : > { %3191 = vrot.lane.b32.xlu1 %v3118_v26, %s4193_s17  ;;  %2995 = vrot.lane.b32.xlu0 %v2923_v50, %s4189_s25  ;;  %v3123_v7 = vsel %vm640_vm1, %v3120_v17, %v3122_v13  ;;  %v7371_v17 = vld [vmem:[#allocation27_spill] sm:$0xff] }
 0x489   : > { %v3477_v22 = vpop.permute.xlu0 %3476 }
 0x48d   : > { %v3166_v33 = vpop.permute.xlu1 %3165  ;;  %v3156_v24 = vpop.permute.xlu2 %3155 }
 0x48e   : > { %v6746_v9 = vsel %vm3273_vm10, %v3255_v28, %v3166_v33  ;;  %v6770_v50 = vsel %vm3273_vm10, %v3250_v31, %v3156_v24  ;;  %v6843_v31 = vld [vmem:[%s7151_s4] ss:$0 sm:$0xff] }
 0x48f   : > { %3456 = vrot.lane.b32.xlu2 %v6724_v6, %s4194_s24 }
 0x490   : > { %3163 = vrot.lane.b32.xlu1 %v3083_v60, %s4193_s17  ;;  %3486 = vrot.lane.b32.xlu0 %v6729_v49, %s4194_s24 }
 0x491   : > { %v3168_v63 = vpop.permute.xlu0 %3167 }
 0x492   : > { %v6762_v46 = vsel %vm3273_vm10, %v3256_v40, %v3168_v63 }
 0x495   : > { %v3379_v15 = vpop.permute.xlu1 %3378  ;;  %v2988_v34 = vpop.permute.xlu2 %2987 }
 0x496   : > { %v3554_v30 = vsel %vm1479_vm6, %v6746_v9, %v3379_v15  ;;  %v3265_v33 = vsel %vm982_vm3, %v6581_v2, %v2988_v34  ;;  %v3251_v2 = vsel %vm982_vm3, %v6119_v20, %v6391_v51  ;;  %v7372_v51 = vld [vmem:[#allocation28_spill] sm:$0xff]  ;;  %v7373_v15 = vld [vmem:[#allocation7_spill] sm:$0xff] }
 0x497   : > { %3193 = vrot.lane.b32.xlu2 %v3121_v62, %s4193_s17  ;;  %v3587_v18 = vsel %vm3568_vm11, %v3554_v30, %v3477_v22  ;;  %v3252_v34 = vsel %vm982_vm3, %v6124_v3, %v7373_v15 }
 0x498   : > { %3388 = vrot.lane.b32.xlu1 %v6679_v61, %s4191_s27  ;;  %2997 = vrot.lane.b32.xlu0 %v2925_v32, %s4189_s25 }
 0x499   : > { %4066 = vmatmul.msk.f32.vlgmr.msrb.gmra.mxu3 %vm3601_vm12, %v3587_v18  ;;  %v3381_v41 = vpop.permute.xlu0 %3380 }
 0x49a   : > { %v3555_v21 = vsel %vm1479_vm6, %v6762_v46, %v3381_v41 }
 0x49d   : > { %v3351_v22 = vpop.permute.xlu1 %3350  ;;  %v3479_v26 = vpop.permute.xlu2 %3478 }
 0x49e   : > { %v3588_v36 = vsel %vm3568_vm11, %v3555_v21, %v3479_v26  ;;  %v3540_v29 = vsel %vm1479_vm6, %v6399_v53, %v3351_v22  ;;  %v6850_v26 = vld [vmem:[%s7151_s4 + $0x1] ss:$0 sm:$0xff] }
 0x49f   : > { %3458 = vrot.lane.b32.xlu2 %v6770_v50, %s4194_s24 }
 0x4a0   : > { %3360 = vrot.lane.b32.xlu1 %v6693_v55, %s4191_s27 }
 0x4a1   : > { %4067 = vmatmul.msk.f32.gmra.mxu3 %vm3601_vm12, %v3588_v36  ;;  %v3353_v1 = vpop.permute.xlu0 %3352 }
 0x4a2   : > { %v3541_v53 = vsel %vm1479_vm6, %v6415_v14, %v3353_v1 }
 0x4a5   : > { %v3449_v8 = vpop.permute.xlu1 %3448  ;;  %v3451_v59 = vpop.permute.xlu2 %3450 }
 0x4a6   : > { %v3573_v27 = vsel %vm3568_vm11, %v3540_v29, %v3449_v8  ;;  %v3574_v60 = vsel %vm3568_vm11, %v3541_v53, %v3451_v59 }
 0x4a7   : > { %3195 = vrot.lane.b32.xlu2 %v3123_v7, %s4193_s17  ;;  %4052 = vmatmul.msk.f32.gmra.mxu1 %vm3601_vm12, %v3573_v27 }
 0x4a8   : > { %3390 = vrot.lane.b32.xlu1 %v6711_v19, %s4191_s27 }
 0x4a9   : > { %v2990_v57 = vpop.permute.xlu0 %2989 }
 0x4aa   : > { %v3266_v12 = vsel %vm982_vm3, %v6356_v56, %v2990_v57 }
 0x4ad   : > { %v3186_v24 = vpop.permute.xlu1 %3185  ;;  %v3188_v37 = vpop.permute.xlu2 %3187 }
 0x4ae   : > { %v6791_v47 = vsel %vm3273_vm10, %v3265_v33, %v3186_v24  ;;  %v6814_v20 = vsel %vm3273_vm10, %v3266_v12, %v3188_v37 }
 0x4af   : > { %3488 = vrot.lane.b32.xlu0 %v6791_v47, %s4194_s24  ;;  %4053 = vmatmul.msk.f32.gmra.mxu1 %vm3601_vm12, %v3574_v60 }
 0x4b0   : > { %3362 = vrot.lane.b32.xlu1 %v6724_v6, %s4191_s27 }
 0x4b5   : > { %v3158_v63 = vpop.permute.xlu1 %3157 }
 0x4b6   : > { %v6803_v14 = vsel %vm3273_vm10, %v3251_v2, %v3158_v63  ;;  %v3160_v28 = vpop.permute.xlu2 %3159 }
 0x4b7   : > { %3460 = vrot.lane.b32.xlu2 %v6803_v14, %s4194_s24  ;;  %4129 = vrot.lane.b32.xlu0 %v7371_v17, %s4189_s25  ;;  %v6826_v56 = vsel %vm3273_vm10, %v3252_v34, %v3160_v28 }
 0x4b8   : > { %3392 = vrot.lane.b32.xlu1 %v6729_v49, %s4191_s27 }
 0x4bd   : > { %v3383_v45 = vpop.permute.xlu1 %3382 }
 0x4be   : > { %v3556_v30 = vsel %vm1479_vm6, %v6515_v42, %v3383_v45  ;;  %v3385_v32 = vpop.permute.xlu2 %3384 }
 0x4bf   : > { %4134 = vrot.lane.b32.xlu2 %v7372_v51, %s4193_s17  ;;  %3490 = vrot.lane.b32.xlu0 %v6814_v20, %s4194_s24  ;;  %v3557_v60 = vsel %vm1479_vm6, %v6531_v48, %v3385_v32 }
 0x4c0   : > { %3364 = vrot.lane.b32.xlu1 %v6770_v50, %s4191_s27 }
 0x4c5   : > { %v3355_v3 = vpop.permute.xlu1 %3354 }
 0x4c6   : > { %v3542_v41 = vsel %vm1479_vm6, %v6485_v16, %v3355_v3  ;;  %v3357_v22 = vpop.permute.xlu2 %3356 }
 0x4c7   : > { %3462 = vrot.lane.b32.xlu2 %v6826_v56, %s4194_s24  ;;  %3394 = vrot.lane.b32.xlu0 %v6791_v47, %s4191_s27  ;;  %v3543_v51 = vsel %vm1479_vm6, %v6518_v25, %v3357_v22 }
 0x4ca   : > { %v3481_v62 = vpop.permute.xlu0 %3480 }
 0x4cb   : > { %v3589_v18 = vsel %vm3568_vm11, %v3556_v30, %v3481_v62 }
 0x4cc   : > { %4068 = vmatmul.msk.f32.gmra.mxu3 %vm3601_vm12, %v3589_v18 }
 0x4cd   : > { %v2992_v13 = vpop.permute.xlu1 %2991 }
 0x4ce   : > { %v3267_v8 = vsel %vm982_vm3, %v6619_v54, %v2992_v13  ;;  %v2994_v59 = vpop.permute.xlu2 %2993  ;;  %v3253_v54 = vsel %vm982_vm3, %v7366_v43, %v6443_v58 }
 0x4cf   : > { %3366 = vrot.lane.b32.xlu2 %v6803_v14, %s4191_s27  ;;  %v3268_v18 = vsel %vm982_vm3, %v6376_v23, %v2994_v59 }
 0x4d2   : > { %v3453_v40 = vpop.permute.xlu0 %3452 }
 0x4d3   : > { %v3575_v21 = vsel %vm3568_vm11, %v3542_v41, %v3453_v40 }
 0x4d4   : > { %4054 = vmatmul.msk.f32.gmra.mxu1 %vm3601_vm12, %v3575_v21 }
 0x4d8   : > { %v3715_v36 = vpop.f32.mrf.mxu1 }
 0x4d9   : > { %v3813_v16 = vmul.f32 %v6843_v31, %v3715_v36 }
 0x4da   : > { %v3190_v7 = vpop.permute.xlu0 %3189 }
 0x4db   : > { %v3847_v29 = vadd.f32 %v6850_v26, %v3813_v16  ;;  %v6863_v1 = vsel %vm3273_vm10, %v3267_v8, %v3190_v7 }
 0x4dc   : > { %3492 = vrot.lane.b32.xlu1 %v6863_v1, %s4194_s24 }
 0x4dd   : > { %v3879_v27 = vmax.f32 %v3847_v29, 0.0 }
 0x4df   : > { %3911 = vst.msk [vmem:[%s6860_s6] sm:$0xff] %vm982_vm3, %v3879_v27 }
 0x4e1   : > { %v3485_v24 = vpop.permute.xlu2 %3484 }
 0x4e2   : > { %v3162_v33 = vpop.permute.xlu0 %3161 }
 0x4e3   : > { %v6873_v53 = vsel %vm3273_vm10, %v3253_v54, %v3162_v33 }
 0x4e4   : > { %3396 = vrot.lane.b32.xlu1 %v6814_v20, %s4191_s27  ;;  %3464 = vrot.lane.b32.xlu0 %v6873_v53, %s4194_s24 }
 0x4e9   : > { %v3457_v12 = vpop.permute.xlu2 %3456 }
 0x4ea   : > { %v3483_v2 = vpop.permute.xlu1 %3482  ;;  %v3387_v63 = vpop.permute.xlu0 %3386 }
 0x4eb   : > { %v3590_v37 = vsel %vm3568_vm11, %v3557_v60, %v3483_v2  ;;  %v3558_v17 = vsel %vm1479_vm6, %v6494_v5, %v3387_v63 }
 0x4ec   : > { %4069 = vmatmul.msk.f32.gmra.mxu3 %vm3601_vm12, %v3590_v37  ;;  %3368 = vrot.lane.b32.xlu0 %v6826_v56, %s4191_s27  ;;  %v3591_v30 = vsel %vm3568_vm11, %v3558_v17, %v3485_v24 }
 0x4ed   : > { %v3718_v58 = vpop.f32.mrf.mxu1 }
 0x4ee   : > { %v3814_v43 = vmul.f32 %v6843_v31, %v3718_v58 }
 0x4f0   : > { %v3848_v57 = vadd.f32 %v6850_v26, %v3814_v43 }
 0x4f1   : > { %v3194_v40 = vpop.permute.xlu2 %3193 }
 0x4f2   : > { %v3880_v28 = vmax.f32 %v3848_v57, 0.0  ;;  %v3455_v45 = vpop.permute.xlu1 %3454  ;;  %v3359_v15 = vpop.permute.xlu0 %3358 }
 0x4f3   : > { %v3576_v34 = vsel %vm3568_vm11, %v3543_v51, %v3455_v45  ;;  %v3544_v25 = vsel %vm1479_vm6, %v6567_v39, %v3359_v15 }
 0x4f4   : > { %3912 = vst.msk [vmem:[%s6860_s6 + $0x8] sm:$0xff] %vm982_vm3, %v3880_v28  ;;  %4055 = vmatmul.msk.f32.gmra.mxu1 %vm3601_vm12, %v3576_v34  ;;  %4070 = vmatmul.msk.f32.gmra.mxu3 %vm3601_vm12, %v3591_v30  ;;  %v3577_v13 = vsel %vm3568_vm11, %v3544_v25, %v3457_v12 }
 0x4f6   : > { %v3721_v5 = vpop.f32.mrf.mxu1 }
 0x4f7   : > { %v3815_v62 = vmul.f32 %v6843_v31, %v3721_v5 }
 0x4f9   : > { %v3849_v32 = vadd.f32 %v6850_v26, %v3815_v62  ;;  %v3459_v54 = vpop.permute.xlu2 %3458 }
 0x4fa   : > { %v3192_v3 = vpop.permute.xlu1 %3191  ;;  %v2996_v41 = vpop.permute.xlu0 %2995 }
 0x4fb   : > { %v3881_v21 = vmax.f32 %v3849_v32, 0.0  ;;  %v6904_v22 = vsel %vm3273_vm10, %v3268_v18, %v3192_v3  ;;  %v3269_v36 = vsel %vm982_vm3, %v6704_v4, %v2996_v41  ;;  %v3254_v4 = vsel %vm982_vm3, %v7364_v11, %v6407_v35 }
 0x4fc   : > { %3494 = vrot.lane.b32.xlu2 %v6904_v22, %s4194_s24  ;;  %4056 = vmatmul.msk.f32.gmra.mxu1 %vm3601_vm12, %v3577_v13  ;;  %v3306_v23 = vsel %vm3273_vm10, %v3269_v36, %v3194_v40 }
 0x4fd   : > { %3913 = vst.msk [vmem:[%s6860_s6 + $0x10] sm:$0xff] %vm982_vm3, %v3881_v21  ;;  %3496 = vrot.lane.b32.xlu0 %v3306_v23, %s4194_s24 }
 0x4fe   : > { %v3724_v39 = vpop.f32.mrf.mxu1 }
 0x4ff   : > { %v3816_v16 = vmul.f32 %v6843_v31, %v3724_v39 }
 0x501   : > { %v3850_v29 = vadd.f32 %v6850_v26, %v3816_v16  ;;  %v3196_v2 = vpop.permute.xlu2 %3195 }
 0x502   : > { %v3164_v8 = vpop.permute.xlu1 %3163  ;;  %v3487_v59 = vpop.permute.xlu0 %3486 }
 0x503   : > { %v3882_v7 = vmax.f32 %v3850_v29, 0.0  ;;  %v6922_v27 = vsel %vm3273_vm10, %v3254_v4, %v3164_v8 }
 0x504   : > { %3398 = vrot.lane.b32.xlu2 %v6863_v1, %s4191_s27  ;;  %3466 = vrot.lane.b32.xlu1 %v6922_v27, %s4194_s24 }
 0x505   : > { %3914 = vst.msk [vmem:[%s6860_s6 + $0x18] sm:$0xff] %vm982_vm3, %v3882_v7  ;;  %3400 = vrot.lane.b32.xlu0 %v6904_v22, %s4191_s27 }
 0x50a   : > { %v3389_v33 = vpop.permute.xlu1 %3388  ;;  %v2998_v24 = vpop.permute.xlu0 %2997 }
 0x50b   : > { %v3559_v35 = vsel %vm1479_vm6, %v6598_v10, %v3389_v33  ;;  %v3270_v60 = vsel %vm982_vm3, %v6403_v52, %v2998_v24 }
 0x50c   : > { %3468 = vrot.lane.b32.xlu2 %v6746_v9, %s4194_s24  ;;  %3370 = vrot.lane.b32.xlu1 %v6873_v53, %s4191_s27  ;;  %v3592_v11 = vsel %vm3568_vm11, %v3559_v35, %v3487_v59  ;;  %v3307_v37 = vsel %vm3273_vm10, %v3270_v60, %v3196_v2 }
 0x50d   : > { %3470 = vrot.lane.b32.xlu0 %v6762_v46, %s4194_s24  ;;  %4071 = vmatmul.msk.f32.gmra.mxu3 %vm3601_vm12, %v3592_v11 }
 0x511   : > { %v3461_v17 = vpop.permute.xlu2 %3460 }
 0x512   : > { %v3361_v63 = vpop.permute.xlu1 %3360 }
 0x513   : > { %v3545_v10 = vsel %vm1479_vm6, %v6608_v44, %v3361_v63 }
 0x514   : > { %3372 = vrot.lane.b32.xlu2 %v6922_v27, %s4191_s27  ;;  %3498 = vrot.lane.b32.xlu1 %v3307_v37, %s4194_s24  ;;  %v3578_v58 = vsel %vm3568_vm11, %v3545_v10, %v3459_v54 }
 0x515   : > { %3374 = vrot.lane.b32.xlu0 %v6746_v9, %s4191_s27  ;;  %4057 = vmatmul.msk.f32.gmra.mxu1 %vm3601_vm12, %v3578_v58 }
 0x519   : > { %v4135_v32 = vpop.permute.xlu2 %4134 }
 0x51a   : > { %v3391_v52 = vpop.permute.xlu1 %3390  ;;  %v4137_v18 = vunpack.i.h.bf16 %v4135_v32  ;;  %v4136_v3 = vunpack.i.l.bf16 %v4135_v32 }
 0x51b   : > { %v3560_v12 = vsel %vm1479_vm6, %v6633_v0, %v3391_v52 }
 0x51c   : > { %v3769_v43 = vpop.f32.mrf.mxu3  ;;  %3402 = vrot.lane.b32.xlu1 %v3306_v23, %s4191_s27 }
 0x51d   : > { %v3831_v44 = vmul.f32 %v6843_v31, %v3769_v43 }
 0x51f   : > { %v3865_v57 = vadd.f32 %v6850_v26, %v3831_v44 }
 0x521   : > { %v3897_v51 = vmax.f32 %v3865_v57, 0.0  ;;  %v3489_v28 = vpop.permute.xlu0 %3488  ;;  %v3463_v11 = vpop.permute.xlu2 %3462 }
 0x522   : > { %v3363_v45 = vpop.permute.xlu1 %3362  ;;  %v3593_v15 = vsel %vm3568_vm11, %v3560_v12, %v3489_v28 }
 0x523   : > { %3929 = vst.msk [vmem:[%s6860_s6 + $0x90] sm:$0xff] %vm982_vm3, %v3897_v51  ;;  %v3546_v9 = vsel %vm1479_vm6, %v6647_v38, %v3363_v45  ;;  %4072 = vmatmul.msk.f32.gmra.mxu3 %vm3601_vm12, %v3593_v15 }
 0x524   : > { %v3772_v34 = vpop.f32.mrf.mxu3  ;;  %3472 = vrot.lane.b32.xlu1 %v6515_v42, %s4194_s24  ;;  %v3727_v30 = vpop.f32.mrf.mxu1  ;;  %v3579_v0 = vsel %vm3568_vm11, %v3546_v9, %v3461_v17 }
 0x525   : > { %v3832_v5 = vmul.f32 %v6843_v31, %v3772_v34  ;;  %v3817_v62 = vmul.f32 %v6843_v31, %v3727_v30  ;;  %4058 = vmatmul.msk.f32.gmra.mxu1 %vm3601_vm12, %v3579_v0 }
 0x527   : > { %v3866_v25 = vadd.f32 %v6850_v26, %v3832_v5  ;;  %v3851_v38 = vadd.f32 %v6850_v26, %v3817_v62 }
 0x529   : > { %v3898_v41 = vmax.f32 %v3866_v25, 0.0  ;;  %v3883_v42 = vmax.f32 %v3851_v38, 0.0  ;;  %v4130_v40 = vpop.permute.xlu0 %4129  ;;  %v3367_v2 = vpop.permute.xlu2 %3366 }
 0x52a   : > { %v4132_v21 = vunpack.i.h.bf16 %v4130_v40  ;;  %v4131_v36 = vunpack.i.l.bf16 %v4130_v40  ;;  %v3393_v13 = vpop.permute.xlu1 %3392  ;;  %v3548_v51 = vsel %vm1479_vm6, %v6724_v6, %v3367_v2 }
 0x52b   : > { %3930 = vst.msk [vmem:[%s6860_s6 + $0x98] sm:$0xff] %vm982_vm3, %v3898_v41  ;;  %v3561_v59 = vsel %vm1479_vm6, %v6679_v61, %v3393_v13 }
 0x52c   : > { %3915 = vst.msk [vmem:[%s6860_s6 + $0x20] sm:$0xff] %vm982_vm3, %v3883_v42  ;;  %v3272_v23 = vsel %vm982_vm3, 0.0, %v4132_v21  ;;  %v3271_v39 = vsel %vm982_vm3, 0.0, %v4131_v36  ;;  %3376 = vrot.lane.b32.xlu1 %v6762_v46, %s4191_s27  ;;  %v3730_v16 = vpop.f32.mrf.mxu1 }
 0x52d   : > { %v3818_v29 = vmul.f32 %v6843_v31, %v3730_v16  ;;  %v3309_v4 = vsel %vm3273_vm10, %v3272_v23, %v4137_v18  ;;  %v3308_v8 = vsel %vm3273_vm10, %v3271_v39, %v4136_v3 }
 0x52e   : > { %3502 = vrot.lane.b32.xlu0 %v3309_v4, %s4194_s24  ;;  %3500 = vrot.lane.b32.xlu2 %v3308_v8, %s4194_s24 }
 0x52f   : > { %v3852_v7 = vadd.f32 %v6850_v26, %v3818_v29 }
 0x531   : > { %v3884_v54 = vmax.f32 %v3852_v7, 0.0  ;;  %v3491_v33 = vpop.permute.xlu0 %3490 }
 0x532   : > { %v3365_v35 = vpop.permute.xlu1 %3364  ;;  %v3594_v46 = vsel %vm3568_vm11, %v3561_v59, %v3491_v33 }
 0x533   : > { %3916 = vst.msk [vmem:[%s6860_s6 + $0x28] sm:$0xff] %vm982_vm3, %v3884_v54  ;;  %v3547_v24 = vsel %vm1479_vm6, %v6693_v55, %v3365_v35  ;;  %4073 = vmatmul.msk.f32.gmra.mxu3 %vm3601_vm12, %v3594_v46 }
 0x534   : > { %v3580_v60 = vsel %vm3568_vm11, %v3547_v24, %v3463_v11 }
 0x535   : > { %4059 = vmatmul.msk.f32.gmra.mxu1 %vm3601_vm12, %v3580_v60 }
 0x536   : > { %3404 = vrot.lane.b32.xlu2 %v3307_v37, %s4191_s27 }
 0x539   : > { %v3395_v61 = vpop.permute.xlu0 %3394 }
 0x53a   : > { %v3562_v63 = vsel %vm1479_vm6, %v6711_v19, %v3395_v61 }
 0x53e   : > { %3474 = vrot.lane.b32.xlu2 %v6531_v48, %s4194_s24 }
 0x54e   : > { %v3493_v10 = vpop.permute.xlu1 %3492 }
 0x54f   : > { %v3775_v58 = vpop.f32.mrf.mxu3  ;;  %v3595_v55 = vsel %vm3568_vm11, %v3562_v63, %v3493_v10 }
 0x550   : > { %v3833_v52 = vmul.f32 %v6843_v31, %v3775_v58  ;;  %4074 = vmatmul.msk.f32.gmra.mxu3 %vm3601_vm12, %v3595_v55 }
 0x551   : > { %v3733_v43 = vpop.f32.mrf.mxu1 }
 0x552   : > { %v3867_v37 = vadd.f32 %v6850_v26, %v3833_v52  ;;  %v3819_v44 = vmul.f32 %v6843_v31, %v3733_v43 }
 0x554   : > { %v3899_v48 = vmax.f32 %v3867_v37, 0.0  ;;  %v3853_v17 = vadd.f32 %v6850_v26, %v3819_v44 }
 0x556   : > { %3931 = vst.msk [vmem:[%s6860_s6 + $0xa0] sm:$0xff] %vm982_vm3, %v3899_v48  ;;  %v3885_v19 = vmax.f32 %v3853_v17, 0.0  ;;  %v3495_v57 = vpop.permute.xlu2 %3494  ;;  %v3397_v12 = vpop.permute.xlu1 %3396 }
 0x557   : > { %v3563_v28 = vsel %vm1479_vm6, %v6729_v49, %v3397_v12  ;;  %v3465_v45 = vpop.permute.xlu0 %3464 }
 0x558   : > { %3917 = vst.msk [vmem:[%s6860_s6 + $0x30] sm:$0xff] %vm982_vm3, %v3885_v19  ;;  %v3581_v15 = vsel %vm3568_vm11, %v3548_v51, %v3465_v45  ;;  %v3596_v9 = vsel %vm3568_vm11, %v3563_v28, %v3495_v57 }
 0x559   : > { %4060 = vmatmul.msk.f32.gmra.mxu1 %vm3601_vm12, %v3581_v15  ;;  %4075 = vmatmul.msk.f32.gmra.mxu3 %vm3601_vm12, %v3596_v9 }
 0x55e   : > { %v3399_v30 = vpop.permute.xlu2 %3398 }
 0x55f   : > { %v3369_v34 = vpop.permute.xlu0 %3368  ;;  %v3564_v6 = vsel %vm1479_vm6, %v6791_v47, %v3399_v30 }
 0x560   : > { %v3549_v47 = vsel %vm1479_vm6, %v6770_v50, %v3369_v34 }
 0x566   : > { %v3469_v13 = vpop.permute.xlu2 %3468 }
 0x56e   : > { %v3373_v33 = vpop.permute.xlu2 %3372 }
 0x56f   : > { %v3778_v0 = vpop.f32.mrf.mxu3  ;;  %v3497_v49 = vpop.permute.xlu0 %3496  ;;  %v3551_v24 = vsel %vm1479_vm6, %v6826_v56, %v3373_v33 }
 0x570   : > { %v3834_v5 = vmul.f32 %v6843_v31, %v3778_v0  ;;  %v3597_v62 = vsel %vm3568_vm11, %v3564_v6, %v3497_v49 }
 0x571   : > { %v3736_v25 = vpop.f32.mrf.mxu1  ;;  %4076 = vmatmul.msk.f32.gmra.mxu3 %vm3601_vm12, %v3597_v62 }
 0x572   : > { %v3868_v38 = vadd.f32 %v6850_v26, %v3834_v5  ;;  %v3820_v32 = vmul.f32 %v6843_v31, %v3736_v25 }
 0x574   : > { %v3900_v18 = vmax.f32 %v3868_v38, 0.0  ;;  %v3854_v3 = vadd.f32 %v6850_v26, %v3820_v32 }
 0x576   : > { %3932 = vst.msk [vmem:[%s6860_s6 + $0xa8] sm:$0xff] %vm982_vm3, %v3900_v18  ;;  %v3886_v41 = vmax.f32 %v3854_v3, 0.0  ;;  %v3467_v42 = vpop.permute.xlu1 %3466 }
 0x577   : > { %v3781_v40 = vpop.f32.mrf.mxu3  ;;  %v3582_v21 = vsel %vm3568_vm11, %v3549_v47, %v3467_v42  ;;  %v3401_v16 = vpop.permute.xlu0 %3400 }
 0x578   : > { %3918 = vst.msk [vmem:[%s6860_s6 + $0x38] sm:$0xff] %vm982_vm3, %v3886_v41  ;;  %v3835_v36 = vmul.f32 %v6843_v31, %v3781_v40  ;;  %4061 = vmatmul.msk.f32.gmra.mxu1 %vm3601_vm12, %v3582_v21  ;;  %v3565_v46 = vsel %vm1479_vm6, %v6814_v20, %v3401_v16 }
 0x579   : > { %v3739_v23 = vpop.f32.mrf.mxu1 }
 0x57a   : > { %v3869_v39 = vadd.f32 %v6850_v26, %v3835_v36  ;;  %v3821_v50 = vmul.f32 %v6843_v31, %v3739_v23 }
 0x57c   : > { %v3901_v29 = vmax.f32 %v3869_v39, 0.0  ;;  %v3855_v4 = vadd.f32 %v6850_v26, %v3821_v50 }
 0x57e   : > { %3933 = vst.msk [vmem:[%s6860_s6 + $0xb0] sm:$0xff] %vm982_vm3, %v3901_v29  ;;  %v3887_v8 = vmax.f32 %v3855_v4, 0.0  ;;  %v3371_v7 = vpop.permute.xlu1 %3370 }
 0x57f   : > { %v3550_v59 = vsel %vm1479_vm6, %v6803_v14, %v3371_v7  ;;  %v3471_v35 = vpop.permute.xlu0 %3470 }
 0x580   : > { %3919 = vst.msk [vmem:[%s6860_s6 + $0x40] sm:$0xff] %vm982_vm3, %v3887_v8  ;;  %v3583_v54 = vsel %vm3568_vm11, %v3550_v59, %v3469_v13  ;;  %v3584_v14 = vsel %vm3568_vm11, %v3551_v24, %v3471_v35 }
 0x581   : > { %4062 = vmatmul.msk.f32.gmra.mxu1 %vm3601_vm12, %v3583_v54 }
 0x586   : > { %v3499_v11 = vpop.permute.xlu1 %3498 }
 0x587   : > { %v3598_v60 = vsel %vm3568_vm11, %v3565_v46, %v3499_v11  ;;  %v3375_v55 = vpop.permute.xlu0 %3374 }
 0x588   : > { %4077 = vmatmul.msk.f32.gmra.mxu3 %vm3601_vm12, %v3598_v60  ;;  %v3501_v61 = vpop.permute.xlu2 %3500 }
 0x589   : > { %4063 = vmatmul.msk.f32.gmra.mxu1 %vm3601_vm12, %v3584_v14 }
 0x58e   : > { %v3403_v2 = vpop.permute.xlu1 %3402 }
 0x58f   : > { %v3566_v63 = vsel %vm1479_vm6, %v6863_v1, %v3403_v2  ;;  %v3552_v1 = vsel %vm1479_vm6, %v6873_v53, %v3375_v55 }
 0x590   : > { %v3784_v10 = vpop.f32.mrf.mxu3  ;;  %v3599_v20 = vsel %vm3568_vm11, %v3566_v63, %v3501_v61  ;;  %v3405_v44 = vpop.permute.xlu2 %3404 }
 0x591   : > { %v3836_v56 = vmul.f32 %v6843_v31, %v3784_v10  ;;  %4078 = vmatmul.msk.f32.gmra.mxu3 %vm3601_vm12, %v3599_v20  ;;  %v3567_v53 = vsel %vm1479_vm6, %v6904_v22, %v3405_v44 }
 0x592   : > { %v3742_v58 = vpop.f32.mrf.mxu1 }
 0x593   : > { %v3870_v52 = vadd.f32 %v6850_v26, %v3836_v56  ;;  %v3822_v43 = vmul.f32 %v6843_v31, %v3742_v58 }
 0x595   : > { %v3902_v37 = vmax.f32 %v3870_v52, 0.0  ;;  %v3856_v48 = vadd.f32 %v6850_v26, %v3822_v43 }
 0x596   : > { %v3473_v17 = vpop.permute.xlu1 %3472 }
 0x597   : > { %3934 = vst.msk [vmem:[%s6860_s6 + $0xb8] sm:$0xff] %vm982_vm3, %v3902_v37  ;;  %v3888_v19 = vmax.f32 %v3856_v48, 0.0  ;;  %v3585_v57 = vsel %vm3568_vm11, %v3552_v1, %v3473_v17 }
 0x598   : > { %4064 = vmatmul.msk.f32.gmra.mxu1 %vm3601_vm12, %v3585_v57  ;;  %v3475_v51 = vpop.permute.xlu2 %3474 }
 0x599   : > { %3920 = vst.msk [vmem:[%s6860_s6 + $0x48] sm:$0xff] %vm982_vm3, %v3888_v19 }
 0x59e   : > { %v3377_v12 = vpop.permute.xlu1 %3376 }
 0x59f   : > { %v3553_v28 = vsel %vm1479_vm6, %v6922_v27, %v3377_v12 }
 0x5a0   : > { %v3503_v45 = vpop.permute.xlu0 %3502  ;;  %v3586_v15 = vsel %vm3568_vm11, %v3553_v28, %v3475_v51 }
 0x5a1   : > { %4065 = vmatmul.msk.f32.gmra.mxu1 %vm3601_vm12, %v3586_v15  ;;  %v3600_v9 = vsel %vm3568_vm11, %v3567_v53, %v3503_v45 }
 0x5a2   : > { %v3745_v34 = vpop.f32.mrf.mxu1  ;;  %4079 = vmatmul.msk.f32.gmra.mxu3 %vm3601_vm12, %v3600_v9 }
 0x5a3   : > { %v3823_v30 = vmul.f32 %v6843_v31, %v3745_v34 }
 0x5a5   : > { %v3857_v6 = vadd.f32 %v6850_v26, %v3823_v30 }
 0x5a6   : > { %v3787_v27 = vpop.f32.mrf.mxu3 }
 0x5a7   : > { %v3889_v0 = vmax.f32 %v3857_v6, 0.0  ;;  %v3837_v22 = vmul.f32 %v6843_v31, %v3787_v27 }
 0x5a9   : > { %3921 = vst.msk [vmem:[%s6860_s6 + $0x50] sm:$0xff] %vm982_vm3, %v3889_v0  ;;  %v3871_v49 = vadd.f32 %v6850_v26, %v3837_v22 }
 0x5ab   : > { %v3903_v5 = vmax.f32 %v3871_v49, 0.0 }
 0x5ad   : > { %3935 = vst.msk [vmem:[%s6860_s6 + $0xc0] sm:$0xff] %vm982_vm3, %v3903_v5 }
 0x5b2   : > { %v3748_v62 = vpop.f32.mrf.mxu1 }
 0x5b3   : > { %v3824_v25 = vmul.f32 %v6843_v31, %v3748_v62 }
 0x5b5   : > { %v3858_v38 = vadd.f32 %v6850_v26, %v3824_v25 }
 0x5b6   : > { %v3790_v32 = vpop.f32.mrf.mxu3 }
 0x5b7   : > { %v3890_v18 = vmax.f32 %v3858_v38, 0.0  ;;  %v3838_v3 = vmul.f32 %v6843_v31, %v3790_v32 }
 0x5b9   : > { %3922 = vst.msk [vmem:[%s6860_s6 + $0x58] sm:$0xff] %vm982_vm3, %v3890_v18  ;;  %v3872_v47 = vadd.f32 %v6850_v26, %v3838_v3 }
 0x5bb   : > { %v3904_v41 = vmax.f32 %v3872_v47, 0.0 }
 0x5bd   : > { %3936 = vst.msk [vmem:[%s6860_s6 + $0xc8] sm:$0xff] %vm982_vm3, %v3904_v41 }
 0x5d3   : > { %v3793_v42 = vpop.f32.mrf.mxu3 }
 0x5d4   : > { %v3839_v40 = vmul.f32 %v6843_v31, %v3793_v42 }
 0x5d6   : > { %v3873_v21 = vadd.f32 %v6850_v26, %v3839_v40  ;;  %v3751_v36 = vpop.f32.mrf.mxu1 }
 0x5d7   : > { %v3825_v13 = vmul.f32 %v6843_v31, %v3751_v36 }
 0x5d8   : > { %v3905_v23 = vmax.f32 %v3873_v21, 0.0 }
 0x5d9   : > { %v3859_v39 = vadd.f32 %v6850_v26, %v3825_v13 }
 0x5da   : > { %3937 = vst.msk [vmem:[%s6860_s6 + $0xd0] sm:$0xff] %vm982_vm3, %v3905_v23 }
 0x5db   : > { %v3891_v50 = vmax.f32 %v3859_v39, 0.0 }
 0x5dc   : > { %v3796_v16 = vpop.f32.mrf.mxu3 }
 0x5dd   : > { %3923 = vst.msk [vmem:[%s6860_s6 + $0x60] sm:$0xff] %vm982_vm3, %v3891_v50  ;;  %v3840_v29 = vmul.f32 %v6843_v31, %v3796_v16 }
 0x5df   : > { %v3874_v4 = vadd.f32 %v6850_v26, %v3840_v29 }
 0x5e1   : > { %v3906_v8 = vmax.f32 %v3874_v4, 0.0 }
 0x5e3   : > { %3938 = vst.msk [vmem:[%s6860_s6 + $0xd8] sm:$0xff] %vm982_vm3, %v3906_v8 }
 0x5f4   : > { %v3799_v7 = vpop.f32.mrf.mxu3 }
 0x5f5   : > { %v3841_v59 = vmul.f32 %v6843_v31, %v3799_v7  ;;  %v3754_v54 = vpop.f32.mrf.mxu1 }
 0x5f6   : > { %v3826_v33 = vmul.f32 %v6843_v31, %v3754_v54 }
 0x5f7   : > { %v3875_v35 = vadd.f32 %v6850_v26, %v3841_v59 }
 0x5f8   : > { %v3860_v46 = vadd.f32 %v6850_v26, %v3826_v33 }
 0x5f9   : > { %v3907_v11 = vmax.f32 %v3875_v35, 0.0 }
 0x5fa   : > { %v3892_v24 = vmax.f32 %v3860_v46, 0.0 }
 0x5fb   : > { %3939 = vst.msk [vmem:[%s6860_s6 + $0xe0] sm:$0xff] %vm982_vm3, %v3907_v11 }
 0x5fc   : > { %3924 = vst.msk [vmem:[%s6860_s6 + $0x68] sm:$0xff] %vm982_vm3, %v3892_v24 }
 0x5fe   : > { %v3757_v60 = vpop.f32.mrf.mxu1 }
 0x5ff   : > { %v3827_v14 = vmul.f32 %v6843_v31, %v3757_v60 }
 0x601   : > { %v3861_v61 = vadd.f32 %v6850_v26, %v3827_v14 }
 0x603   : > { %v3893_v2 = vmax.f32 %v3861_v61, 0.0 }
 0x605   : > { %3925 = vst.msk [vmem:[%s6860_s6 + $0x70] sm:$0xff] %vm982_vm3, %v3893_v2 }
 0x606   : > { %v3760_v63 = vpop.f32.mrf.mxu1 }
 0x607   : > { %v3828_v10 = vmul.f32 %v6843_v31, %v3760_v63 }
 0x609   : > { %v3862_v20 = vadd.f32 %v6850_v26, %v3828_v10 }
 0x60b   : > { %v3894_v56 = vmax.f32 %v3862_v20, 0.0  ;;  %v3802_v58 = vpop.f32.mrf.mxu3 }
 0x60c   : > { %v3842_v55 = vmul.f32 %v6843_v31, %v3802_v58 }
 0x60d   : > { %3926 = vst.msk [vmem:[%s6860_s6 + $0x78] sm:$0xff] %vm982_vm3, %v3894_v56 }
 0x60e   : > { %v3876_v52 = vadd.f32 %v6850_v26, %v3842_v55 }
 0x610   : > { %v3908_v43 = vmax.f32 %v3876_v52, 0.0 }
 0x612   : > { %3940 = vst.msk [vmem:[%s6860_s6 + $0xe8] sm:$0xff] %vm982_vm3, %v3908_v43 }
 0x614   : > { %v3805_v37 = vpop.f32.mrf.mxu3 }
 0x615   : > { %v3843_v44 = vmul.f32 %v6843_v31, %v3805_v37  ;;  %v3763_v48 = vpop.f32.mrf.mxu1 }
 0x616   : > { %v3829_v1 = vmul.f32 %v6843_v31, %v3763_v48 }
 0x617   : > { %v3877_v17 = vadd.f32 %v6850_v26, %v3843_v44 }
 0x618   : > { %v3863_v19 = vadd.f32 %v6850_v26, %v3829_v1 }
 0x619   : > { %v3909_v57 = vmax.f32 %v3877_v17, 0.0 }
 0x61a   : > { %v3895_v12 = vmax.f32 %v3863_v19, 0.0 }
 0x61b   : > { %3941 = vst.msk [vmem:[%s6860_s6 + $0xf0] sm:$0xff] %vm982_vm3, %v3909_v57 }
 0x61c   : > { %3927 = vst.msk [vmem:[%s6860_s6 + $0x80] sm:$0xff] %vm982_vm3, %v3895_v12 }
 0x61e   : > { %v3766_v51 = vpop.f32.mrf.mxu1 }
 0x61f   : > { %v3830_v28 = vmul.f32 %v6843_v31, %v3766_v51 }
 0x621   : > { %v3864_v53 = vadd.f32 %v6850_v26, %v3830_v28 }
 0x623   : > { %v3896_v45 = vmax.f32 %v3864_v53, 0.0 }
 0x625   : > { %3928 = vst.msk [vmem:[%s6860_s6 + $0x88] sm:$0xff] %vm982_vm3, %v3896_v45  ;;  %v3808_v15 = vpop.f32.mrf.mxu3 }
 0x626   : > { %v3844_v9 = vmul.f32 %v6843_v31, %v3808_v15 }
 0x628   : > { %v3878_v34 = vadd.f32 %v6850_v26, %v3844_v9 }
 0x62a   : > { %v3910_v30 = vmax.f32 %v3878_v34, 0.0 }
 0x62c   : > { %3942 = vst.msk [vmem:[%s6860_s6 + $0xf8] sm:$0xff] %vm982_vm3, %v3910_v30 }
 0x62d PF: > { %s15_s18 = sadd.s32 1, %s4186_s18  }
 0x62e   : > { %p12_p4 = scmp.ge.s32.totalorder %s15_s18, 4  }
 0x630   :  { %14 = sbr.rel (!%p12_p4) target bundleno = 1 (0x1), region = 84 }

</bundles_post_ra>
